<compile_context>
chip_gen: v5e
topology: v5e:2x2
jax: 0.10.0
libtpu: 0.0.40
codegen_flags: <defaults>
</compile_context>

<pallas_src>
import functools
import numpy as np
import jax
import jax.numpy as jnp
from jax.experimental import pallas as pl
from jax.experimental.pallas import tpu as pltpu

_EPS = 1e-5
_PAD = 8        # zero-border rows in the H-shift scratch (max needed offset is 3)


# ---------------------------------------------------------------------------
# Fused kernel: interprets a static "program" of conv / affine / sum ops.
# ---------------------------------------------------------------------------

def _banded_conv(act_f32, w_ref, b_ref, pad_ref, meta, H, WC):
    """One 'same'-padded (dilated) conv as a single MXU matmul.

    act_f32: [H, W*Cin] f32 value (lane-dense).
    w_ref:   stacked banded weights [R_total, W*Cout] bf16 (VMEM resident).
    b_ref:   per-layer bias rows [n_layers, W*Cout] f32.
    pad_ref: [H + 2*_PAD, WC] f32 scratch with permanently-zero border rows.
    """
    oh_list = meta['oh']                      # per-kh-tap row offsets
    if len(oh_list) == 1 and oh_list[0] == 0:
        patch = act_f32.astype(jnp.bfloat16)                       # [H, WC]
    else:
        pad_ref[_PAD:_PAD + H, :] = act_f32                        # aligned store
        pieces = [pad_ref[_PAD + oh:_PAD + oh + H, :] for oh in oh_list]
        patch = jnp.concatenate(pieces, axis=-1).astype(jnp.bfloat16)
    rows = len(oh_list) * WC
    r0 = meta['row_off']
    w = w_ref[r0:r0 + rows, :]                                     # [rows, WC] bf16
    out = jnp.dot(patch, w, preferred_element_type=jnp.float32)    # [H, WC] f32
    bi = meta['bias_idx']
    out = out + b_ref[bi:bi + 1, :]
    if meta['relu']:
        out = jnp.maximum(out, 0.0)
    return out


def _fused_kernel(x_ref, w_ref, b_ref, a_ref, o_ref, pad_ref, *, ops, H, WC):
    # Zero only the border rows of the shift scratch (interior rows are fully
    # overwritten by every conv layer).
    pad_ref[0:_PAD, :] = jnp.zeros((_PAD, WC), jnp.float32)
    pad_ref[_PAD + H:_PAD + H + _PAD, :] = jnp.zeros((_PAD, WC), jnp.float32)

    env = {'in': x_ref[0].astype(jnp.float32)}          # [H, WC] f32
    for op in ops:
        kind, src, dst = op[0], op[1], op[2]
        if kind == 'affine':
            si, ti = op[3], op[4]
            env[dst] = env[src] * a_ref[si:si + 1, :] + a_ref[ti:ti + 1, :]
        elif kind == 'conv':
            env[dst] = _banded_conv(env[src], w_ref, b_ref, pad_ref, op[3], H, WC)
        else:  # 'sum'
            acc = env[src[0]]
            for s in src[1:]:
                acc = acc + env[s]
            env[dst] = acc
    o_ref[0] = env[ops[-1][2]].astype(o_ref.dtype)


def _fused_forward(x, weights, biases, affines, ops):
    """x: [N, H, W*C] f32 lane-dense.  One pallas_call for the whole block."""
    N, H, WC = x.shape
    kern = functools.partial(_fused_kernel, ops=ops, H=H, WC=WC)
    return pl.pallas_call(
        kern,
        out_shape=jax.ShapeDtypeStruct((N, H, WC), jnp.float32),
        grid=(N,),
        in_specs=[
            pl.BlockSpec((1, H, WC), lambda n: (n, 0, 0)),
            pl.BlockSpec(weights.shape, lambda n: (0, 0)),   # VMEM-resident
            pl.BlockSpec(biases.shape, lambda n: (0, 0)),
            pl.BlockSpec(affines.shape, lambda n: (0, 0)),
        ],
        out_specs=pl.BlockSpec((1, H, WC), lambda n: (n, 0, 0)),
        scratch_shapes=[pltpu.VMEM((H + 2 * _PAD, WC), jnp.float32)],
        compiler_params=pltpu.CompilerParams(
            dimension_semantics=("parallel",)),
    )(x, weights, biases, affines)


# ---------------------------------------------------------------------------
# Host-side parameter construction (deterministic, numpy).
# ---------------------------------------------------------------------------

def _conv_params(rng, cin, cout, kh, kw):
    bound = 1.0 / np.sqrt(cin * kh * kw)
    w = rng.uniform(-bound, bound, (kh, kw, cin, cout)).astype(np.float32)
    b = rng.uniform(-bound, bound, (cout,)).astype(np.float32)
    return w, b


def _bn_params(rng, c):
    # Eval-mode BatchNorm2d reduced to per-channel (scale, shift).
    gamma = rng.uniform(0.5, 1.5, c).astype(np.float32)
    beta = (0.1 * rng.standard_normal(c)).astype(np.float32)
    mean = (0.1 * rng.standard_normal(c)).astype(np.float32)
    var = rng.uniform(0.5, 1.5, c).astype(np.float32)
    scale = (gamma / np.sqrt(var + _EPS)).astype(np.float32)
    shift = (beta - mean * scale).astype(np.float32)
    return scale, shift


def _fold_bn(w, b, bn):
    """Fold an eval-mode BN that follows the conv into (w, b) — exact."""
    if bn is None:
        return w, b
    s, t = bn
    return w * s[None, None, None, :], b * s + t


class _Builder:
    """Accumulates banded weights / biases / affines and a static op program."""

    def __init__(self, width, channels):
        self.W, self.C = width, channels
        self.WC = width * channels
        self.w_mats, self.b_rows, self.a_rows = [], [], []
        self.ops = []
        self._nreg = 0
        self._rows = 0
        self.cur = 'in'

    def _new(self):
        self._nreg += 1
        return 'r%d' % self._nreg

    def affine(self, scale, shift, src=None):
        src = self.cur if src is None else src
        si = len(self.a_rows)
        self.a_rows.append(np.tile(scale.astype(np.float32), self.W))
        ti = len(self.a_rows)
        self.a_rows.append(np.tile(shift.astype(np.float32), self.W))
        dst = self._new()
        self.ops.append(('affine', src, dst, si, ti))
        self.cur = dst
        return dst

    def conv(self, w, b, dilation, relu, src=None):
        src = self.cur if src is None else src
        Kh, Kw, Cin, Cout = w.shape
        assert Cin == self.C and Cout == self.C, "homogeneous channels only"
        dh, dw = dilation
        ph = (dh * (Kh - 1)) // 2        # PyTorch padding='same' left pad
        pw = (dw * (Kw - 1)) // 2
        W, WC = self.W, self.WC
        # Banded (Toeplitz) matrix per kh tap: [W*Cin, W*Cout]; zero-padding
        # along W is baked in (out-of-range columns simply have no band).
        M = np.zeros((Kh, WC, WC), np.float32)
        for kh in range(Kh):
            for kw in range(Kw):
                off = kw * dw - pw
                for wo in range(W):
                    wi = wo + off
                    if 0 <= wi < W:
                        M[kh, wi * Cin:(wi + 1) * Cin,
                          wo * Cout:(wo + 1) * Cout] = w[kh, kw]
        meta = dict(row_off=self._rows,
                    oh=tuple(int(kh * dh - ph) for kh in range(Kh)),
                    bias_idx=len(self.b_rows),
                    relu=bool(relu))
        self.w_mats.append(M.reshape(Kh * WC, WC))
        self.b_rows.append(np.tile(b.astype(np.float32), W))
        self._rows += Kh * WC
        dst = self._new()
        self.ops.append(('conv', src, dst, meta))
        self.cur = dst
        return dst

    def sum(self, srcs):
        dst = self._new()
        self.ops.append(('sum', tuple(srcs), dst))
        self.cur = dst
        return dst


# ---------------------------------------------------------------------------
# Block emitters (mirror the PyTorch modules, eval mode).
# ---------------------------------------------------------------------------

def _emit_conv_bn_relu(b, rng, cin, cout, kh, kw, dil, bn=True, relu=True, src=None):
    w, bias = _conv_params(rng, cin, cout, kh, kw)
    bnp = _bn_params(rng, cout) if bn else None
    wf, bf = _fold_bn(w, bias, bnp)
    return b.conv(wf, bf, dil, relu, src=src)


def _emit_widescope(b, rng, filters, out):
    _emit_conv_bn_relu(b, rng, filters, out, 3, 3, (1, 1))
    _emit_conv_bn_relu(b, rng, out, out, 3, 3, (2, 2))
    _emit_conv_bn_relu(b, rng, out, out, 3, 3, (3, 3))
    return b.cur


def _emit_midscope(b, rng, filters, out):
    _emit_conv_bn_relu(b, rng, filters, out, 3, 3, (1, 1))
    _emit_conv_bn_relu(b, rng, out, out, 3, 3, (2, 2))
    return b.cur


def _emit_separated(b, rng, filters, out, size):
    _emit_conv_bn_relu(b, rng, filters, out, 1, size, (1, 1))
    _emit_conv_bn_relu(b, rng, out, out, size, 1, (1, 1))
    return b.cur


def _emit_resnet(b, rng, filters, out, dil):
    src = b.cur
    # conv_block1: 1x1 conv (no BN) + ReLU
    w, bias = _conv_params(rng, filters, out, 1, 1)
    skip = b.conv(w, bias, (dil, dil), relu=True, src=src)
    # conv_block2: 1x1+BN+ReLU, 3x3+BN+ReLU
    _emit_conv_bn_relu(b, rng, filters, out, 1, 1, (dil, dil), src=src)
    _emit_conv_bn_relu(b, rng, out, out, 3, 3, (dil, dil))
    main = b.cur
    b.sum((main, skip))
    sc, sh = _bn_params(rng, out)           # conv_final BatchNorm
    b.affine(sc, sh)
    return b.cur


def _emit_resnet_chain(b, rng, filters, out, repeat):
    for _ in range(repeat):
        _emit_resnet(b, rng, filters, out, 1)
    return b.cur


def _emit_double_conv(b, rng, filters, out, dil):
    # TODO(synk): reference ctor is buggy (missing arg + nn.Batchnorm2d typo);
    # implemented with the corrected, evidently-intended signature.
    _emit_conv_bn_relu(b, rng, filters, out, 3, 3, (dil, dil))
    _emit_conv_bn_relu(b, rng, out, out, 3, 3, (dil, dil))
    return b.cur


def _emit_duckv2(b, rng, filters, out, size):
    # x_0 BN kept as an explicit in-VMEM affine (NOT folded into padded convs)
    # so that zero padding is applied after the BN — border-correct.
    sc0, sh0 = _bn_params(rng, filters)
    x0 = b.affine(sc0, sh0)
    parts = []
    b.cur = x0
    parts.append(_emit_widescope(b, rng, filters, out))            # x_1
    b.cur = x0
    parts.append(_emit_midscope(b, rng, filters, out))             # x_2
    b.cur = x0
    parts.append(_emit_resnet_chain(b, rng, filters, out, 1))      # x_3
    b.cur = x0
    parts.append(_emit_resnet_chain(b, rng, filters, out, 2))      # x_4
    b.cur = x0
    parts.append(_emit_resnet_chain(b, rng, filters, out, 3))      # x_5
    b.cur = x0
    parts.append(_emit_separated(b, rng, filters, out, 6))         # x_6 (size=6)
    b.sum(tuple(parts))
    sc7, sh7 = _bn_params(rng, out)                                # x_7 BN
    b.affine(sc7, sh7)
    return b.cur


# ---------------------------------------------------------------------------
# Public module: JAX/Pallas equivalent of PyTorch conv_block_2D (eval mode).
# ---------------------------------------------------------------------------

class ConvBlock2D:
    """Whole block is executed by ONE fused pallas_call per forward."""

    def __init__(self, rng, filters, block_type, repeat=1, dilation_rate=1,
                 size=3, padding='same', half_channel=False, *, width):
        if half_channel:
            # TODO(synk): half_channel narrows Cout mid-block (sub-128-lane
            # activations); not exercised by this test, not implemented.
            raise NotImplementedError("half_channel=True not supported")
        b = _Builder(width, filters)
        for _ in range(repeat):
            if block_type == 'separated':
                _emit_separated(b, rng, filters, filters, size)
            elif block_type == 'duckv2':
                _emit_duckv2(b, rng, filters, filters, size)
            elif block_type == 'midscope':
                _emit_midscope(b, rng, filters, filters)
            elif block_type == 'widescope':
                _emit_widescope(b, rng, filters, filters)
            elif block_type == 'resnet':
                _emit_resnet(b, rng, filters, filters, dilation_rate)
            elif block_type == 'conv':
                w, bias = _conv_params(rng, filters, filters, size, size)
                b.conv(w, bias, (1, 1), relu=True)
            elif block_type == 'double_convolution':
                _emit_double_conv(b, rng, filters, filters, dilation_rate)
            else:
                print('HERE')
        self.ops = tuple(b.ops)
        self.weights = jnp.asarray(np.concatenate(b.w_mats, axis=0),
                                   dtype=jnp.bfloat16)             # [R, W*C]
        self.biases = jnp.asarray(np.stack(b.b_rows, axis=0),
                                  dtype=jnp.float32)               # [n_layers, W*C]
        a = (np.stack(b.a_rows, axis=0) if b.a_rows
             else np.zeros((1, b.WC), np.float32))
        self.affines = jnp.asarray(a, dtype=jnp.float32)           # [n_aff, W*C]
        self.channels = filters
        self.width = width

    def __call__(self, x):
        """x: [N, H, W*C] f32 lane-dense activation."""
        return _fused_forward(x, self.weights, self.biases, self.affines, self.ops)


# ---------------------------------------------------------------------------

if __name__ == "__main__":
    N, C, H, W = 2, 8, 16, 16                                  # W*C = 128 lanes

    # Deterministic input (PyTorch NCHW layout), then lane-dense [N, H, W*C].
    x_nchw = jax.random.normal(jax.random.PRNGKey(0), (N, C, H, W), jnp.float32)
    x = jnp.transpose(x_nchw, (0, 2, 3, 1)).reshape(N, H, W * C)

    # conv_block_2D(filters=8, block_type='duckv2', repeat=1) — exercises
    # widescope / midscope / resnet(x1..x3) / separated / BN / sum paths.
    rng = np.random.default_rng(0)
    model = ConvBlock2D(rng, filters=C, block_type='duckv2', repeat=1, size=3,
                        width=W)

    fwd = jax.jit(lambda inp: model(inp))
    y = fwd(x)                                                 # [N, H, W*C] f32
    y_nchw = jnp.transpose(y.reshape(N, H, W, C), (0, 3, 1, 2))
    jax.block_until_ready(y_nchw)

    assert y_nchw.shape == (N, C, H, W), y_nchw.shape
    assert bool(jnp.all(jnp.isfinite(y_nchw)))
    print("KERNEL_OK")
</pallas_src>

<mosaic_0001>
module attributes {stable_mosaic.version = 11 : i64} {
  func.func @_fused_kernel(%arg0: i32, %arg1: memref<1x16x128xf32, #tpu.memory_space<vmem>>, %arg2: memref<6656x128xbf16, #tpu.memory_space<vmem>>, %arg3: memref<25x128xf32, #tpu.memory_space<vmem>>, %arg4: memref<16x128xf32, #tpu.memory_space<vmem>>, %arg5: memref<1x16x128xf32, #tpu.memory_space<vmem>>, %arg6: memref<32x128xf32, #tpu.memory_space<vmem>>) attributes {dimension_semantics = [#tpu.dimension_semantics<parallel>], iteration_bounds = array<i64: 2>, scalar_prefetch = 0 : i64, scratch_operands = 1 : i64, tpu.core_type = #tpu.core_type<tc>, window_params = [{transform_indices = @transform_0, window_bounds = array<i64: 1, 16, 128>}, {pipeline_mode = #tpu.pipeline_mode<synchronous>, transform_indices = @transform_1, window_bounds = array<i64: 6656, 128>}, {pipeline_mode = #tpu.pipeline_mode<synchronous>, transform_indices = @transform_2, window_bounds = array<i64: 25, 128>}, {pipeline_mode = #tpu.pipeline_mode<synchronous>, transform_indices = @transform_3, window_bounds = array<i64: 16, 128>}, {transform_indices = @transform_4, window_bounds = array<i64: 1, 16, 128>}]} {
    %cst = arith.constant 0.000000e+00 : f32
    %0 = vector.broadcast %cst : f32 to vector<8x128xf32>
    %c0 = arith.constant 0 : index
    %c0_0 = arith.constant 0 : index
    %1 = vector.load %arg6[%c0, %c0_0] : memref<32x128xf32, #tpu.memory_space<vmem>>, vector<8x128xf32>
    tpu.vector_store %arg6[%c0, %c0_0], %0 {strides = array<i32>} : memref<32x128xf32, #tpu.memory_space<vmem>>, vector<8x128xf32>,
    %cst_1 = arith.constant 0.000000e+00 : f32
    %2 = vector.broadcast %cst_1 : f32 to vector<8x128xf32>
    %c24 = arith.constant 24 : index
    %c0_2 = arith.constant 0 : index
    %3 = vector.load %arg6[%c24, %c0_2] : memref<32x128xf32, #tpu.memory_space<vmem>>, vector<8x128xf32>
    tpu.vector_store %arg6[%c24, %c0_2], %2 {strides = array<i32>} : memref<32x128xf32, #tpu.memory_space<vmem>>, vector<8x128xf32>,
    %c0_3 = arith.constant 0 : index
    %c0_4 = arith.constant 0 : index
    %c0_5 = arith.constant 0 : index
    %4 = vector.load %arg1[%c0_3, %c0_4, %c0_5] : memref<1x16x128xf32, #tpu.memory_space<vmem>>, vector<1x16x128xf32>
    %5 = vector.shape_cast %4 : vector<1x16x128xf32> to vector<16x128xf32>
    %c0_6 = arith.constant 0 : index
    %c0_7 = arith.constant 0 : index
    %6 = vector.load %arg4[%c0_6, %c0_7] : memref<16x128xf32, #tpu.memory_space<vmem>>, vector<1x128xf32>
    %7 = vector.broadcast %6 : vector<1x128xf32> to vector<16x128xf32>
    %8 = arith.mulf %5, %7 : vector<16x128xf32>
    %c1 = arith.constant 1 : index
    %c0_8 = arith.constant 0 : index
    %9 = vector.load %arg4[%c1, %c0_8] : memref<16x128xf32, #tpu.memory_space<vmem>>, vector<1x128xf32>
    %10 = vector.broadcast %9 : vector<1x128xf32> to vector<16x128xf32>
    %11 = arith.addf %8, %10 : vector<16x128xf32>
    %c8 = arith.constant 8 : index
    %c0_9 = arith.constant 0 : index
    %12 = vector.load %arg6[%c8, %c0_9] : memref<32x128xf32, #tpu.memory_space<vmem>>, vector<16x128xf32>
    tpu.vector_store %arg6[%c8, %c0_9], %11 {strides = array<i32>} : memref<32x128xf32, #tpu.memory_space<vmem>>, vector<16x128xf32>,
    %c7 = arith.constant 7 : index
    %c0_10 = arith.constant 0 : index
    %13 = vector.load %arg6[%c7, %c0_10] : memref<32x128xf32, #tpu.memory_space<vmem>>, vector<16x128xf32>
    %c8_11 = arith.constant 8 : index
    %c0_12 = arith.constant 0 : index
    %14 = vector.load %arg6[%c8_11, %c0_12] : memref<32x128xf32, #tpu.memory_space<vmem>>, vector<16x128xf32>
    %c9 = arith.constant 9 : index
    %c0_13 = arith.constant 0 : index
    %15 = vector.load %arg6[%c9, %c0_13] : memref<32x128xf32, #tpu.memory_space<vmem>>, vector<16x128xf32>
    %16 = tpu.concatenate %13, %14, %15 in 1 : vector<16x128xf32>, vector<16x128xf32>, vector<16x128xf32> -> vector<16x384xf32>
    %17 = arith.truncf %16 : vector<16x384xf32> to vector<16x384xbf16>
    %c0_14 = arith.constant 0 : index
    %c0_15 = arith.constant 0 : index
    %18 = vector.load %arg2[%c0_14, %c0_15] : memref<6656x128xbf16, #tpu.memory_space<vmem>>, vector<384x128xbf16>
    %cst_16 = arith.constant dense<0.000000e+00> : vector<16x128xf32>
    %19 = tpu.matmul %17, %18, %cst_16 {dimension_numbers = #tpu.dot_dimension_numbers<[1], [0], [0], [1], [0, 0, 1, 1], [], []>} : vector<16x384xbf16>, vector<384x128xbf16>, vector<16x128xf32> -> vector<16x128xf32>
    %c0_17 = arith.constant 0 : index
    %c0_18 = arith.constant 0 : index
    %20 = vector.load %arg3[%c0_17, %c0_18] : memref<25x128xf32, #tpu.memory_space<vmem>>, vector<1x128xf32>
    %21 = vector.broadcast %20 : vector<1x128xf32> to vector<16x128xf32>
    %22 = arith.addf %19, %21 : vector<16x128xf32>
    %cst_19 = arith.constant 0.000000e+00 : f32
    %23 = vector.broadcast %cst_19 : f32 to vector<16x128xf32>
    %24 = arith.maximumf %22, %23 : vector<16x128xf32>
    %c8_20 = arith.constant 8 : index
    %c0_21 = arith.constant 0 : index
    %25 = vector.load %arg6[%c8_20, %c0_21] : memref<32x128xf32, #tpu.memory_space<vmem>>, vector<16x128xf32>
    tpu.vector_store %arg6[%c8_20, %c0_21], %24 {strides = array<i32>} : memref<32x128xf32, #tpu.memory_space<vmem>>, vector<16x128xf32>,
    %c6 = arith.constant 6 : index
    %c0_22 = arith.constant 0 : index
    %26 = vector.load %arg6[%c6, %c0_22] : memref<32x128xf32, #tpu.memory_space<vmem>>, vector<16x128xf32>
    %c8_23 = arith.constant 8 : index
    %c0_24 = arith.constant 0 : index
    %27 = vector.load %arg6[%c8_23, %c0_24] : memref<32x128xf32, #tpu.memory_space<vmem>>, vector<16x128xf32>
    %c10 = arith.constant 10 : index
    %c0_25 = arith.constant 0 : index
    %28 = vector.load %arg6[%c10, %c0_25] : memref<32x128xf32, #tpu.memory_space<vmem>>, vector<16x128xf32>
    %29 = tpu.concatenate %26, %27, %28 in 1 : vector<16x128xf32>, vector<16x128xf32>, vector<16x128xf32> -> vector<16x384xf32>
    %30 = arith.truncf %29 : vector<16x384xf32> to vector<16x384xbf16>
    %c384 = arith.constant 384 : index
    %c0_26 = arith.constant 0 : index
    %31 = vector.load %arg2[%c384, %c0_26] : memref<6656x128xbf16, #tpu.memory_space<vmem>>, vector<384x128xbf16>
    %cst_27 = arith.constant dense<0.000000e+00> : vector<16x128xf32>
    %32 = tpu.matmul %30, %31, %cst_27 {dimension_numbers = #tpu.dot_dimension_numbers<[1], [0], [0], [1], [0, 0, 1, 1], [], []>} : vector<16x384xbf16>, vector<384x128xbf16>, vector<16x128xf32> -> vector<16x128xf32>
    %c1_28 = arith.constant 1 : index
    %c0_29 = arith.constant 0 : index
    %33 = vector.load %arg3[%c1_28, %c0_29] : memref<25x128xf32, #tpu.memory_space<vmem>>, vector<1x128xf32>
    %34 = vector.broadcast %33 : vector<1x128xf32> to vector<16x128xf32>
    %35 = arith.addf %32, %34 : vector<16x128xf32>
    %cst_30 = arith.constant 0.000000e+00 : f32
    %36 = vector.broadcast %cst_30 : f32 to vector<16x128xf32>
    %37 = arith.maximumf %35, %36 : vector<16x128xf32>
    %c8_31 = arith.constant 8 : index
    %c0_32 = arith.constant 0 : index
    %38 = vector.load %arg6[%c8_31, %c0_32] : memref<32x128xf32, #tpu.memory_space<vmem>>, vector<16x128xf32>
    tpu.vector_store %arg6[%c8_31, %c0_32], %37 {strides = array<i32>} : memref<32x128xf32, #tpu.memory_space<vmem>>, vector<16x128xf32>,
    %c5 = arith.constant 5 : index
    %c0_33 = arith.constant 0 : index
    %39 = vector.load %arg6[%c5, %c0_33] : memref<32x128xf32, #tpu.memory_space<vmem>>, vector<16x128xf32>
    %c8_34 = arith.constant 8 : index
    %c0_35 = arith.constant 0 : index
    %40 = vector.load %arg6[%c8_34, %c0_35] : memref<32x128xf32, #tpu.memory_space<vmem>>, vector<16x128xf32>
    %c11 = arith.constant 11 : index
    %c0_36 = arith.constant 0 : index
    %41 = vector.load %arg6[%c11, %c0_36] : memref<32x128xf32, #tpu.memory_space<vmem>>, vector<16x128xf32>
    %42 = tpu.concatenate %39, %40, %41 in 1 : vector<16x128xf32>, vector<16x128xf32>, vector<16x128xf32> -> vector<16x384xf32>
    %43 = arith.truncf %42 : vector<16x384xf32> to vector<16x384xbf16>
    %c768 = arith.constant 768 : index
    %c0_37 = arith.constant 0 : index
    %44 = vector.load %arg2[%c768, %c0_37] : memref<6656x128xbf16, #tpu.memory_space<vmem>>, vector<384x128xbf16>
    %cst_38 = arith.constant dense<0.000000e+00> : vector<16x128xf32>
    %45 = tpu.matmul %43, %44, %cst_38 {dimension_numbers = #tpu.dot_dimension_numbers<[1], [0], [0], [1], [0, 0, 1, 1], [], []>} : vector<16x384xbf16>, vector<384x128xbf16>, vector<16x128xf32> -> vector<16x128xf32>
    %c2 = arith.constant 2 : index
    %c0_39 = arith.constant 0 : index
    %46 = vector.load %arg3[%c2, %c0_39] : memref<25x128xf32, #tpu.memory_space<vmem>>, vector<1x128xf32>
    %47 = vector.broadcast %46 : vector<1x128xf32> to vector<16x128xf32>
    %48 = arith.addf %45, %47 : vector<16x128xf32>
    %cst_40 = arith.constant 0.000000e+00 : f32
    %49 = vector.broadcast %cst_40 : f32 to vector<16x128xf32>
    %50 = arith.maximumf %48, %49 : vector<16x128xf32>
    %c8_41 = arith.constant 8 : index
    %c0_42 = arith.constant 0 : index
    %51 = vector.load %arg6[%c8_41, %c0_42] : memref<32x128xf32, #tpu.memory_space<vmem>>, vector<16x128xf32>
    tpu.vector_store %arg6[%c8_41, %c0_42], %11 {strides = array<i32>} : memref<32x128xf32, #tpu.memory_space<vmem>>, vector<16x128xf32>,
    %c7_43 = arith.constant 7 : index
    %c0_44 = arith.constant 0 : index
    %52 = vector.load %arg6[%c7_43, %c0_44] : memref<32x128xf32, #tpu.memory_space<vmem>>, vector<16x128xf32>
    %c8_45 = arith.constant 8 : index
    %c0_46 = arith.constant 0 : index
    %53 = vector.load %arg6[%c8_45, %c0_46] : memref<32x128xf32, #tpu.memory_space<vmem>>, vector<16x128xf32>
    %c9_47 = arith.constant 9 : index
    %c0_48 = arith.constant 0 : index
    %54 = vector.load %arg6[%c9_47, %c0_48] : memref<32x128xf32, #tpu.memory_space<vmem>>, vector<16x128xf32>
    %55 = tpu.concatenate %52, %53, %54 in 1 : vector<16x128xf32>, vector<16x128xf32>, vector<16x128xf32> -> vector<16x384xf32>
    %56 = arith.truncf %55 : vector<16x384xf32> to vector<16x384xbf16>
    %c1152 = arith.constant 1152 : index
    %c0_49 = arith.constant 0 : index
    %57 = vector.load %arg2[%c1152, %c0_49] : memref<6656x128xbf16, #tpu.memory_space<vmem>>, vector<384x128xbf16>
    %cst_50 = arith.constant dense<0.000000e+00> : vector<16x128xf32>
    %58 = tpu.matmul %56, %57, %cst_50 {dimension_numbers = #tpu.dot_dimension_numbers<[1], [0], [0], [1], [0, 0, 1, 1], [], []>} : vector<16x384xbf16>, vector<384x128xbf16>, vector<16x128xf32> -> vector<16x128xf32>
    %c3 = arith.constant 3 : index
    %c0_51 = arith.constant 0 : index
    %59 = vector.load %arg3[%c3, %c0_51] : memref<25x128xf32, #tpu.memory_space<vmem>>, vector<1x128xf32>
    %60 = vector.broadcast %59 : vector<1x128xf32> to vector<16x128xf32>
    %61 = arith.addf %58, %60 : vector<16x128xf32>
    %cst_52 = arith.constant 0.000000e+00 : f32
    %62 = vector.broadcast %cst_52 : f32 to vector<16x128xf32>
    %63 = arith.maximumf %61, %62 : vector<16x128xf32>
    %c8_53 = arith.constant 8 : index
    %c0_54 = arith.constant 0 : index
    %64 = vector.load %arg6[%c8_53, %c0_54] : memref<32x128xf32, #tpu.memory_space<vmem>>, vector<16x128xf32>
    tpu.vector_store %arg6[%c8_53, %c0_54], %63 {strides = array<i32>} : memref<32x128xf32, #tpu.memory_space<vmem>>, vector<16x128xf32>,
    %c6_55 = arith.constant 6 : index
    %c0_56 = arith.constant 0 : index
    %65 = vector.load %arg6[%c6_55, %c0_56] : memref<32x128xf32, #tpu.memory_space<vmem>>, vector<16x128xf32>
    %c8_57 = arith.constant 8 : index
    %c0_58 = arith.constant 0 : index
    %66 = vector.load %arg6[%c8_57, %c0_58] : memref<32x128xf32, #tpu.memory_space<vmem>>, vector<16x128xf32>
    %c10_59 = arith.constant 10 : index
    %c0_60 = arith.constant 0 : index
    %67 = vector.load %arg6[%c10_59, %c0_60] : memref<32x128xf32, #tpu.memory_space<vmem>>, vector<16x128xf32>
    %68 = tpu.concatenate %65, %66, %67 in 1 : vector<16x128xf32>, vector<16x128xf32>, vector<16x128xf32> -> vector<16x384xf32>
    %69 = arith.truncf %68 : vector<16x384xf32> to vector<16x384xbf16>
    %c1536 = arith.constant 1536 : index
    %c0_61 = arith.constant 0 : index
    %70 = vector.load %arg2[%c1536, %c0_61] : memref<6656x128xbf16, #tpu.memory_space<vmem>>, vector<384x128xbf16>
    %cst_62 = arith.constant dense<0.000000e+00> : vector<16x128xf32>
    %71 = tpu.matmul %69, %70, %cst_62 {dimension_numbers = #tpu.dot_dimension_numbers<[1], [0], [0], [1], [0, 0, 1, 1], [], []>} : vector<16x384xbf16>, vector<384x128xbf16>, vector<16x128xf32> -> vector<16x128xf32>
    %c4 = arith.constant 4 : index
    %c0_63 = arith.constant 0 : index
    %72 = vector.load %arg3[%c4, %c0_63] : memref<25x128xf32, #tpu.memory_space<vmem>>, vector<1x128xf32>
    %73 = vector.broadcast %72 : vector<1x128xf32> to vector<16x128xf32>
    %74 = arith.addf %71, %73 : vector<16x128xf32>
    %cst_64 = arith.constant 0.000000e+00 : f32
    %75 = vector.broadcast %cst_64 : f32 to vector<16x128xf32>
    %76 = arith.maximumf %74, %75 : vector<16x128xf32>
    %77 = arith.truncf %11 : vector<16x128xf32> to vector<16x128xbf16>
    %c1920 = arith.constant 1920 : index
    %c0_65 = arith.constant 0 : index
    %78 = vector.load %arg2[%c1920, %c0_65] : memref<6656x128xbf16, #tpu.memory_space<vmem>>, vector<128x128xbf16>
    %cst_66 = arith.constant dense<0.000000e+00> : vector<16x128xf32>
    %79 = tpu.matmul %77, %78, %cst_66 {dimension_numbers = #tpu.dot_dimension_numbers<[1], [0], [0], [1], [0, 0, 1, 1], [], []>} : vector<16x128xbf16>, vector<128x128xbf16>, vector<16x128xf32> -> vector<16x128xf32>
    %c5_67 = arith.constant 5 : index
    %c0_68 = arith.constant 0 : index
    %80 = vector.load %arg3[%c5_67, %c0_68] : memref<25x128xf32, #tpu.memory_space<vmem>>, vector<1x128xf32>
    %81 = vector.broadcast %80 : vector<1x128xf32> to vector<16x128xf32>
    %82 = arith.addf %79, %81 : vector<16x128xf32>
    %cst_69 = arith.constant 0.000000e+00 : f32
    %83 = vector.broadcast %cst_69 : f32 to vector<16x128xf32>
    %84 = arith.maximumf %82, %83 : vector<16x128xf32>
    %85 = arith.truncf %11 : vector<16x128xf32> to vector<16x128xbf16>
    %c2048 = arith.constant 2048 : index
    %c0_70 = arith.constant 0 : index
    %86 = vector.load %arg2[%c2048, %c0_70] : memref<6656x128xbf16, #tpu.memory_space<vmem>>, vector<128x128xbf16>
    %cst_71 = arith.constant dense<0.000000e+00> : vector<16x128xf32>
    %87 = tpu.matmul %85, %86, %cst_71 {dimension_numbers = #tpu.dot_dimension_numbers<[1], [0], [0], [1], [0, 0, 1, 1], [], []>} : vector<16x128xbf16>, vector<128x128xbf16>, vector<16x128xf32> -> vector<16x128xf32>
    %c6_72 = arith.constant 6 : index
    %c0_73 = arith.constant 0 : index
    %88 = vector.load %arg3[%c6_72, %c0_73] : memref<25x128xf32, #tpu.memory_space<vmem>>, vector<1x128xf32>
    %89 = vector.broadcast %88 : vector<1x128xf32> to vector<16x128xf32>
    %90 = arith.addf %87, %89 : vector<16x128xf32>
    %cst_74 = arith.constant 0.000000e+00 : f32
    %91 = vector.broadcast %cst_74 : f32 to vector<16x128xf32>
    %92 = arith.maximumf %90, %91 : vector<16x128xf32>
    %c8_75 = arith.constant 8 : index
    %c0_76 = arith.constant 0 : index
    %93 = vector.load %arg6[%c8_75, %c0_76] : memref<32x128xf32, #tpu.memory_space<vmem>>, vector<16x128xf32>
    tpu.vector_store %arg6[%c8_75, %c0_76], %92 {strides = array<i32>} : memref<32x128xf32, #tpu.memory_space<vmem>>, vector<16x128xf32>,
    %c7_77 = arith.constant 7 : index
    %c0_78 = arith.constant 0 : index
    %94 = vector.load %arg6[%c7_77, %c0_78] : memref<32x128xf32, #tpu.memory_space<vmem>>, vector<16x128xf32>
    %c8_79 = arith.constant 8 : index
    %c0_80 = arith.constant 0 : index
    %95 = vector.load %arg6[%c8_79, %c0_80] : memref<32x128xf32, #tpu.memory_space<vmem>>, vector<16x128xf32>
    %c9_81 = arith.constant 9 : index
    %c0_82 = arith.constant 0 : index
    %96 = vector.load %arg6[%c9_81, %c0_82] : memref<32x128xf32, #tpu.memory_space<vmem>>, vector<16x128xf32>
    %97 = tpu.concatenate %94, %95, %96 in 1 : vector<16x128xf32>, vector<16x128xf32>, vector<16x128xf32> -> vector<16x384xf32>
    %98 = arith.truncf %97 : vector<16x384xf32> to vector<16x384xbf16>
    %c2176 = arith.constant 2176 : index
    %c0_83 = arith.constant 0 : index
    %99 = vector.load %arg2[%c2176, %c0_83] : memref<6656x128xbf16, #tpu.memory_space<vmem>>, vector<384x128xbf16>
    %cst_84 = arith.constant dense<0.000000e+00> : vector<16x128xf32>
    %100 = tpu.matmul %98, %99, %cst_84 {dimension_numbers = #tpu.dot_dimension_numbers<[1], [0], [0], [1], [0, 0, 1, 1], [], []>} : vector<16x384xbf16>, vector<384x128xbf16>, vector<16x128xf32> -> vector<16x128xf32>
    %c7_85 = arith.constant 7 : index
    %c0_86 = arith.constant 0 : index
    %101 = vector.load %arg3[%c7_85, %c0_86] : memref<25x128xf32, #tpu.memory_space<vmem>>, vector<1x128xf32>
    %102 = vector.broadcast %101 : vector<1x128xf32> to vector<16x128xf32>
    %103 = arith.addf %100, %102 : vector<16x128xf32>
    %cst_87 = arith.constant 0.000000e+00 : f32
    %104 = vector.broadcast %cst_87 : f32 to vector<16x128xf32>
    %105 = arith.maximumf %103, %104 : vector<16x128xf32>
    %106 = arith.addf %105, %84 : vector<16x128xf32>
    %c2_88 = arith.constant 2 : index
    %c0_89 = arith.constant 0 : index
    %107 = vector.load %arg4[%c2_88, %c0_89] : memref<16x128xf32, #tpu.memory_space<vmem>>, vector<1x128xf32>
    %108 = vector.broadcast %107 : vector<1x128xf32> to vector<16x128xf32>
    %109 = arith.mulf %106, %108 : vector<16x128xf32>
    %c3_90 = arith.constant 3 : index
    %c0_91 = arith.constant 0 : index
    %110 = vector.load %arg4[%c3_90, %c0_91] : memref<16x128xf32, #tpu.memory_space<vmem>>, vector<1x128xf32>
    %111 = vector.broadcast %110 : vector<1x128xf32> to vector<16x128xf32>
    %112 = arith.addf %109, %111 : vector<16x128xf32>
    %113 = arith.truncf %11 : vector<16x128xf32> to vector<16x128xbf16>
    %c2560 = arith.constant 2560 : index
    %c0_92 = arith.constant 0 : index
    %114 = vector.load %arg2[%c2560, %c0_92] : memref<6656x128xbf16, #tpu.memory_space<vmem>>, vector<128x128xbf16>
    %cst_93 = arith.constant dense<0.000000e+00> : vector<16x128xf32>
    %115 = tpu.matmul %113, %114, %cst_93 {dimension_numbers = #tpu.dot_dimension_numbers<[1], [0], [0], [1], [0, 0, 1, 1], [], []>} : vector<16x128xbf16>, vector<128x128xbf16>, vector<16x128xf32> -> vector<16x128xf32>
    %c8_94 = arith.constant 8 : index
    %c0_95 = arith.constant 0 : index
    %116 = vector.load %arg3[%c8_94, %c0_95] : memref<25x128xf32, #tpu.memory_space<vmem>>, vector<1x128xf32>
    %117 = vector.broadcast %116 : vector<1x128xf32> to vector<16x128xf32>
    %118 = arith.addf %115, %117 : vector<16x128xf32>
    %cst_96 = arith.constant 0.000000e+00 : f32
    %119 = vector.broadcast %cst_96 : f32 to vector<16x128xf32>
    %120 = arith.maximumf %118, %119 : vector<16x128xf32>
    %121 = arith.truncf %11 : vector<16x128xf32> to vector<16x128xbf16>
    %c2688 = arith.constant 2688 : index
    %c0_97 = arith.constant 0 : index
    %122 = vector.load %arg2[%c2688, %c0_97] : memref<6656x128xbf16, #tpu.memory_space<vmem>>, vector<128x128xbf16>
    %cst_98 = arith.constant dense<0.000000e+00> : vector<16x128xf32>
    %123 = tpu.matmul %121, %122, %cst_98 {dimension_numbers = #tpu.dot_dimension_numbers<[1], [0], [0], [1], [0, 0, 1, 1], [], []>} : vector<16x128xbf16>, vector<128x128xbf16>, vector<16x128xf32> -> vector<16x128xf32>
    %c9_99 = arith.constant 9 : index
    %c0_100 = arith.constant 0 : index
    %124 = vector.load %arg3[%c9_99, %c0_100] : memref<25x128xf32, #tpu.memory_space<vmem>>, vector<1x128xf32>
    %125 = vector.broadcast %124 : vector<1x128xf32> to vector<16x128xf32>
    %126 = arith.addf %123, %125 : vector<16x128xf32>
    %cst_101 = arith.constant 0.000000e+00 : f32
    %127 = vector.broadcast %cst_101 : f32 to vector<16x128xf32>
    %128 = arith.maximumf %126, %127 : vector<16x128xf32>
    %c8_102 = arith.constant 8 : index
    %c0_103 = arith.constant 0 : index
    %129 = vector.load %arg6[%c8_102, %c0_103] : memref<32x128xf32, #tpu.memory_space<vmem>>, vector<16x128xf32>
    tpu.vector_store %arg6[%c8_102, %c0_103], %128 {strides = array<i32>} : memref<32x128xf32, #tpu.memory_space<vmem>>, vector<16x128xf32>,
    %c7_104 = arith.constant 7 : index
    %c0_105 = arith.constant 0 : index
    %130 = vector.load %arg6[%c7_104, %c0_105] : memref<32x128xf32, #tpu.memory_space<vmem>>, vector<16x128xf32>
    %c8_106 = arith.constant 8 : index
    %c0_107 = arith.constant 0 : index
    %131 = vector.load %arg6[%c8_106, %c0_107] : memref<32x128xf32, #tpu.memory_space<vmem>>, vector<16x128xf32>
    %c9_108 = arith.constant 9 : index
    %c0_109 = arith.constant 0 : index
    %132 = vector.load %arg6[%c9_108, %c0_109] : memref<32x128xf32, #tpu.memory_space<vmem>>, vector<16x128xf32>
    %133 = tpu.concatenate %130, %131, %132 in 1 : vector<16x128xf32>, vector<16x128xf32>, vector<16x128xf32> -> vector<16x384xf32>
    %134 = arith.truncf %133 : vector<16x384xf32> to vector<16x384xbf16>
    %c2816 = arith.constant 2816 : index
    %c0_110 = arith.constant 0 : index
    %135 = vector.load %arg2[%c2816, %c0_110] : memref<6656x128xbf16, #tpu.memory_space<vmem>>, vector<384x128xbf16>
    %cst_111 = arith.constant dense<0.000000e+00> : vector<16x128xf32>
    %136 = tpu.matmul %134, %135, %cst_111 {dimension_numbers = #tpu.dot_dimension_numbers<[1], [0], [0], [1], [0, 0, 1, 1], [], []>} : vector<16x384xbf16>, vector<384x128xbf16>, vector<16x128xf32> -> vector<16x128xf32>
    %c10_112 = arith.constant 10 : index
    %c0_113 = arith.constant 0 : index
    %137 = vector.load %arg3[%c10_112, %c0_113] : memref<25x128xf32, #tpu.memory_space<vmem>>, vector<1x128xf32>
    %138 = vector.broadcast %137 : vector<1x128xf32> to vector<16x128xf32>
    %139 = arith.addf %136, %138 : vector<16x128xf32>
    %cst_114 = arith.constant 0.000000e+00 : f32
    %140 = vector.broadcast %cst_114 : f32 to vector<16x128xf32>
    %141 = arith.maximumf %139, %140 : vector<16x128xf32>
    %142 = arith.addf %141, %120 : vector<16x128xf32>
    %c4_115 = arith.constant 4 : index
    %c0_116 = arith.constant 0 : index
    %143 = vector.load %arg4[%c4_115, %c0_116] : memref<16x128xf32, #tpu.memory_space<vmem>>, vector<1x128xf32>
    %144 = vector.broadcast %143 : vector<1x128xf32> to vector<16x128xf32>
    %145 = arith.mulf %142, %144 : vector<16x128xf32>
    %c5_117 = arith.constant 5 : index
    %c0_118 = arith.constant 0 : index
    %146 = vector.load %arg4[%c5_117, %c0_118] : memref<16x128xf32, #tpu.memory_space<vmem>>, vector<1x128xf32>
    %147 = vector.broadcast %146 : vector<1x128xf32> to vector<16x128xf32>
    %148 = arith.addf %145, %147 : vector<16x128xf32>
    %149 = arith.truncf %148 : vector<16x128xf32> to vector<16x128xbf16>
    %c3200 = arith.constant 3200 : index
    %c0_119 = arith.constant 0 : index
    %150 = vector.load %arg2[%c3200, %c0_119] : memref<6656x128xbf16, #tpu.memory_space<vmem>>, vector<128x128xbf16>
    %cst_120 = arith.constant dense<0.000000e+00> : vector<16x128xf32>
    %151 = tpu.matmul %149, %150, %cst_120 {dimension_numbers = #tpu.dot_dimension_numbers<[1], [0], [0], [1], [0, 0, 1, 1], [], []>} : vector<16x128xbf16>, vector<128x128xbf16>, vector<16x128xf32> -> vector<16x128xf32>
    %c11_121 = arith.constant 11 : index
    %c0_122 = arith.constant 0 : index
    %152 = vector.load %arg3[%c11_121, %c0_122] : memref<25x128xf32, #tpu.memory_space<vmem>>, vector<1x128xf32>
    %153 = vector.broadcast %152 : vector<1x128xf32> to vector<16x128xf32>
    %154 = arith.addf %151, %153 : vector<16x128xf32>
    %cst_123 = arith.constant 0.000000e+00 : f32
    %155 = vector.broadcast %cst_123 : f32 to vector<16x128xf32>
    %156 = arith.maximumf %154, %155 : vector<16x128xf32>
    %157 = arith.truncf %148 : vector<16x128xf32> to vector<16x128xbf16>
    %c3328 = arith.constant 3328 : index
    %c0_124 = arith.constant 0 : index
    %158 = vector.load %arg2[%c3328, %c0_124] : memref<6656x128xbf16, #tpu.memory_space<vmem>>, vector<128x128xbf16>
    %cst_125 = arith.constant dense<0.000000e+00> : vector<16x128xf32>
    %159 = tpu.matmul %157, %158, %cst_125 {dimension_numbers = #tpu.dot_dimension_numbers<[1], [0], [0], [1], [0, 0, 1, 1], [], []>} : vector<16x128xbf16>, vector<128x128xbf16>, vector<16x128xf32> -> vector<16x128xf32>
    %c12 = arith.constant 12 : index
    %c0_126 = arith.constant 0 : index
    %160 = vector.load %arg3[%c12, %c0_126] : memref<25x128xf32, #tpu.memory_space<vmem>>, vector<1x128xf32>
    %161 = vector.broadcast %160 : vector<1x128xf32> to vector<16x128xf32>
    %162 = arith.addf %159, %161 : vector<16x128xf32>
    %cst_127 = arith.constant 0.000000e+00 : f32
    %163 = vector.broadcast %cst_127 : f32 to vector<16x128xf32>
    %164 = arith.maximumf %162, %163 : vector<16x128xf32>
    %c8_128 = arith.constant 8 : index
    %c0_129 = arith.constant 0 : index
    %165 = vector.load %arg6[%c8_128, %c0_129] : memref<32x128xf32, #tpu.memory_space<vmem>>, vector<16x128xf32>
    tpu.vector_store %arg6[%c8_128, %c0_129], %164 {strides = array<i32>} : memref<32x128xf32, #tpu.memory_space<vmem>>, vector<16x128xf32>,
    %c7_130 = arith.constant 7 : index
    %c0_131 = arith.constant 0 : index
    %166 = vector.load %arg6[%c7_130, %c0_131] : memref<32x128xf32, #tpu.memory_space<vmem>>, vector<16x128xf32>
    %c8_132 = arith.constant 8 : index
    %c0_133 = arith.constant 0 : index
    %167 = vector.load %arg6[%c8_132, %c0_133] : memref<32x128xf32, #tpu.memory_space<vmem>>, vector<16x128xf32>
    %c9_134 = arith.constant 9 : index
    %c0_135 = arith.constant 0 : index
    %168 = vector.load %arg6[%c9_134, %c0_135] : memref<32x128xf32, #tpu.memory_space<vmem>>, vector<16x128xf32>
    %169 = tpu.concatenate %166, %167, %168 in 1 : vector<16x128xf32>, vector<16x128xf32>, vector<16x128xf32> -> vector<16x384xf32>
    %170 = arith.truncf %169 : vector<16x384xf32> to vector<16x384xbf16>
    %c3456 = arith.constant 3456 : index
    %c0_136 = arith.constant 0 : index
    %171 = vector.load %arg2[%c3456, %c0_136] : memref<6656x128xbf16, #tpu.memory_space<vmem>>, vector<384x128xbf16>
    %cst_137 = arith.constant dense<0.000000e+00> : vector<16x128xf32>
    %172 = tpu.matmul %170, %171, %cst_137 {dimension_numbers = #tpu.dot_dimension_numbers<[1], [0], [0], [1], [0, 0, 1, 1], [], []>} : vector<16x384xbf16>, vector<384x128xbf16>, vector<16x128xf32> -> vector<16x128xf32>
    %c13 = arith.constant 13 : index
    %c0_138 = arith.constant 0 : index
    %173 = vector.load %arg3[%c13, %c0_138] : memref<25x128xf32, #tpu.memory_space<vmem>>, vector<1x128xf32>
    %174 = vector.broadcast %173 : vector<1x128xf32> to vector<16x128xf32>
    %175 = arith.addf %172, %174 : vector<16x128xf32>
    %cst_139 = arith.constant 0.000000e+00 : f32
    %176 = vector.broadcast %cst_139 : f32 to vector<16x128xf32>
    %177 = arith.maximumf %175, %176 : vector<16x128xf32>
    %178 = arith.addf %177, %156 : vector<16x128xf32>
    %c6_140 = arith.constant 6 : index
    %c0_141 = arith.constant 0 : index
    %179 = vector.load %arg4[%c6_140, %c0_141] : memref<16x128xf32, #tpu.memory_space<vmem>>, vector<1x128xf32>
    %180 = vector.broadcast %179 : vector<1x128xf32> to vector<16x128xf32>
    %181 = arith.mulf %178, %180 : vector<16x128xf32>
    %c7_142 = arith.constant 7 : index
    %c0_143 = arith.constant 0 : index
    %182 = vector.load %arg4[%c7_142, %c0_143] : memref<16x128xf32, #tpu.memory_space<vmem>>, vector<1x128xf32>
    %183 = vector.broadcast %182 : vector<1x128xf32> to vector<16x128xf32>
    %184 = arith.addf %181, %183 : vector<16x128xf32>
    %185 = arith.truncf %11 : vector<16x128xf32> to vector<16x128xbf16>
    %c3840 = arith.constant 3840 : index
    %c0_144 = arith.constant 0 : index
    %186 = vector.load %arg2[%c3840, %c0_144] : memref<6656x128xbf16, #tpu.memory_space<vmem>>, vector<128x128xbf16>
    %cst_145 = arith.constant dense<0.000000e+00> : vector<16x128xf32>
    %187 = tpu.matmul %185, %186, %cst_145 {dimension_numbers = #tpu.dot_dimension_numbers<[1], [0], [0], [1], [0, 0, 1, 1], [], []>} : vector<16x128xbf16>, vector<128x128xbf16>, vector<16x128xf32> -> vector<16x128xf32>
    %c14 = arith.constant 14 : index
    %c0_146 = arith.constant 0 : index
    %188 = vector.load %arg3[%c14, %c0_146] : memref<25x128xf32, #tpu.memory_space<vmem>>, vector<1x128xf32>
    %189 = vector.broadcast %188 : vector<1x128xf32> to vector<16x128xf32>
    %190 = arith.addf %187, %189 : vector<16x128xf32>
    %cst_147 = arith.constant 0.000000e+00 : f32
    %191 = vector.broadcast %cst_147 : f32 to vector<16x128xf32>
    %192 = arith.maximumf %190, %191 : vector<16x128xf32>
    %193 = arith.truncf %11 : vector<16x128xf32> to vector<16x128xbf16>
    %c3968 = arith.constant 3968 : index
    %c0_148 = arith.constant 0 : index
    %194 = vector.load %arg2[%c3968, %c0_148] : memref<6656x128xbf16, #tpu.memory_space<vmem>>, vector<128x128xbf16>
    %cst_149 = arith.constant dense<0.000000e+00> : vector<16x128xf32>
    %195 = tpu.matmul %193, %194, %cst_149 {dimension_numbers = #tpu.dot_dimension_numbers<[1], [0], [0], [1], [0, 0, 1, 1], [], []>} : vector<16x128xbf16>, vector<128x128xbf16>, vector<16x128xf32> -> vector<16x128xf32>
    %c15 = arith.constant 15 : index
    %c0_150 = arith.constant 0 : index
    %196 = vector.load %arg3[%c15, %c0_150] : memref<25x128xf32, #tpu.memory_space<vmem>>, vector<1x128xf32>
    %197 = vector.broadcast %196 : vector<1x128xf32> to vector<16x128xf32>
    %198 = arith.addf %195, %197 : vector<16x128xf32>
    %cst_151 = arith.constant 0.000000e+00 : f32
    %199 = vector.broadcast %cst_151 : f32 to vector<16x128xf32>
    %200 = arith.maximumf %198, %199 : vector<16x128xf32>
    %c8_152 = arith.constant 8 : index
    %c0_153 = arith.constant 0 : index
    %201 = vector.load %arg6[%c8_152, %c0_153] : memref<32x128xf32, #tpu.memory_space<vmem>>, vector<16x128xf32>
    tpu.vector_store %arg6[%c8_152, %c0_153], %200 {strides = array<i32>} : memref<32x128xf32, #tpu.memory_space<vmem>>, vector<16x128xf32>,
    %c7_154 = arith.constant 7 : index
    %c0_155 = arith.constant 0 : index
    %202 = vector.load %arg6[%c7_154, %c0_155] : memref<32x128xf32, #tpu.memory_space<vmem>>, vector<16x128xf32>
    %c8_156 = arith.constant 8 : index
    %c0_157 = arith.constant 0 : index
    %203 = vector.load %arg6[%c8_156, %c0_157] : memref<32x128xf32, #tpu.memory_space<vmem>>, vector<16x128xf32>
    %c9_158 = arith.constant 9 : index
    %c0_159 = arith.constant 0 : index
    %204 = vector.load %arg6[%c9_158, %c0_159] : memref<32x128xf32, #tpu.memory_space<vmem>>, vector<16x128xf32>
    %205 = tpu.concatenate %202, %203, %204 in 1 : vector<16x128xf32>, vector<16x128xf32>, vector<16x128xf32> -> vector<16x384xf32>
    %206 = arith.truncf %205 : vector<16x384xf32> to vector<16x384xbf16>
    %c4096 = arith.constant 4096 : index
    %c0_160 = arith.constant 0 : index
    %207 = vector.load %arg2[%c4096, %c0_160] : memref<6656x128xbf16, #tpu.memory_space<vmem>>, vector<384x128xbf16>
    %cst_161 = arith.constant dense<0.000000e+00> : vector<16x128xf32>
    %208 = tpu.matmul %206, %207, %cst_161 {dimension_numbers = #tpu.dot_dimension_numbers<[1], [0], [0], [1], [0, 0, 1, 1], [], []>} : vector<16x384xbf16>, vector<384x128xbf16>, vector<16x128xf32> -> vector<16x128xf32>
    %c16 = arith.constant 16 : index
    %c0_162 = arith.constant 0 : index
    %209 = vector.load %arg3[%c16, %c0_162] : memref<25x128xf32, #tpu.memory_space<vmem>>, vector<1x128xf32>
    %210 = vector.broadcast %209 : vector<1x128xf32> to vector<16x128xf32>
    %211 = arith.addf %208, %210 : vector<16x128xf32>
    %cst_163 = arith.constant 0.000000e+00 : f32
    %212 = vector.broadcast %cst_163 : f32 to vector<16x128xf32>
    %213 = arith.maximumf %211, %212 : vector<16x128xf32>
    %214 = arith.addf %213, %192 : vector<16x128xf32>
    %c8_164 = arith.constant 8 : index
    %c0_165 = arith.constant 0 : index
    %215 = vector.load %arg4[%c8_164, %c0_165] : memref<16x128xf32, #tpu.memory_space<vmem>>, vector<1x128xf32>
    %216 = vector.broadcast %215 : vector<1x128xf32> to vector<16x128xf32>
    %217 = arith.mulf %214, %216 : vector<16x128xf32>
    %c9_166 = arith.constant 9 : index
    %c0_167 = arith.constant 0 : index
    %218 = vector.load %arg4[%c9_166, %c0_167] : memref<16x128xf32, #tpu.memory_space<vmem>>, vector<1x128xf32>
    %219 = vector.broadcast %218 : vector<1x128xf32> to vector<16x128xf32>
    %220 = arith.addf %217, %219 : vector<16x128xf32>
    %221 = arith.truncf %220 : vector<16x128xf32> to vector<16x128xbf16>
    %c4480 = arith.constant 4480 : index
    %c0_168 = arith.constant 0 : index
    %222 = vector.load %arg2[%c4480, %c0_168] : memref<6656x128xbf16, #tpu.memory_space<vmem>>, vector<128x128xbf16>
    %cst_169 = arith.constant dense<0.000000e+00> : vector<16x128xf32>
    %223 = tpu.matmul %221, %222, %cst_169 {dimension_numbers = #tpu.dot_dimension_numbers<[1], [0], [0], [1], [0, 0, 1, 1], [], []>} : vector<16x128xbf16>, vector<128x128xbf16>, vector<16x128xf32> -> vector<16x128xf32>
    %c17 = arith.constant 17 : index
    %c0_170 = arith.constant 0 : index
    %224 = vector.load %arg3[%c17, %c0_170] : memref<25x128xf32, #tpu.memory_space<vmem>>, vector<1x128xf32>
    %225 = vector.broadcast %224 : vector<1x128xf32> to vector<16x128xf32>
    %226 = arith.addf %223, %225 : vector<16x128xf32>
    %cst_171 = arith.constant 0.000000e+00 : f32
    %227 = vector.broadcast %cst_171 : f32 to vector<16x128xf32>
    %228 = arith.maximumf %226, %227 : vector<16x128xf32>
    %229 = arith.truncf %220 : vector<16x128xf32> to vector<16x128xbf16>
    %c4608 = arith.constant 4608 : index
    %c0_172 = arith.constant 0 : index
    %230 = vector.load %arg2[%c4608, %c0_172] : memref<6656x128xbf16, #tpu.memory_space<vmem>>, vector<128x128xbf16>
    %cst_173 = arith.constant dense<0.000000e+00> : vector<16x128xf32>
    %231 = tpu.matmul %229, %230, %cst_173 {dimension_numbers = #tpu.dot_dimension_numbers<[1], [0], [0], [1], [0, 0, 1, 1], [], []>} : vector<16x128xbf16>, vector<128x128xbf16>, vector<16x128xf32> -> vector<16x128xf32>
    %c18 = arith.constant 18 : index
    %c0_174 = arith.constant 0 : index
    %232 = vector.load %arg3[%c18, %c0_174] : memref<25x128xf32, #tpu.memory_space<vmem>>, vector<1x128xf32>
    %233 = vector.broadcast %232 : vector<1x128xf32> to vector<16x128xf32>
    %234 = arith.addf %231, %233 : vector<16x128xf32>
    %cst_175 = arith.constant 0.000000e+00 : f32
    %235 = vector.broadcast %cst_175 : f32 to vector<16x128xf32>
    %236 = arith.maximumf %234, %235 : vector<16x128xf32>
    %c8_176 = arith.constant 8 : index
    %c0_177 = arith.constant 0 : index
    %237 = vector.load %arg6[%c8_176, %c0_177] : memref<32x128xf32, #tpu.memory_space<vmem>>, vector<16x128xf32>
    tpu.vector_store %arg6[%c8_176, %c0_177], %236 {strides = array<i32>} : memref<32x128xf32, #tpu.memory_space<vmem>>, vector<16x128xf32>,
    %c7_178 = arith.constant 7 : index
    %c0_179 = arith.constant 0 : index
    %238 = vector.load %arg6[%c7_178, %c0_179] : memref<32x128xf32, #tpu.memory_space<vmem>>, vector<16x128xf32>
    %c8_180 = arith.constant 8 : index
    %c0_181 = arith.constant 0 : index
    %239 = vector.load %arg6[%c8_180, %c0_181] : memref<32x128xf32, #tpu.memory_space<vmem>>, vector<16x128xf32>
    %c9_182 = arith.constant 9 : index
    %c0_183 = arith.constant 0 : index
    %240 = vector.load %arg6[%c9_182, %c0_183] : memref<32x128xf32, #tpu.memory_space<vmem>>, vector<16x128xf32>
    %241 = tpu.concatenate %238, %239, %240 in 1 : vector<16x128xf32>, vector<16x128xf32>, vector<16x128xf32> -> vector<16x384xf32>
    %242 = arith.truncf %241 : vector<16x384xf32> to vector<16x384xbf16>
    %c4736 = arith.constant 4736 : index
    %c0_184 = arith.constant 0 : index
    %243 = vector.load %arg2[%c4736, %c0_184] : memref<6656x128xbf16, #tpu.memory_space<vmem>>, vector<384x128xbf16>
    %cst_185 = arith.constant dense<0.000000e+00> : vector<16x128xf32>
    %244 = tpu.matmul %242, %243, %cst_185 {dimension_numbers = #tpu.dot_dimension_numbers<[1], [0], [0], [1], [0, 0, 1, 1], [], []>} : vector<16x384xbf16>, vector<384x128xbf16>, vector<16x128xf32> -> vector<16x128xf32>
    %c19 = arith.constant 19 : index
    %c0_186 = arith.constant 0 : index
    %245 = vector.load %arg3[%c19, %c0_186] : memref<25x128xf32, #tpu.memory_space<vmem>>, vector<1x128xf32>
    %246 = vector.broadcast %245 : vector<1x128xf32> to vector<16x128xf32>
    %247 = arith.addf %244, %246 : vector<16x128xf32>
    %cst_187 = arith.constant 0.000000e+00 : f32
    %248 = vector.broadcast %cst_187 : f32 to vector<16x128xf32>
    %249 = arith.maximumf %247, %248 : vector<16x128xf32>
    %250 = arith.addf %249, %228 : vector<16x128xf32>
    %c10_188 = arith.constant 10 : index
    %c0_189 = arith.constant 0 : index
    %251 = vector.load %arg4[%c10_188, %c0_189] : memref<16x128xf32, #tpu.memory_space<vmem>>, vector<1x128xf32>
    %252 = vector.broadcast %251 : vector<1x128xf32> to vector<16x128xf32>
    %253 = arith.mulf %250, %252 : vector<16x128xf32>
    %c11_190 = arith.constant 11 : index
    %c0_191 = arith.constant 0 : index
    %254 = vector.load %arg4[%c11_190, %c0_191] : memref<16x128xf32, #tpu.memory_space<vmem>>, vector<1x128xf32>
    %255 = vector.broadcast %254 : vector<1x128xf32> to vector<16x128xf32>
    %256 = arith.addf %253, %255 : vector<16x128xf32>
    %257 = arith.truncf %256 : vector<16x128xf32> to vector<16x128xbf16>
    %c5120 = arith.constant 5120 : index
    %c0_192 = arith.constant 0 : index
    %258 = vector.load %arg2[%c5120, %c0_192] : memref<6656x128xbf16, #tpu.memory_space<vmem>>, vector<128x128xbf16>
    %cst_193 = arith.constant dense<0.000000e+00> : vector<16x128xf32>
    %259 = tpu.matmul %257, %258, %cst_193 {dimension_numbers = #tpu.dot_dimension_numbers<[1], [0], [0], [1], [0, 0, 1, 1], [], []>} : vector<16x128xbf16>, vector<128x128xbf16>, vector<16x128xf32> -> vector<16x128xf32>
    %c20 = arith.constant 20 : index
    %c0_194 = arith.constant 0 : index
    %260 = vector.load %arg3[%c20, %c0_194] : memref<25x128xf32, #tpu.memory_space<vmem>>, vector<1x128xf32>
    %261 = vector.broadcast %260 : vector<1x128xf32> to vector<16x128xf32>
    %262 = arith.addf %259, %261 : vector<16x128xf32>
    %cst_195 = arith.constant 0.000000e+00 : f32
    %263 = vector.broadcast %cst_195 : f32 to vector<16x128xf32>
    %264 = arith.maximumf %262, %263 : vector<16x128xf32>
    %265 = arith.truncf %256 : vector<16x128xf32> to vector<16x128xbf16>
    %c5248 = arith.constant 5248 : index
    %c0_196 = arith.constant 0 : index
    %266 = vector.load %arg2[%c5248, %c0_196] : memref<6656x128xbf16, #tpu.memory_space<vmem>>, vector<128x128xbf16>
    %cst_197 = arith.constant dense<0.000000e+00> : vector<16x128xf32>
    %267 = tpu.matmul %265, %266, %cst_197 {dimension_numbers = #tpu.dot_dimension_numbers<[1], [0], [0], [1], [0, 0, 1, 1], [], []>} : vector<16x128xbf16>, vector<128x128xbf16>, vector<16x128xf32> -> vector<16x128xf32>
    %c21 = arith.constant 21 : index
    %c0_198 = arith.constant 0 : index
    %268 = vector.load %arg3[%c21, %c0_198] : memref<25x128xf32, #tpu.memory_space<vmem>>, vector<1x128xf32>
    %269 = vector.broadcast %268 : vector<1x128xf32> to vector<16x128xf32>
    %270 = arith.addf %267, %269 : vector<16x128xf32>
    %cst_199 = arith.constant 0.000000e+00 : f32
    %271 = vector.broadcast %cst_199 : f32 to vector<16x128xf32>
    %272 = arith.maximumf %270, %271 : vector<16x128xf32>
    %c8_200 = arith.constant 8 : index
    %c0_201 = arith.constant 0 : index
    %273 = vector.load %arg6[%c8_200, %c0_201] : memref<32x128xf32, #tpu.memory_space<vmem>>, vector<16x128xf32>
    tpu.vector_store %arg6[%c8_200, %c0_201], %272 {strides = array<i32>} : memref<32x128xf32, #tpu.memory_space<vmem>>, vector<16x128xf32>,
    %c7_202 = arith.constant 7 : index
    %c0_203 = arith.constant 0 : index
    %274 = vector.load %arg6[%c7_202, %c0_203] : memref<32x128xf32, #tpu.memory_space<vmem>>, vector<16x128xf32>
    %c8_204 = arith.constant 8 : index
    %c0_205 = arith.constant 0 : index
    %275 = vector.load %arg6[%c8_204, %c0_205] : memref<32x128xf32, #tpu.memory_space<vmem>>, vector<16x128xf32>
    %c9_206 = arith.constant 9 : index
    %c0_207 = arith.constant 0 : index
    %276 = vector.load %arg6[%c9_206, %c0_207] : memref<32x128xf32, #tpu.memory_space<vmem>>, vector<16x128xf32>
    %277 = tpu.concatenate %274, %275, %276 in 1 : vector<16x128xf32>, vector<16x128xf32>, vector<16x128xf32> -> vector<16x384xf32>
    %278 = arith.truncf %277 : vector<16x384xf32> to vector<16x384xbf16>
    %c5376 = arith.constant 5376 : index
    %c0_208 = arith.constant 0 : index
    %279 = vector.load %arg2[%c5376, %c0_208] : memref<6656x128xbf16, #tpu.memory_space<vmem>>, vector<384x128xbf16>
    %cst_209 = arith.constant dense<0.000000e+00> : vector<16x128xf32>
    %280 = tpu.matmul %278, %279, %cst_209 {dimension_numbers = #tpu.dot_dimension_numbers<[1], [0], [0], [1], [0, 0, 1, 1], [], []>} : vector<16x384xbf16>, vector<384x128xbf16>, vector<16x128xf32> -> vector<16x128xf32>
    %c22 = arith.constant 22 : index
    %c0_210 = arith.constant 0 : index
    %281 = vector.load %arg3[%c22, %c0_210] : memref<25x128xf32, #tpu.memory_space<vmem>>, vector<1x128xf32>
    %282 = vector.broadcast %281 : vector<1x128xf32> to vector<16x128xf32>
    %283 = arith.addf %280, %282 : vector<16x128xf32>
    %cst_211 = arith.constant 0.000000e+00 : f32
    %284 = vector.broadcast %cst_211 : f32 to vector<16x128xf32>
    %285 = arith.maximumf %283, %284 : vector<16x128xf32>
    %286 = arith.addf %285, %264 : vector<16x128xf32>
    %c12_212 = arith.constant 12 : index
    %c0_213 = arith.constant 0 : index
    %287 = vector.load %arg4[%c12_212, %c0_213] : memref<16x128xf32, #tpu.memory_space<vmem>>, vector<1x128xf32>
    %288 = vector.broadcast %287 : vector<1x128xf32> to vector<16x128xf32>
    %289 = arith.mulf %286, %288 : vector<16x128xf32>
    %c13_214 = arith.constant 13 : index
    %c0_215 = arith.constant 0 : index
    %290 = vector.load %arg4[%c13_214, %c0_215] : memref<16x128xf32, #tpu.memory_space<vmem>>, vector<1x128xf32>
    %291 = vector.broadcast %290 : vector<1x128xf32> to vector<16x128xf32>
    %292 = arith.addf %289, %291 : vector<16x128xf32>
    %293 = arith.truncf %11 : vector<16x128xf32> to vector<16x128xbf16>
    %c5760 = arith.constant 5760 : index
    %c0_216 = arith.constant 0 : index
    %294 = vector.load %arg2[%c5760, %c0_216] : memref<6656x128xbf16, #tpu.memory_space<vmem>>, vector<128x128xbf16>
    %cst_217 = arith.constant dense<0.000000e+00> : vector<16x128xf32>
    %295 = tpu.matmul %293, %294, %cst_217 {dimension_numbers = #tpu.dot_dimension_numbers<[1], [0], [0], [1], [0, 0, 1, 1], [], []>} : vector<16x128xbf16>, vector<128x128xbf16>, vector<16x128xf32> -> vector<16x128xf32>
    %c23 = arith.constant 23 : index
    %c0_218 = arith.constant 0 : index
    %296 = vector.load %arg3[%c23, %c0_218] : memref<25x128xf32, #tpu.memory_space<vmem>>, vector<1x128xf32>
    %297 = vector.broadcast %296 : vector<1x128xf32> to vector<16x128xf32>
    %298 = arith.addf %295, %297 : vector<16x128xf32>
    %cst_219 = arith.constant 0.000000e+00 : f32
    %299 = vector.broadcast %cst_219 : f32 to vector<16x128xf32>
    %300 = arith.maximumf %298, %299 : vector<16x128xf32>
    %c8_220 = arith.constant 8 : index
    %c0_221 = arith.constant 0 : index
    %301 = vector.load %arg6[%c8_220, %c0_221] : memref<32x128xf32, #tpu.memory_space<vmem>>, vector<16x128xf32>
    tpu.vector_store %arg6[%c8_220, %c0_221], %300 {strides = array<i32>} : memref<32x128xf32, #tpu.memory_space<vmem>>, vector<16x128xf32>,
    %c6_222 = arith.constant 6 : index
    %c0_223 = arith.constant 0 : index
    %302 = vector.load %arg6[%c6_222, %c0_223] : memref<32x128xf32, #tpu.memory_space<vmem>>, vector<16x128xf32>
    %c7_224 = arith.constant 7 : index
    %c0_225 = arith.constant 0 : index
    %303 = vector.load %arg6[%c7_224, %c0_225] : memref<32x128xf32, #tpu.memory_space<vmem>>, vector<16x128xf32>
    %c8_226 = arith.constant 8 : index
    %c0_227 = arith.constant 0 : index
    %304 = vector.load %arg6[%c8_226, %c0_227] : memref<32x128xf32, #tpu.memory_space<vmem>>, vector<16x128xf32>
    %c9_228 = arith.constant 9 : index
    %c0_229 = arith.constant 0 : index
    %305 = vector.load %arg6[%c9_228, %c0_229] : memref<32x128xf32, #tpu.memory_space<vmem>>, vector<16x128xf32>
    %c10_230 = arith.constant 10 : index
    %c0_231 = arith.constant 0 : index
    %306 = vector.load %arg6[%c10_230, %c0_231] : memref<32x128xf32, #tpu.memory_space<vmem>>, vector<16x128xf32>
    %c11_232 = arith.constant 11 : index
    %c0_233 = arith.constant 0 : index
    %307 = vector.load %arg6[%c11_232, %c0_233] : memref<32x128xf32, #tpu.memory_space<vmem>>, vector<16x128xf32>
    %308 = tpu.concatenate %302, %303, %304, %305, %306, %307 in 1 : vector<16x128xf32>, vector<16x128xf32>, vector<16x128xf32>, vector<16x128xf32>, vector<16x128xf32>, vector<16x128xf32> -> vector<16x768xf32>
    %309 = arith.truncf %308 : vector<16x768xf32> to vector<16x768xbf16>
    %c5888 = arith.constant 5888 : index
    %c0_234 = arith.constant 0 : index
    %310 = vector.load %arg2[%c5888, %c0_234] : memref<6656x128xbf16, #tpu.memory_space<vmem>>, vector<768x128xbf16>
    %cst_235 = arith.constant dense<0.000000e+00> : vector<16x128xf32>
    %311 = tpu.matmul %309, %310, %cst_235 {dimension_numbers = #tpu.dot_dimension_numbers<[1], [0], [0], [1], [0, 0, 1, 1], [], []>} : vector<16x768xbf16>, vector<768x128xbf16>, vector<16x128xf32> -> vector<16x128xf32>
    %c24_236 = arith.constant 24 : index
    %c0_237 = arith.constant 0 : index
    %312 = vector.load %arg3[%c24_236, %c0_237] : memref<25x128xf32, #tpu.memory_space<vmem>>, vector<1x128xf32>
    %313 = vector.broadcast %312 : vector<1x128xf32> to vector<16x128xf32>
    %314 = arith.addf %311, %313 : vector<16x128xf32>
    %cst_238 = arith.constant 0.000000e+00 : f32
    %315 = vector.broadcast %cst_238 : f32 to vector<16x128xf32>
    %316 = arith.maximumf %314, %315 : vector<16x128xf32>
    %317 = arith.addf %50, %76 : vector<16x128xf32>
    %318 = arith.addf %317, %112 : vector<16x128xf32>
    %319 = arith.addf %318, %184 : vector<16x128xf32>
    %320 = arith.addf %319, %292 : vector<16x128xf32>
    %321 = arith.addf %320, %316 : vector<16x128xf32>
    %c14_239 = arith.constant 14 : index
    %c0_240 = arith.constant 0 : index
    %322 = vector.load %arg4[%c14_239, %c0_240] : memref<16x128xf32, #tpu.memory_space<vmem>>, vector<1x128xf32>
    %323 = vector.broadcast %322 : vector<1x128xf32> to vector<16x128xf32>
    %324 = arith.mulf %321, %323 : vector<16x128xf32>
    %c15_241 = arith.constant 15 : index
    %c0_242 = arith.constant 0 : index
    %325 = vector.load %arg4[%c15_241, %c0_242] : memref<16x128xf32, #tpu.memory_space<vmem>>, vector<1x128xf32>
    %326 = vector.broadcast %325 : vector<1x128xf32> to vector<16x128xf32>
    %327 = arith.addf %324, %326 : vector<16x128xf32>
    %c0_243 = arith.constant 0 : index
    %c0_244 = arith.constant 0 : index
    %c0_245 = arith.constant 0 : index
    %328 = vector.load %arg5[%c0_243, %c0_244, %c0_245] : memref<1x16x128xf32, #tpu.memory_space<vmem>>, vector<1x16x128xf32>
    %329 = vector.shape_cast %328 : vector<1x16x128xf32> to vector<16x128xf32>
    %330 = vector.shape_cast %327 : vector<16x128xf32> to vector<1x16x128xf32>
    tpu.vector_store %arg5[%c0_243, %c0_244, %c0_245], %330 {strides = array<i32>} : memref<1x16x128xf32, #tpu.memory_space<vmem>>, vector<1x16x128xf32>,
    return
  }
  func.func @transform_0(%arg0: i32) -> (i32, i32, i32) {
    %c0_i32 = arith.constant 0 : i32
    %c0_i32_0 = arith.constant 0 : i32
    %c0_i32_1 = arith.constant 0 : i32
    return %arg0, %c0_i32, %c0_i32_0 : i32, i32, i32
  }
  func.func @transform_1(%arg0: i32) -> (i32, i32) {
    %c0_i32 = arith.constant 0 : i32
    %c0_i32_0 = arith.constant 0 : i32
    %c0_i32_1 = arith.constant 0 : i32
    return %c0_i32, %c0_i32_0 : i32, i32
  }
  func.func @transform_2(%arg0: i32) -> (i32, i32) {
    %c0_i32 = arith.constant 0 : i32
    %c0_i32_0 = arith.constant 0 : i32
    %c0_i32_1 = arith.constant 0 : i32
    return %c0_i32, %c0_i32_0 : i32, i32
  }
  func.func @transform_3(%arg0: i32) -> (i32, i32) {
    %c0_i32 = arith.constant 0 : i32
    %c0_i32_0 = arith.constant 0 : i32
    %c0_i32_1 = arith.constant 0 : i32
    return %c0_i32, %c0_i32_0 : i32, i32
  }
  func.func @transform_4(%arg0: i32) -> (i32, i32, i32) {
    %c0_i32 = arith.constant 0 : i32
    %c0_i32_0 = arith.constant 0 : i32
    %c0_i32_1 = arith.constant 0 : i32
    return %arg0, %c0_i32, %c0_i32_0 : i32, i32, i32
  }
}

</mosaic_0001>

<bundles_post_ra>
// kernel: _lambda_.1
= control target key start
LH: loop header
LB: loop body
LE: loop exit
PB: predicated region body
PF: predicated region fallthrough
CT: control target
= control target key end

     0   :  { %9 = vsyncpa [#allocation4], 0  ;;  %s7453_s0 = inlined_call_operand.hbm [shape: f32[2,16,128], index: 0, kind: input, shape index: {}]   ;;  %s7454_s1 = inlined_call_operand.hbm [shape: bf16[6656,128], index: 1, kind: input, shape index: {}]   ;;  %s7455_s2 = inlined_call_operand.hbm [shape: f32[25,128], index: 2, kind: input, shape index: {}]   ;;  %s7456_s3 = inlined_call_operand.hbm [shape: f32[16,128], index: 3, kind: input, shape index: {}]   ;;  %s7457_s4 = inlined_call_operand.hbm [shape: f32[2,16,128], index: 4, kind: output, shape index: {}]  }
   0x1   :  { %11 = vsyncpa [#allocation4 + $0x1], 0 }
   0x2   :  { %12 = vsyncpa [#allocation7], 0 }
   0x3   :  { %13 = vsyncpa [#allocation10], 0 }
   0x4   :  { %14 = vsyncpa [#allocation5], 0 }
   0x5   :  { %16 = vsyncpa [#allocation5 + $0x1], 0  ;;  %s7237_s15 = smov 0   ;;  %s7239_s16 = smov 0  }
   0x6   :  { %s7241_s17 = smov 0   ;;  %s7243_s18 = smov 0  }
   0x7 LB: > { %s7258_s19 = sadd.s32 4294967295, %s7200_s18   ;;  %s4779_s20 = sadd.s32 4294967294, %s7200_s18   ;;  %s7200_s18 = sphi %s7243_s18, %s7468_s18   ;;  %s7196_s17 = sphi %s7241_s17, %s7467_s17   ;;  %s7192_s16 = sphi %s7239_s16, %s7466_s16   ;;  %s7188_s15 = sphi %s7237_s15, %s7465_s15  }
   0x8   : > { %p42_p0 = scmp.ne.s32.totalorder %s7192_s16, %s7188_s15  ;;  %p43_p1 = scmp.eq.s32.totalorder %s7258_s19, 0 }
   0x9   : > { %p129_p2 = scmp.eq.s32.totalorder %s7258_s19, 1  ;;  %p135_p3 = scmp.eq.s32.totalorder %s4779_s20, 1 }
   0xa   : > { %p7267_p4 = por %p43_p1, %p42_p0  ;;  %p4780_p5 = scmp.ge.s32.totalorder %s7200_s18, 1 }
   0xb   : > { %p7272_p6 = por %p135_p3, %p42_p0  ;;  %p142_p7 = scmp.lt.s32.totalorder %s7200_s18, 3 }
   0xc   : > { %s153_s25 = sshll.u32 %s7454_s1, 4  ;;  %s7202_s27 = smov [#allocation6]   ;;  %s154_s25 = int_to_ptr.hbm [resolvable:$true] %s153_s25 }
   0xd   : > { %p7280_p8 = pnand %p4780_p5, %p142_p7  ;;  %s155_s28 = sshll.u32 %s7202_s27, 4  ;;  %s156_s28 = int_to_ptr.vmem [resolvable:$true] %s155_s28 }
   0xe   : > { %s167_s6 = sshll.u32 %s7455_s2, 4  ;;  %s7203_s7 = smov 64   ;;  %s168_s6 = int_to_ptr.hbm [resolvable:$true] %s167_s6 }
   0xf   : > { %p6897_p9 = pneg %p7280_p8  ;;  %s7204_s8 = smov 4  }
  0x10   : > { %s7205_s9 = smov [#allocation8]   ;;  %s7206_s11 = smov 128  }
  0x11   : > { %p7288_p10 = pnand %p6897_p9, %p43_p1  ;;  %s169_s10 = sshll.u32 %s7205_s9, 4  ;;  %s170_s10 = int_to_ptr.vmem [resolvable:$true] %s169_s10 }
  0x12   : > { %s7207_s12 = smov 8   ;;  %s181_s20 = sshll.u32 %s7456_s3, 4  ;;  %s182_s20 = int_to_ptr.hbm [resolvable:$true] %s181_s20 }
  0x13   : > { %6900 = dma.hbm_to_vmem [thread:$0]  (!%p7288_p10), %s154_s25, 53248, %s156_s28, [#allocation7], %s7203_s7, %s7203_s7, %s7204_s8  }
  0x14   : > { %6903 = dma.hbm_to_vmem [thread:$0]  (!%p7288_p10), %s168_s6, 512, %s170_s10, [#allocation7], %s7206_s11, %s7206_s11, %s7207_s12  }
  0x15   : > { %s7208_s23 = smov [#allocation9]   ;;  %s7312_s25 = sadd.s32 1, %s7200_s18  }
  0x16   : > { %s183_s24 = sshll.u32 %s7208_s23, 4  ;;  %s26_s27 = ssub.s32 %s7200_s18, %s7312_s25  ;;  %s184_s24 = int_to_ptr.vmem [resolvable:$true] %s183_s24 }
  0x17   : > { %6906 = dma.hbm_to_vmem [thread:$0]  (!%p7288_p10), %s182_s20, 256, %s184_s24, [#allocation10], %s7206_s11, %s7206_s11, %s7207_s12  }
  0x18   : > { %s29_s28 = sadd.s32 1, %s7196_s17  ;;  %p27_p12 = scmp.eq.s32.totalorder %s26_s27, 0 }
  0x19   : > { %p36_p13 = scmp.ne.s32.totalorder %s7196_s17, %s7192_s16  ;;  %p37_p0 = scmp.eq.s32.totalorder %s7200_s18, 0 }
  0x1a   : > { %s7321_s30 = scalar_select %p27_p12, %s7196_s17, %s29_s28  }
  0x1b   : > { %p7325_p3 = por %p129_p2, %p36_p13  ;;  %p6918_p5 = scmp.lt.s32.totalorder %s7200_s18, 2 }
  0x1c   : > { %s197_s29 = sand.u32 1, %s7196_s17   ;;  %s6463_s6 = sshll.u32 %s7200_s18, 4 }
  0x1d   : > { %p38_p7 = por %p37_p0, %p36_p13  ;;  %s4785_s7 = sshll.u32 %s197_s29, 4 }
  0x1e   : > { %s206_s10 = scalar_lea.hbm %s7453_s0, %s6463_s6  ;;  %s201_s14 = scalar_lea.vmem [#allocation3], %s4785_s7 }
  0x1f   : > { %s207_s13 = sshll.u32 %s206_s10, 4  ;;  %s209_s20 = sshll.u32 %s201_s14, 4  ;;  %s208_s13 = int_to_ptr.hbm [resolvable:$true] %s207_s13  ;;  %s210_s20 = int_to_ptr.vmem [resolvable:$true] %s209_s20 }
  0x20   : > { %p7335_p9 = pnand %p6918_p5, %p38_p7  ;;  %s198_s24 = scalar_lea.sflag [#allocation4], %s197_s29 }
  0x21   : > { %s7096_s27 = sshra.s32 %s208_s13, 4  ;;  %s7103_s7 = scalar_lea.hbm %s7453_s0, 32  ;;  %s7097_s27 = int_to_ptr.hbm [resolvable:$true] %s7096_s27 }
  0x22   : > { %s7098_s28 = scalar_lea.hbm %s7097_s27, 16  ;;  %p7100_p10 = pneg %p7335_p9 }
  0x23   : > { %p7099_p2 = scmp.ne.s32.totalorder %s7097_s27, %s7098_s28  ;;  %p7104_p0 = scmp.lt.s32.totalorder %s7097_s27, %s7453_s0 }
  0x24   : > { %p7105_p5 = scmp.lt.s32.totalorder %s7103_s7, %s7098_s28 }
  0x25   : > { %p7101_p12 = pnand %p7100_p10, %p7099_p2 }
  0x26   : > { %p7106_p7 = por %p7105_p5, %p7104_p0 }
  0x27   : > { %p7102_p13 = pneg %p7101_p12 }
  0x29   : > { %p7107_p11 = pnand %p7106_p7, %p7102_p13 }
  0x2b   : > { %7110 = shalt.err (!%p7107_p11)
}
  0x2c   : > { %6910 = dma.hbm_to_vmem [thread:$0]  (!%p7335_p9), %s208_s13, 256, %s210_s20, %s198_s24, %s7206_s11, %s7206_s11, %s7207_s12  }
  0x2d   : > { %221 = sbr.rel (%p7280_p8) target bundleno = 2172 (0x87c), region = 36  ;;  %s7355_s29 = sand.u32 (!%p7280_p8), 1, %s7192_s16  }
  0x2e   : > { %s4789_s14 = sshll.u32 (!%p7280_p8), %s7355_s29, 4  ;;  %s224_s27 = scalar_lea.sflag (!%p7280_p8), [#allocation4], %s7355_s29 }
  0x2f   : > { %s227_s28 = scalar_lea.vmem (!%p7280_p8), [#allocation3], %s4789_s14 }
  0x32   : > { %7171 = dma.done.wait (%p7267_p4), %s224_s27, 256  }
  0x33   : > { %7173 = vsyncadd (%p7267_p4), %s224_s27, 4294967040 }
  0x34   : > { %7175 = dma.done.wait (%p43_p1), [#allocation7], 53760  }
  0x35   : > { %7177 = vsyncadd (%p43_p1), [#allocation7], 4294913536 }
  0x36   : > { %7179 = dma.done.wait (%p43_p1), [#allocation10], 256  }
  0x37   : > { %7181 = vsyncadd (%p43_p1), [#allocation10], 4294967040  ;;  %v7209_v0 = vmov 0.0   ;;  %v6471_v1 = vld [vmem:[#allocation6 + $0x38] sm:$0xff]  ;;  %v6470_v4 = vld [vmem:[#allocation6 + $0x30] sm:$0xff]  ;;  %s6880_s21 = sshll.u32 %s7258_s19, 4 }
  0x38   : > { %268 = vst [vmem:[#allocation2] sm:$0xff] %v7209_v0  ;;  %v6479_v2 = vld [vmem:[#allocation6 + $0x78] sm:$0xff]  ;;  %485 = vmatpush.bf16.msra.mxu0 %v6471_v1  ;;  %v6478_v5 = vld [vmem:[#allocation6 + $0x70] sm:$0xff]  ;;  %v6469_v7 = vld [vmem:[#allocation6 + $0x28] sm:$0xff]  ;;  %s4673_s12 = scalar_lea.hbm %s7457_s4, %s6880_s21  ;;  %s267_s13 = scalar_lea.vmem [#allocation11], %s4789_s14 }
  0x39   : > { %269 = vst [vmem:[#allocation2 + $0x18] sm:$0xff] %v7209_v0  ;;  %v6487_v3 = vld [vmem:[#allocation6 + $0xb8] sm:$0xff]  ;;  %499 = vmatpush.bf16.msra.mxu1 %v6479_v2  ;;  %v6486_v6 = vld [vmem:[#allocation6 + $0xb0] sm:$0xff]  ;;  %v6477_v8 = vld [vmem:[#allocation6 + $0x68] sm:$0xff]  ;;  %s4674_s20 = sshll.u32 %s267_s13, 4  ;;  %s4676_s23 = sshll.u32 %s4673_s12, 4  ;;  %s4675_s20 = int_to_ptr.vmem [resolvable:$true] %s4674_s20  ;;  %s4677_s23 = int_to_ptr.hbm [resolvable:$true] %s4676_s23 }
  0x3a   : > { %513 = vmatpush.bf16.msra.mxu2 %v6487_v3  ;;  %v6485_v9 = vld [vmem:[#allocation6 + $0xa8] sm:$0xff]  ;;  %v270_v10 = vld [vmem:[%s227_s28] sm:$0xff]  ;;  %v6495_v16 = vld [vmem:[#allocation6 + $0xf8] sm:$0xff]  ;;  %s4662_s19 = scalar_lea.sflag [#allocation5], %s7355_s29  ;;  %s7140_s24 = sshra.s32 %s4677_s23, 4  ;;  %s7141_s24 = int_to_ptr.hbm [resolvable:$true] %s7140_s24 }
  0x3b   : > { %v271_v11 = vld [vmem:[%s227_s28 + $0x8] sm:$0xff]  ;;  %v6965_v12 = vld [vmem:[#allocation9] ss:$0 sm:$0xff]  ;;  %v6966_v13 = vld [vmem:[#allocation9 + $0x1] ss:$0 sm:$0xff]  ;;  %734 = vmatpush.bf16.msra.mxu3 %v6495_v16  ;;  %s7142_s6 = scalar_lea.hbm %s7141_s24, 16  ;;  %p7147_p11 = scmp.lt.s32.totalorder %s7141_s24, %s7457_s4 }
  0x3c   : > { %486 = vmatpush.bf16.msra.mxu0 %v6470_v4  ;;  %v6468_v14 = vld [vmem:[#allocation6 + $0x20] sm:$0xff]  ;;  %v274_v18 = vmul.f32 %v6965_v12, %v270_v10  ;;  %v275_v19 = vmul.f32 %v6965_v12, %v271_v11  ;;  %v6467_v20 = vld [vmem:[#allocation6 + $0x18] sm:$0xff]  ;;  %v6466_v25 = vld [vmem:[#allocation6 + $0x10] sm:$0xff]  ;;  %p7143_p1 = scmp.ne.s32.totalorder %s7141_s24, %s7142_s6  ;;  %s7146_s9 = scalar_lea.hbm %s7457_s4, 32 }
  0x3d   : > { %500 = vmatpush.bf16.msra.mxu1 %v6478_v5  ;;  %v6476_v15 = vld [vmem:[#allocation6 + $0x60] sm:$0xff]  ;;  %v6475_v21 = vld [vmem:[#allocation6 + $0x58] sm:$0xff]  ;;  %v6474_v26 = vld [vmem:[#allocation6 + $0x50] sm:$0xff]  ;;  %p7148_p9 = scmp.lt.s32.totalorder %s7146_s9, %s7142_s6 }
  0x3e   : > { %514 = vmatpush.bf16.msra.mxu2 %v6486_v6  ;;  %v6484_v17 = vld [vmem:[#allocation6 + $0xa0] sm:$0xff]  ;;  %v7373_v22 = vadd.f32 %v6966_v13, %v274_v18  ;;  %v7375_v23 = vadd.f32 %v6966_v13, %v275_v19  ;;  %v6483_v24 = vld [vmem:[#allocation6 + $0x98] sm:$0xff]  ;;  %v6482_v27 = vld [vmem:[#allocation6 + $0x90] sm:$0xff]  ;;  %p7144_p4 = pnand %p7143_p1, %p7325_p3 }
  0x3f   : > { %v6465_v28 = vld [vmem:[#allocation6 + $0x8] sm:$0xff]  ;;  %v6464_v31 = vld [vmem:[#allocation6] sm:$0xff]  ;;  %v6503_v38 = vld [vmem:[#allocation6 + $0x138] sm:$0xff]  ;;  %p7149_p2 = por %p7148_p9, %p7147_p11 }
  0x40   : > { %487 = vmatpush.bf16.msra.mxu0 %v6469_v7  ;;  %280 = vst [vmem:[#allocation2 + $0x8] sm:$0xff] %v7373_v22  ;;  %v6473_v29 = vld [vmem:[#allocation6 + $0x48] sm:$0xff]  ;;  %v6472_v32 = vld [vmem:[#allocation6 + $0x40] sm:$0xff]  ;;  %v6511_v39 = vld [vmem:[#allocation6 + $0x178] sm:$0xff]  ;;  %v7381_v41 = vpack.c.bf16 %v7375_v23, %v7373_v22  ;;  %p7145_p8 = pneg %p7144_p4 }
  0x41   : > { %501 = vmatpush.bf16.msra.mxu1 %v6477_v8  ;;  %281 = vst [vmem:[#allocation2 + $0x10] sm:$0xff] %v7375_v23  ;;  %v6481_v30 = vld [vmem:[#allocation6 + $0x88] sm:$0xff]  ;;  %v6480_v33 = vld [vmem:[#allocation6 + $0x80] sm:$0xff]  ;;  %v6502_v43 = vld [vmem:[#allocation6 + $0x130] sm:$0xff] }
  0x42   : > { %515 = vmatpush.bf16.msra.mxu2 %v6485_v9  ;;  %v6501_v44 = vld [vmem:[#allocation6 + $0x128] sm:$0xff]  ;;  %v6494_v45 = vld [vmem:[#allocation6 + $0xf0] sm:$0xff]  ;;  %v6500_v47 = vld [vmem:[#allocation6 + $0x120] sm:$0xff]  ;;  %p7150_p10 = pnand %p7149_p2, %p7145_p8 }
  0x43   : > { %v6510_v46 = vld [vmem:[#allocation6 + $0x170] sm:$0xff]  ;;  %735 = vmatpush.bf16.msra.mxu3 %v6494_v45  ;;  %v6493_v48 = vld [vmem:[#allocation6 + $0xe8] sm:$0xff]  ;;  %v6499_v50 = vld [vmem:[#allocation6 + $0x118] sm:$0xff] }
  0x44   : > { %488 = vmatpush.bf16.msra.mxu0 %v6468_v14  ;;  %v6509_v49 = vld [vmem:[#allocation6 + $0x168] sm:$0xff]  ;;  %v6492_v51 = vld [vmem:[#allocation6 + $0xe0] sm:$0xff]  ;;  %v6498_v53 = vld [vmem:[#allocation6 + $0x110] sm:$0xff] }
  0x45   : > { %502 = vmatpush.bf16.msra.mxu1 %v6476_v15  ;;  %v6508_v52 = vld [vmem:[#allocation6 + $0x160] sm:$0xff]  ;;  %v6491_v54 = vld [vmem:[#allocation6 + $0xd8] sm:$0xff]  ;;  %v6497_v56 = vld [vmem:[#allocation6 + $0x108] sm:$0xff] }
  0x46   : > { %516 = vmatpush.bf16.msra.mxu2 %v6484_v17  ;;  %v6507_v55 = vld [vmem:[#allocation6 + $0x158] sm:$0xff]  ;;  %v6490_v57 = vld [vmem:[#allocation6 + $0xd0] sm:$0xff]  ;;  %v6496_v59 = vld [vmem:[#allocation6 + $0x100] sm:$0xff] }
  0x47   : > { %v282_v34 = vld [vmem:[#allocation2 + $0x7] sm:$0xff]  ;;  %736 = vmatpush.bf16.msra.mxu3 %v6493_v48  ;;  %v6506_v58 = vld [vmem:[#allocation6 + $0x150] sm:$0xff]  ;;  %v6967_v0 = vld [vmem:[#allocation8] ss:$0 sm:$0xff] }
  0x48   : > { %489 = vmatpush.bf16.msra.mxu0 %v6467_v20  ;;  %v283_v35 = vld [vmem:[#allocation2 + $0xf] sm:$0xff]  ;;  %v6488_v62 = vld [vmem:[#allocation6 + $0xc0] sm:$0xff]  ;;  %v6519_v1 = vld [vmem:[#allocation6 + $0x1b8] sm:$0xff] }
  0x49   : > { %503 = vmatpush.bf16.msra.mxu1 %v6475_v21  ;;  %v286_v36 = vld [vmem:[#allocation2 + $0x9] sm:$0xff]  ;;  %v287_v37 = vld [vmem:[#allocation2 + $0x11] sm:$0xff]  ;;  %v288_v40 = vpack.c.bf16 %v283_v35, %v282_v34  ;;  %v6504_v63 = vld [vmem:[#allocation6 + $0x140] sm:$0xff] }
  0x4a   : > { %517 = vmatpush.bf16.msra.mxu2 %v6483_v24  ;;  %v290_v42 = vpack.c.bf16 %v287_v37, %v286_v36  ;;  %v6489_v60 = vld [vmem:[#allocation6 + $0xc8] sm:$0xff]  ;;  %v6527_v2 = vld [vmem:[#allocation6 + $0x1f8] sm:$0xff]  ;;  %v6518_v4 = vld [vmem:[#allocation6 + $0x1b0] sm:$0xff] }
  0x4b   : > { %737 = vmatpush.bf16.msra.mxu3 %v6492_v51  ;;  %v6505_v61 = vld [vmem:[#allocation6 + $0x148] sm:$0xff]  ;;  %v6526_v5 = vld [vmem:[#allocation6 + $0x1f0] sm:$0xff]  ;;  %v6515_v34 = vld [vmem:[#allocation6 + $0x198] sm:$0xff] }
  0x4c   : > { %490 = vmatpush.bf16.msra.mxu0 %v6466_v25  ;;  %v6517_v9 = vld [vmem:[#allocation6 + $0x1a8] sm:$0xff]  ;;  %v6522_v35 = vld [vmem:[#allocation6 + $0x1d0] sm:$0xff]  ;;  %v6543_v45 = vld [vmem:[#allocation6 + $0x278] sm:$0xff] }
  0x4d   : > { %504 = vmatpush.bf16.msra.mxu1 %v6474_v26  ;;  %v6525_v10 = vld [vmem:[#allocation6 + $0x1e8] sm:$0xff]  ;;  %v6534_v36 = vld [vmem:[#allocation6 + $0x230] sm:$0xff]  ;;  %v6531_v48 = vld [vmem:[#allocation6 + $0x218] sm:$0xff] }
  0x4e   : > { %518 = vmatpush.bf16.msra.mxu2 %v6482_v27  ;;  %v6521_v37 = vld [vmem:[#allocation6 + $0x1c8] sm:$0xff] }
  0x4f   : > { %738 = vmatpush.bf16.msra.mxu3 %v6491_v54  ;;  %v6557_v51 = vld [vmem:[#allocation6 + $0x2e8] sm:$0xff]  ;;  %v6550_v54 = vld [vmem:[#allocation6 + $0x2b0] sm:$0xff] }
  0x50   : > { %491 = vmatpush.bf16.msra.mxu0 %v6465_v28 }
  0x51   : > { %505 = vmatpush.bf16.msra.mxu1 %v6473_v29 }
  0x52   : > { %519 = vmatpush.bf16.msra.mxu2 %v6481_v30  ;;  %v6524_v30 = vld [vmem:[#allocation6 + $0x1e0] sm:$0xff] }
  0x53   : > { %739 = vmatpush.bf16.msra.mxu3 %v6490_v57  ;;  %v6540_v57 = vld [vmem:[#allocation6 + $0x260] sm:$0xff] }
  0x54   : > { %492 = vmatpush.bf16.msra.mxu0 %v6464_v31  ;;  %v6523_v31 = vld [vmem:[#allocation6 + $0x1d8] sm:$0xff] }
  0x55   : > { %506 = vmatpush.bf16.msra.mxu1 %v6472_v32  ;;  %v6516_v32 = vld [vmem:[#allocation6 + $0x1a0] sm:$0xff] }
  0x56   : > { %520 = vmatpush.bf16.msra.mxu2 %v6480_v33  ;;  %v6535_v33 = vld [vmem:[#allocation6 + $0x238] sm:$0xff] }
  0x57   : > { %493 = vmatmul.bf16.vlgmr.msra.gmra.mxu0 %v288_v40  ;;  %740 = vmatpush.bf16.msra.mxu3 %v6489_v60  ;;  %v6520_v40 = vld [vmem:[#allocation6 + $0x1c0] sm:$0xff] }
  0x58   : > { %748 = vmatpush.bf16.msrb.mxu0 %v6503_v38  ;;  %507 = vmatmul.bf16.vlgmr.msra.gmra.mxu1 %v7381_v41  ;;  %v6514_v38 = vld [vmem:[#allocation6 + $0x190] sm:$0xff]  ;;  %v6528_v60 = vld [vmem:[#allocation6 + $0x200] sm:$0xff] }
  0x59   : > { %762 = vmatpush.bf16.msrb.mxu1 %v6511_v39  ;;  %521 = vmatmul.bf16.vlgmr.msra.gmra.mxu2 %v290_v42  ;;  %v6533_v39 = vld [vmem:[#allocation6 + $0x228] sm:$0xff]  ;;  %v6559_v42 = vld [vmem:[#allocation6 + $0x2f8] sm:$0xff] }
  0x5a   : > { %983 = vmatpush.bf16.msrb.mxu2 %v6519_v1  ;;  %v6547_v1 = vld [vmem:[#allocation6 + $0x298] sm:$0xff] }
  0x5b   : > { %741 = vmatpush.bf16.msra.mxu3 %v6488_v62  ;;  %v6548_v62 = vld [vmem:[#allocation6 + $0x2a0] sm:$0xff] }
  0x5c   : > { %749 = vmatpush.bf16.msrb.mxu0 %v6502_v43  ;;  %v6513_v43 = vld [vmem:[#allocation6 + $0x188] sm:$0xff] }
  0x5d   : > { %763 = vmatpush.bf16.msrb.mxu1 %v6510_v46  ;;  %v6558_v46 = vld [vmem:[#allocation6 + $0x2f0] sm:$0xff] }
  0x5e   : > { %984 = vmatpush.bf16.msrb.mxu2 %v6518_v4  ;;  %v6968_v4 = vld [vmem:[#allocation8 + $0x1] ss:$0 sm:$0xff] }
  0x5f   : > { %997 = vmatpush.bf16.msrb.mxu3 %v6527_v2  ;;  %v6537_v2 = vld [vmem:[#allocation6 + $0x248] sm:$0xff] }
  0x60   : > { %750 = vmatpush.bf16.msrb.mxu0 %v6501_v44  ;;  %v6532_v44 = vld [vmem:[#allocation6 + $0x220] sm:$0xff] }
  0x61   : > { %764 = vmatpush.bf16.msrb.mxu1 %v6509_v49  ;;  %v6542_v49 = vld [vmem:[#allocation6 + $0x270] sm:$0xff] }
  0x62   : > { %985 = vmatpush.bf16.msrb.mxu2 %v6517_v9  ;;  %v6552_v9 = vld [vmem:[#allocation6 + $0x2c0] sm:$0xff] }
  0x63   : > { %998 = vmatpush.bf16.msrb.mxu3 %v6526_v5  ;;  %v6546_v5 = vld [vmem:[#allocation6 + $0x290] sm:$0xff] }
  0x64   : > { %751 = vmatpush.bf16.msrb.mxu0 %v6500_v47  ;;  %v6512_v47 = vld [vmem:[#allocation6 + $0x180] sm:$0xff] }
  0x65   : > { %765 = vmatpush.bf16.msrb.mxu1 %v6508_v52  ;;  %v6530_v52 = vld [vmem:[#allocation6 + $0x210] sm:$0xff] }
  0x66   : > { %986 = vmatpush.bf16.msrb.mxu2 %v6516_v32 }
  0x67   : > { %999 = vmatpush.bf16.msrb.mxu3 %v6525_v10 }
  0x68   : > { %752 = vmatpush.bf16.msrb.mxu0 %v6499_v50  ;;  %v6551_v50 = vld [vmem:[#allocation6 + $0x2b8] sm:$0xff] }
  0x69   : > { %766 = vmatpush.bf16.msrb.mxu1 %v6507_v55  ;;  %v6556_v55 = vld [vmem:[#allocation6 + $0x2e0] sm:$0xff] }
  0x6a   : > { %987 = vmatpush.bf16.msrb.mxu2 %v6515_v34 }
  0x6b   : > { %1000 = vmatpush.bf16.msrb.mxu3 %v6524_v30 }
  0x6c   : > { %753 = vmatpush.bf16.msrb.mxu0 %v6498_v53  ;;  %v6541_v53 = vld [vmem:[#allocation6 + $0x268] sm:$0xff] }
  0x6d   : > { %767 = vmatpush.bf16.msrb.mxu1 %v6506_v58  ;;  %v6549_v58 = vld [vmem:[#allocation6 + $0x2a8] sm:$0xff] }
  0x6e   : > { %988 = vmatpush.bf16.msrb.mxu2 %v6514_v38 }
  0x6f   : > { %1001 = vmatpush.bf16.msrb.mxu3 %v6523_v31 }
  0x70   : > { %754 = vmatpush.bf16.msrb.mxu0 %v6497_v56  ;;  %v6529_v56 = vld [vmem:[#allocation6 + $0x208] sm:$0xff] }
  0x71   : > { %768 = vmatpush.bf16.msrb.mxu1 %v6505_v61  ;;  %v6539_v61 = vld [vmem:[#allocation6 + $0x258] sm:$0xff] }
  0x72   : > { %989 = vmatpush.bf16.msrb.mxu2 %v6513_v43  ;;  %v6564_v43 = vld [vmem:[#allocation6 + $0x320] sm:$0xff] }
  0x73   : > { %1002 = vmatpush.bf16.msrb.mxu3 %v6522_v35 }
  0x74   : > { %755 = vmatpush.bf16.msrb.mxu0 %v6496_v59  ;;  %v6555_v59 = vld [vmem:[#allocation6 + $0x2d8] sm:$0xff] }
  0x75   : > { %769 = vmatpush.bf16.msrb.mxu1 %v6504_v63  ;;  %v6554_v63 = vld [vmem:[#allocation6 + $0x2d0] sm:$0xff] }
  0x76   : > { %990 = vmatpush.bf16.msrb.mxu2 %v6512_v47  ;;  %v6582_v47 = vld [vmem:[#allocation6 + $0x3b0] sm:$0xff] }
  0x77   : > { %1003 = vmatpush.bf16.msrb.mxu3 %v6521_v37 }
  0x78   : > { %1011 = vmatpush.bf16.msra.mxu0 %v6535_v33 }
  0x79   : > { %1232 = vmatpush.bf16.msra.mxu1 %v6543_v45  ;;  %v6573_v45 = vld [vmem:[#allocation6 + $0x368] sm:$0xff] }
  0x7a   : > { %1246 = vmatpush.bf16.msra.mxu2 %v6551_v50  ;;  %v6581_v50 = vld [vmem:[#allocation6 + $0x3a8] sm:$0xff] }
  0x7b   : > { %1004 = vmatpush.bf16.msrb.mxu3 %v6520_v40  ;;  %v6566_v40 = vld [vmem:[#allocation6 + $0x330] sm:$0xff] }
  0x7c   : > { %1012 = vmatpush.bf16.msra.mxu0 %v6534_v36 }
  0x7d   : > { %1233 = vmatpush.bf16.msra.mxu1 %v6542_v49  ;;  %v6562_v49 = vld [vmem:[#allocation6 + $0x310] sm:$0xff] }
  0x7e   : > { %1247 = vmatpush.bf16.msra.mxu2 %v6550_v54  ;;  %v6570_v54 = vld [vmem:[#allocation6 + $0x350] sm:$0xff] }
  0x80   : > { %1013 = vmatpush.bf16.msra.mxu0 %v6533_v39  ;;  %v6567_v39 = vld [vmem:[#allocation6 + $0x338] sm:$0xff] }
  0x81   : > { %1234 = vmatpush.bf16.msra.mxu1 %v6541_v53  ;;  %v6580_v53 = vld [vmem:[#allocation6 + $0x3a0] sm:$0xff] }
  0x82   : > { %1248 = vmatpush.bf16.msra.mxu2 %v6549_v58  ;;  %v6569_v58 = vld [vmem:[#allocation6 + $0x348] sm:$0xff] }
  0x84   : > { %1014 = vmatpush.bf16.msra.mxu0 %v6532_v44  ;;  %v6583_v44 = vld [vmem:[#allocation6 + $0x3b8] sm:$0xff] }
  0x85   : > { %1235 = vmatpush.bf16.msra.mxu1 %v6540_v57  ;;  %v6599_v57 = vld [vmem:[#allocation6 + $0x438] sm:$0xff] }
  0x86   : > { %1249 = vmatpush.bf16.msra.mxu2 %v6548_v62  ;;  %v6969_v62 = vld [vmem:[#allocation8 + $0x2] ss:$0 sm:$0xff] }
  0x88   : > { %1015 = vmatpush.bf16.msra.mxu0 %v6531_v48  ;;  %v6572_v48 = vld [vmem:[#allocation6 + $0x360] sm:$0xff] }
  0x89   : > { %1236 = vmatpush.bf16.msra.mxu1 %v6539_v61  ;;  %v6568_v61 = vld [vmem:[#allocation6 + $0x340] sm:$0xff] }
  0x8a   : > { %1250 = vmatpush.bf16.msra.mxu2 %v6547_v1  ;;  %v6597_v1 = vld [vmem:[#allocation6 + $0x428] sm:$0xff] }
  0x8c   : > { %1016 = vmatpush.bf16.msra.mxu0 %v6530_v52  ;;  %v6561_v52 = vld [vmem:[#allocation6 + $0x308] sm:$0xff] }
  0x8e   : > { %1251 = vmatpush.bf16.msra.mxu2 %v6546_v5  ;;  %v6596_v5 = vld [vmem:[#allocation6 + $0x420] sm:$0xff] }
  0x90   : > { %1017 = vmatpush.bf16.msra.mxu0 %v6529_v56  ;;  %v6579_v56 = vld [vmem:[#allocation6 + $0x398] sm:$0xff] }
  0x94   : > { %1018 = vmatpush.bf16.msra.mxu0 %v6528_v60  ;;  %v6598_v60 = vld [vmem:[#allocation6 + $0x430] sm:$0xff] }
  0xd4   : > { %v494_v3 = vpop.f32.mrf.mxu0 }
  0xd5   : > { %v495_v6 = vadd.f32 %v6967_v0, %v494_v3  ;;  %v508_v7 = vpop.f32.mrf.mxu1  ;;  %v6553_v3 = vld [vmem:[#allocation6 + $0x2c8] sm:$0xff] }
  0xd7   : > { %v509_v8 = vadd.f32 %v508_v7, %v495_v6 }
  0xdc   : > { %v522_v11 = vpop.f32.mrf.mxu2  ;;  %v496_v13 = vpop.f32.mrf.mxu0 }
  0xdd   : > { %v523_v12 = vadd.f32 %v522_v11, %v509_v8  ;;  %v497_v15 = vadd.f32 %v6967_v0, %v496_v13  ;;  %v510_v16 = vpop.f32.mrf.mxu1  ;;  %v6538_v0 = vld [vmem:[#allocation6 + $0x250] sm:$0xff]  ;;  %v6536_v8 = vld [vmem:[#allocation6 + $0x240] sm:$0xff]  ;;  %v6545_v11 = vld [vmem:[#allocation6 + $0x288] sm:$0xff] }
  0xde   : > { %1237 = vmatpush.bf16.msra.mxu1 %v6538_v0  ;;  %1252 = vmatpush.bf16.msra.mxu2 %v6545_v11  ;;  %v6577_v0 = vld [vmem:[#allocation6 + $0x388] sm:$0xff]  ;;  %v6595_v11 = vld [vmem:[#allocation6 + $0x418] sm:$0xff] }
  0xdf   : > { %v527_v14 = vmax.f32 %v523_v12, 0.0  ;;  %v511_v17 = vadd.f32 %v510_v16, %v497_v15  ;;  %v6544_v15 = vld [vmem:[#allocation6 + $0x280] sm:$0xff] }
  0xe1   : > { %529 = vst [vmem:[#allocation2 + $0x8] sm:$0xff] %v527_v14 }
  0xe2   : > { %1238 = vmatpush.bf16.msra.mxu1 %v6537_v2  ;;  %1253 = vmatpush.bf16.msra.mxu2 %v6544_v15  ;;  %v6594_v15 = vld [vmem:[#allocation6 + $0x410] sm:$0xff] }
  0xe4   : > { %v524_v18 = vpop.f32.mrf.mxu2 }
  0xe5   : > { %v525_v19 = vadd.f32 %v524_v18, %v511_v17 }
  0xe6   : > { %1239 = vmatpush.bf16.msra.mxu1 %v6536_v8 }
  0xe7   : > { %v528_v20 = vmax.f32 %v525_v19, 0.0 }
  0xe8   : > { %v531_v24 = vld [vmem:[#allocation2 + $0x6] sm:$0xff] }
  0xe9   : > { %530 = vst [vmem:[#allocation2 + $0x10] sm:$0xff] %v528_v20  ;;  %v538_v21 = vpack.c.bf16 %v528_v20, %v527_v14 }
  0xeb   : > { %756 = vmatmul.bf16.vlgmr.msrb.gmra.mxu0 %v538_v21 }
  0xec   : > { %1481 = vmatpush.bf16.msrb.mxu0 %v6567_v39  ;;  %v6589_v39 = vld [vmem:[#allocation6 + $0x3e8] sm:$0xff] }
  0xf0   : > { %v532_v25 = vld [vmem:[#allocation2 + $0xe] sm:$0xff]  ;;  %1482 = vmatpush.bf16.msrb.mxu0 %v6566_v40  ;;  %v6588_v40 = vld [vmem:[#allocation6 + $0x3e0] sm:$0xff] }
  0xf1   : > { %v535_v26 = vld [vmem:[#allocation2 + $0xa] sm:$0xff]  ;;  %v536_v27 = vld [vmem:[#allocation2 + $0x12] sm:$0xff]  ;;  %v537_v28 = vpack.c.bf16 %v532_v25, %v531_v24 }
  0xf2   : > { %v539_v29 = vpack.c.bf16 %v536_v27, %v535_v26 }
  0xf3   : > { %742 = vmatmul.bf16.vlgmr.msra.gmra.mxu3 %v537_v28 }
  0xf4   : > { %770 = vmatmul.bf16.vlgmr.msrb.gmra.mxu1 %v539_v29  ;;  %1260 = vmatpush.bf16.msra.mxu3 %v6559_v42  ;;  %v6575_v42 = vld [vmem:[#allocation6 + $0x378] sm:$0xff] }
  0xf5   : > { %1495 = vmatpush.bf16.msrb.mxu1 %v6575_v42 }
  0xf8   : > { %1261 = vmatpush.bf16.msra.mxu3 %v6558_v46  ;;  %v6563_v46 = vld [vmem:[#allocation6 + $0x318] sm:$0xff] }
  0xfc   : > { %1262 = vmatpush.bf16.msra.mxu3 %v6557_v51  ;;  %v6571_v51 = vld [vmem:[#allocation6 + $0x358] sm:$0xff] }
 0x100   : > { %1263 = vmatpush.bf16.msra.mxu3 %v6556_v55  ;;  %v6560_v55 = vld [vmem:[#allocation6 + $0x300] sm:$0xff] }
 0x104   : > { %1264 = vmatpush.bf16.msra.mxu3 %v6555_v59  ;;  %v6578_v59 = vld [vmem:[#allocation6 + $0x390] sm:$0xff] }
 0x108   : > { %1265 = vmatpush.bf16.msra.mxu3 %v6554_v63 }
 0x10c   : > { %1266 = vmatpush.bf16.msra.mxu3 %v6553_v3 }
 0x110   : > { %1267 = vmatpush.bf16.msra.mxu3 %v6552_v9 }
 0x168   : > { %v757_v6 = vpop.f32.mrf.mxu0 }
 0x170   : > { %v759_v19 = vpop.f32.mrf.mxu0 }
 0x171   : > { %v771_v12 = vpop.f32.mrf.mxu1 }
 0x176   : > { %v743_v7 = vpop.f32.mrf.mxu3 }
 0x177   : > { %v744_v10 = vadd.f32 %v6968_v4, %v743_v7 }
 0x179   : > { %v758_v13 = vadd.f32 %v757_v6, %v744_v10  ;;  %v773_v21 = vpop.f32.mrf.mxu1 }
 0x17b   : > { %v772_v14 = vadd.f32 %v771_v12, %v758_v13  ;;  %v6970_v12 = vld [vmem:[#allocation8 + $0x3] ss:$0 sm:$0xff] }
 0x17d   : > { %v776_v16 = vmax.f32 %v772_v14, 0.0 }
 0x17e   : > { %v745_v17 = vpop.f32.mrf.mxu3 }
 0x17f   : > { %778 = vst [vmem:[#allocation2 + $0x8] sm:$0xff] %v776_v16  ;;  %v746_v18 = vadd.f32 %v6968_v4, %v745_v17  ;;  %v6576_v4 = vld [vmem:[#allocation6 + $0x380] sm:$0xff] }
 0x181   : > { %v760_v20 = vadd.f32 %v759_v19, %v746_v18  ;;  %v6593_v18 = vld [vmem:[#allocation6 + $0x408] sm:$0xff] }
 0x183   : > { %v774_v24 = vadd.f32 %v773_v21, %v760_v20 }
 0x185   : > { %v777_v25 = vmax.f32 %v774_v24, 0.0  ;;  %v6592_v24 = vld [vmem:[#allocation6 + $0x400] sm:$0xff] }
 0x186   : > { %v780_v27 = vld [vmem:[#allocation2 + $0x5] sm:$0xff] }
 0x187   : > { %779 = vst [vmem:[#allocation2 + $0x10] sm:$0xff] %v777_v25  ;;  %v787_v26 = vpack.c.bf16 %v777_v25, %v776_v16 }
 0x189   : > { %1005 = vmatmul.bf16.vlgmr.msrb.gmra.mxu3 %v787_v26 }
 0x18e   : > { %v781_v28 = vld [vmem:[#allocation2 + $0xd] sm:$0xff] }
 0x18f   : > { %v784_v29 = vld [vmem:[#allocation2 + $0xb] sm:$0xff]  ;;  %v785_v30 = vld [vmem:[#allocation2 + $0x13] sm:$0xff]  ;;  %v786_v31 = vpack.c.bf16 %v781_v28, %v780_v27 }
 0x190   : > { %1027 = vst [vmem:[#allocation2 + $0x8] sm:$0xff] %v7373_v22  ;;  %v788_v32 = vpack.c.bf16 %v785_v30, %v784_v29  ;;  %v6565_v22 = vld [vmem:[#allocation6 + $0x328] sm:$0xff] }
 0x191   : > { %1028 = vst [vmem:[#allocation2 + $0x10] sm:$0xff] %v7375_v23  ;;  %991 = vmatmul.bf16.vlgmr.msrb.gmra.mxu2 %v786_v31  ;;  %v6574_v23 = vld [vmem:[#allocation6 + $0x370] sm:$0xff]  ;;  %1483 = vmatpush.bf16.msrb.mxu0 %v6565_v22  ;;  %v6591_v31 = vld [vmem:[#allocation6 + $0x3f8] sm:$0xff] }
 0x192   : > { %1019 = vmatmul.bf16.vlgmr.msra.gmra.mxu0 %v788_v32  ;;  %1496 = vmatpush.bf16.msrb.mxu1 %v6574_v23 }
 0x193   : > { %1509 = vmatpush.bf16.msrb.mxu2 %v6583_v44  ;;  %1592 = vmatpush.bf16.msrb.mxu3 %v6591_v31 }
 0x195   : > { %1484 = vmatpush.bf16.msrb.mxu0 %v6564_v43 }
 0x196   : > { %1497 = vmatpush.bf16.msrb.mxu1 %v6573_v45 }
 0x197   : > { %v1029_v33 = vld [vmem:[#allocation2 + $0x7] sm:$0xff]  ;;  %1510 = vmatpush.bf16.msrb.mxu2 %v6582_v47  ;;  %v6586_v47 = vld [vmem:[#allocation6 + $0x3d0] sm:$0xff] }
 0x198   : > { %v1030_v34 = vld [vmem:[#allocation2 + $0xf] sm:$0xff] }
 0x199   : > { %v1033_v35 = vld [vmem:[#allocation2 + $0x9] sm:$0xff]  ;;  %v1034_v36 = vld [vmem:[#allocation2 + $0x11] sm:$0xff]  ;;  %v1035_v37 = vpack.c.bf16 %v1030_v34, %v1029_v33  ;;  %1485 = vmatpush.bf16.msrb.mxu0 %v6563_v46 }
 0x19a   : > { %v1037_v38 = vpack.c.bf16 %v1034_v36, %v1033_v35  ;;  %1498 = vmatpush.bf16.msrb.mxu1 %v6572_v48  ;;  %v6607_v33 = vld [vmem:[#allocation6 + $0x478] sm:$0xff]  ;;  %v6590_v35 = vld [vmem:[#allocation6 + $0x3f0] sm:$0xff] }
 0x19b   : > { %1240 = vmatmul.bf16.vlgmr.msra.gmra.mxu1 %v1035_v37  ;;  %1511 = vmatpush.bf16.msrb.mxu2 %v6581_v50  ;;  %v6606_v36 = vld [vmem:[#allocation6 + $0x470] sm:$0xff]  ;;  %v6587_v46 = vld [vmem:[#allocation6 + $0x3d8] sm:$0xff]  ;;  %v6605_v50 = vld [vmem:[#allocation6 + $0x468] sm:$0xff] }
 0x19c   : > { %1268 = vmatmul.bf16.vlgmr.msra.gmra.mxu3 %v1037_v38  ;;  %v6615_v48 = vld [vmem:[#allocation6 + $0x4b8] sm:$0xff] }
 0x19d   : > { %1486 = vmatpush.bf16.msrb.mxu0 %v6562_v49  ;;  %1593 = vmatpush.bf16.msrb.mxu3 %v6590_v35  ;;  %v6585_v49 = vld [vmem:[#allocation6 + $0x3c8] sm:$0xff]  ;;  %v6972_v35 = vld [vmem:[#allocation8 + $0x6] ss:$0 sm:$0xff] }
 0x19e   : > { %1499 = vmatpush.bf16.msrb.mxu1 %v6571_v51  ;;  %v6614_v51 = vld [vmem:[#allocation6 + $0x4b0] sm:$0xff] }
 0x19f   : > { %1512 = vmatpush.bf16.msrb.mxu2 %v6580_v53  ;;  %v6604_v53 = vld [vmem:[#allocation6 + $0x460] sm:$0xff] }
 0x1a1   : > { %1254 = vmatmul.bf16.vlgmr.msra.gmra.mxu2 %v7381_v41  ;;  %1487 = vmatpush.bf16.msrb.mxu0 %v6561_v52  ;;  %v6584_v52 = vld [vmem:[#allocation6 + $0x3c0] sm:$0xff] }
 0x1a2   : > { %1500 = vmatpush.bf16.msrb.mxu1 %v6570_v54  ;;  %1594 = vmatpush.bf16.msrb.mxu3 %v6589_v39  ;;  %v6623_v54 = vld [vmem:[#allocation6 + $0x4f8] sm:$0xff]  ;;  %v6632_v39 = vld [vmem:[#allocation6 + $0x540] sm:$0xff] }
 0x1a3   : > { %1513 = vmatpush.bf16.msrb.mxu2 %v6579_v56  ;;  %v6603_v56 = vld [vmem:[#allocation6 + $0x458] sm:$0xff] }
 0x1a5   : > { %1488 = vmatpush.bf16.msrb.mxu0 %v6560_v55  ;;  %v6613_v55 = vld [vmem:[#allocation6 + $0x4a8] sm:$0xff] }
 0x1a6   : > { %1501 = vmatpush.bf16.msrb.mxu1 %v6569_v58  ;;  %1595 = vmatpush.bf16.msrb.mxu3 %v6588_v40  ;;  %v6612_v58 = vld [vmem:[#allocation6 + $0x4a0] sm:$0xff] }
 0x1a7   : > { %1514 = vmatpush.bf16.msrb.mxu2 %v6578_v59  ;;  %v6602_v59 = vld [vmem:[#allocation6 + $0x450] sm:$0xff] }
 0x1a9   : > { %1674 = vmatpush.bf16.msra.mxu0 %v6599_v57  ;;  %v6622_v57 = vld [vmem:[#allocation6 + $0x4f0] sm:$0xff] }
 0x1aa   : > { %1502 = vmatpush.bf16.msrb.mxu1 %v6568_v61  ;;  %1596 = vmatpush.bf16.msrb.mxu3 %v6587_v46  ;;  %v6611_v61 = vld [vmem:[#allocation6 + $0x498] sm:$0xff] }
 0x1ab   : > { %1515 = vmatpush.bf16.msrb.mxu2 %v6577_v0  ;;  %v6610_v0 = vld [vmem:[#allocation6 + $0x490] sm:$0xff] }
 0x1ad   : > { %1675 = vmatpush.bf16.msra.mxu0 %v6598_v60  ;;  %v6621_v60 = vld [vmem:[#allocation6 + $0x4e8] sm:$0xff] }
 0x1ae   : > { %1895 = vmatpush.bf16.msra.mxu1 %v6607_v33  ;;  %1597 = vmatpush.bf16.msrb.mxu3 %v6586_v47 }
 0x1af   : > { %1516 = vmatpush.bf16.msrb.mxu2 %v6576_v4  ;;  %v6609_v4 = vld [vmem:[#allocation6 + $0x488] sm:$0xff] }
 0x1b1   : > { %1676 = vmatpush.bf16.msra.mxu0 %v6597_v1  ;;  %v6600_v1 = vld [vmem:[#allocation6 + $0x440] sm:$0xff] }
 0x1b2   : > { %1896 = vmatpush.bf16.msra.mxu1 %v6606_v36  ;;  %1598 = vmatpush.bf16.msrb.mxu3 %v6585_v49 }
 0x1b3   : > { %1909 = vmatpush.bf16.msra.mxu2 %v6615_v48  ;;  %v6629_v48 = vld [vmem:[#allocation6 + $0x528] sm:$0xff] }
 0x1b5   : > { %1677 = vmatpush.bf16.msra.mxu0 %v6596_v5 }
 0x1b6   : > { %1897 = vmatpush.bf16.msra.mxu1 %v6605_v50  ;;  %1599 = vmatpush.bf16.msrb.mxu3 %v6584_v52 }
 0x1b7   : > { %1910 = vmatpush.bf16.msra.mxu2 %v6614_v51 }
 0x1b9   : > { %1678 = vmatpush.bf16.msra.mxu0 %v6595_v11  ;;  %1600 = vmatmul.bf16.vlgmr.msrb.gmra.mxu3 %v7381_v41  ;;  %v6617_v11 = vld [vmem:[#allocation6 + $0x4c8] sm:$0xff] }
 0x1ba   : > { %1898 = vmatpush.bf16.msra.mxu1 %v6604_v53  ;;  %1923 = vmatpush.bf16.msra.mxu3 %v6623_v54 }
 0x1bb   : > { %1911 = vmatpush.bf16.msra.mxu2 %v6613_v55  ;;  %v6628_v55 = vld [vmem:[#allocation6 + $0x520] sm:$0xff] }
 0x1bd   : > { %1679 = vmatpush.bf16.msra.mxu0 %v6594_v15  ;;  %v6636_v15 = vld [vmem:[#allocation6 + $0x560] sm:$0xff] }
 0x1be   : > { %1899 = vmatpush.bf16.msra.mxu1 %v6603_v56  ;;  %1924 = vmatpush.bf16.msra.mxu3 %v6622_v57  ;;  %v6627_v56 = vld [vmem:[#allocation6 + $0x518] sm:$0xff]  ;;  %v6626_v57 = vld [vmem:[#allocation6 + $0x510] sm:$0xff] }
 0x1bf   : > { %1912 = vmatpush.bf16.msra.mxu2 %v6612_v58  ;;  %v6655_v58 = vld [vmem:[#allocation6 + $0x5f8] sm:$0xff] }
 0x1c1   : > { %1680 = vmatpush.bf16.msra.mxu0 %v6593_v18 }
 0x1c2   : > { %1900 = vmatpush.bf16.msra.mxu1 %v6602_v59  ;;  %1925 = vmatpush.bf16.msra.mxu3 %v6621_v60  ;;  %v6625_v59 = vld [vmem:[#allocation6 + $0x508] sm:$0xff]  ;;  %v6654_v60 = vld [vmem:[#allocation6 + $0x5f0] sm:$0xff] }
 0x1c3   : > { %1913 = vmatpush.bf16.msra.mxu2 %v6611_v61  ;;  %v6624_v61 = vld [vmem:[#allocation6 + $0x500] sm:$0xff] }
 0x1c5   : > { %1681 = vmatpush.bf16.msra.mxu0 %v6592_v24 }
 0x1c7   : > { %1914 = vmatpush.bf16.msra.mxu2 %v6610_v0  ;;  %v6653_v0 = vld [vmem:[#allocation6 + $0x5e8] sm:$0xff] }
 0x1cb   : > { %1915 = vmatpush.bf16.msra.mxu2 %v6609_v4  ;;  %v6645_v4 = vld [vmem:[#allocation6 + $0x5a8] sm:$0xff] }
 0x20c   : > { %v1006_v63 = vpop.f32.mrf.mxu3 }
 0x20f   : > { %v1020_v7 = vpop.f32.mrf.mxu0 }
 0x214   : > { %v992_v2 = vpop.f32.mrf.mxu2  ;;  %v1008_v10 = vpop.f32.mrf.mxu3 }
 0x215   : > { %v993_v3 = vadd.f32 %v6969_v62, %v992_v2  ;;  %v6619_v2 = vld [vmem:[#allocation6 + $0x4d8] sm:$0xff] }
 0x217   : > { %v1007_v6 = vadd.f32 %v1006_v63, %v993_v3  ;;  %v6620_v63 = vld [vmem:[#allocation6 + $0x4e0] sm:$0xff]  ;;  %v6639_v3 = vld [vmem:[#allocation6 + $0x578] sm:$0xff]  ;;  %v1022_v5 = vpop.f32.mrf.mxu0 }
 0x218   : > { %v1241_v14 = vpop.f32.mrf.mxu1  ;;  %1926 = vmatpush.bf16.msra.mxu3 %v6620_v63  ;;  %v6663_v63 = vld [vmem:[#allocation6 + $0x638] sm:$0xff] }
 0x219   : > { %v7387_v8 = vadd.f32 %v1020_v7, %v1007_v6  ;;  %v1242_v17 = vadd.f32 %v6970_v12, %v1241_v14  ;;  %v6618_v6 = vld [vmem:[#allocation6 + $0x4d0] sm:$0xff]  ;;  %v6616_v14 = vld [vmem:[#allocation6 + $0x4c0] sm:$0xff] }
 0x21a   : > { %v6638_v7 = vld [vmem:[#allocation6 + $0x570] sm:$0xff] }
 0x21c   : > { %v994_v9 = vpop.f32.mrf.mxu2  ;;  %1927 = vmatpush.bf16.msra.mxu3 %v6619_v2  ;;  %v6662_v2 = vld [vmem:[#allocation6 + $0x630] sm:$0xff] }
 0x21d   : > { %v995_v13 = vadd.f32 %v6969_v62, %v994_v9  ;;  %v6601_v62 = vld [vmem:[#allocation6 + $0x448] sm:$0xff]  ;;  %v6608_v9 = vld [vmem:[#allocation6 + $0x480] sm:$0xff] }
 0x21e   : > { %1901 = vmatpush.bf16.msra.mxu1 %v6601_v62  ;;  %1916 = vmatpush.bf16.msra.mxu2 %v6608_v9  ;;  %v6647_v62 = vld [vmem:[#allocation6 + $0x5b8] sm:$0xff]  ;;  %v6644_v9 = vld [vmem:[#allocation6 + $0x5a0] sm:$0xff] }
 0x21f   : > { %v7389_v16 = vadd.f32 %v1008_v10, %v995_v13  ;;  %v1269_v20 = vpop.f32.mrf.mxu3  ;;  %v6971_v10 = vld [vmem:[#allocation8 + $0x4] ss:$0 sm:$0xff] }
 0x220   : > { %v1243_v26 = vpop.f32.mrf.mxu1  ;;  %1928 = vmatpush.bf16.msra.mxu3 %v6618_v6  ;;  %v6651_v6 = vld [vmem:[#allocation6 + $0x5d8] sm:$0xff] }
 0x221   : > { %v1244_v28 = vadd.f32 %v6970_v12, %v1243_v26  ;;  %v6637_v12 = vld [vmem:[#allocation6 + $0x568] sm:$0xff]  ;;  %v6634_v26 = vld [vmem:[#allocation6 + $0x550] sm:$0xff]  ;;  %v1023_v33 = vadd.f32 %v1022_v5, %v7389_v16 }
 0x222   : > { %1902 = vmatpush.bf16.msra.mxu1 %v6600_v1  ;;  %v6630_v16 = vld [vmem:[#allocation6 + $0x530] sm:$0xff]  ;;  %v6661_v5 = vld [vmem:[#allocation6 + $0x628] sm:$0xff] }
 0x223   : > { %v1026_v40 = vmax.f32 %v1023_v33, 0.0  ;;  %v6646_v1 = vld [vmem:[#allocation6 + $0x5b0] sm:$0xff] }
 0x224   : > { %v1255_v19 = vpop.f32.mrf.mxu2  ;;  %1929 = vmatpush.bf16.msra.mxu3 %v6617_v11  ;;  %v6650_v11 = vld [vmem:[#allocation6 + $0x5d0] sm:$0xff] }
 0x225   : > { %v1256_v21 = vadd.f32 %v1255_v19, %v1242_v17 }
 0x227   : > { %v1270_v25 = vadd.f32 %v1269_v20, %v1256_v21  ;;  %v1271_v32 = vpop.f32.mrf.mxu3  ;;  %v6635_v21 = vld [vmem:[#allocation6 + $0x558] sm:$0xff] }
 0x228   : > { %1930 = vmatpush.bf16.msra.mxu3 %v6616_v14  ;;  %v6649_v14 = vld [vmem:[#allocation6 + $0x5c8] sm:$0xff] }
 0x229   : > { %v1274_v27 = vmax.f32 %v1270_v25, 0.0 }
 0x22b   : > { %1276 = vst [vmem:[#allocation2 + $0x8] sm:$0xff] %v1274_v27 }
 0x22c   : > { %v1257_v29 = vpop.f32.mrf.mxu2  ;;  %2332 = vmatpush.bf16.msrb.mxu3 %v6655_v58 }
 0x22d   : > { %v1258_v30 = vadd.f32 %v1257_v29, %v1244_v28 }
 0x22f   : > { %v1272_v34 = vadd.f32 %v1271_v32, %v1258_v30  ;;  %v6633_v32 = vld [vmem:[#allocation6 + $0x548] sm:$0xff] }
 0x230   : > { %2333 = vmatpush.bf16.msrb.mxu3 %v6654_v60 }
 0x231   : > { %v1275_v37 = vmax.f32 %v1272_v34, 0.0 }
 0x232   : > { %v1278_v42 = vld [vmem:[#allocation2 + $0x6] sm:$0xff] }
 0x233   : > { %1277 = vst [vmem:[#allocation2 + $0x10] sm:$0xff] %v1275_v37  ;;  %v1285_v38 = vpack.c.bf16 %v1275_v37, %v1274_v27  ;;  %v1025_v27 = vmax.f32 %v7387_v8, 0.0 }
 0x234   : > { %2334 = vmatpush.bf16.msrb.mxu3 %v6653_v0 }
 0x235   : > { %1503 = vmatmul.bf16.vlgmr.msrb.gmra.mxu1 %v1285_v38 }
 0x236   : > { %2097 = vmatpush.bf16.msrb.mxu1 %v6639_v3  ;;  %v6652_v3 = vld [vmem:[#allocation6 + $0x5e0] sm:$0xff] }
 0x238   : > { %2335 = vmatpush.bf16.msrb.mxu3 %v6652_v3 }
 0x23a   : > { %v1279_v22 = vld [vmem:[#allocation2 + $0xe] sm:$0xff]  ;;  %2098 = vmatpush.bf16.msrb.mxu1 %v6638_v7 }
 0x23b   : > { %v1282_v23 = vld [vmem:[#allocation2 + $0xa] sm:$0xff]  ;;  %v1283_v43 = vld [vmem:[#allocation2 + $0x12] sm:$0xff]  ;;  %v1284_v44 = vpack.c.bf16 %v1279_v22, %v1278_v42 }
 0x23c   : > { %v1286_v45 = vpack.c.bf16 %v1283_v43, %v1282_v23  ;;  %v6631_v43 = vld [vmem:[#allocation6 + $0x538] sm:$0xff]  ;;  %2336 = vmatpush.bf16.msrb.mxu3 %v6651_v6  ;;  %v1601_v7 = vpop.f32.mrf.mxu3  ;;  %v6670_v6 = vld [vmem:[#allocation6 + $0x670] sm:$0xff] }
 0x23d   : > { %1489 = vmatmul.bf16.vlgmr.msrb.gmra.mxu0 %v1284_v44 }
 0x23e   : > { %1517 = vmatmul.bf16.vlgmr.msrb.gmra.mxu2 %v1286_v45  ;;  %2099 = vmatpush.bf16.msrb.mxu1 %v6637_v12  ;;  %v6643_v12 = vld [vmem:[#allocation6 + $0x598] sm:$0xff] }
 0x23f   : > { %2015 = vmatpush.bf16.msrb.mxu0 %v6631_v43  ;;  %2318 = vmatpush.bf16.msrb.mxu2 %v6647_v62 }
 0x240   : > { %2337 = vmatpush.bf16.msrb.mxu3 %v6650_v11  ;;  %v6676_v11 = vld [vmem:[#allocation6 + $0x6a0] sm:$0xff] }
 0x242   : > { %2100 = vmatpush.bf16.msrb.mxu1 %v6636_v15  ;;  %v6642_v15 = vld [vmem:[#allocation6 + $0x590] sm:$0xff] }
 0x243   : > { %2016 = vmatpush.bf16.msrb.mxu0 %v6630_v16  ;;  %2319 = vmatpush.bf16.msrb.mxu2 %v6646_v1  ;;  %v6977_v16 = vld [vmem:[#allocation8 + $0x9] ss:$0 sm:$0xff] }
 0x244   : > { %2338 = vmatpush.bf16.msrb.mxu3 %v6649_v14  ;;  %v6666_v14 = vld [vmem:[#allocation6 + $0x650] sm:$0xff] }
 0x246   : > { %2101 = vmatpush.bf16.msrb.mxu1 %v6635_v21  ;;  %v6641_v21 = vld [vmem:[#allocation6 + $0x588] sm:$0xff] }
 0x247   : > { %2017 = vmatpush.bf16.msrb.mxu0 %v6629_v48  ;;  %2320 = vmatpush.bf16.msrb.mxu2 %v6645_v4  ;;  %v6671_v4 = vld [vmem:[#allocation6 + $0x678] sm:$0xff] }
 0x24a   : > { %2102 = vmatpush.bf16.msrb.mxu1 %v6634_v26 }
 0x24b   : > { %2018 = vmatpush.bf16.msrb.mxu0 %v6628_v55  ;;  %2321 = vmatpush.bf16.msrb.mxu2 %v6644_v9  ;;  %v6677_v9 = vld [vmem:[#allocation6 + $0x6a8] sm:$0xff] }
 0x24d   : > { %1682 = vmatmul.bf16.vlgmr.msra.gmra.mxu0 %v7381_v41 }
 0x24e   : > { %2103 = vmatpush.bf16.msrb.mxu1 %v6633_v32 }
 0x24f   : > { %2019 = vmatpush.bf16.msrb.mxu0 %v6627_v56  ;;  %2322 = vmatpush.bf16.msrb.mxu2 %v6643_v12  ;;  %v6667_v12 = vld [vmem:[#allocation6 + $0x658] sm:$0xff] }
 0x252   : > { %2104 = vmatpush.bf16.msrb.mxu1 %v6632_v39  ;;  %v6975_v39 = vld [vmem:[#allocation9 + $0x2] ss:$0 sm:$0xff] }
 0x253   : > { %2020 = vmatpush.bf16.msrb.mxu0 %v6626_v57  ;;  %2323 = vmatpush.bf16.msrb.mxu2 %v6642_v15  ;;  %v6674_v15 = vld [vmem:[#allocation6 + $0x690] sm:$0xff] }
 0x257   : > { %2021 = vmatpush.bf16.msrb.mxu0 %v6625_v59  ;;  %2324 = vmatpush.bf16.msrb.mxu2 %v6641_v21  ;;  %v6672_v21 = vld [vmem:[#allocation6 + $0x680] sm:$0xff] }
 0x25b   : > { %2022 = vmatpush.bf16.msrb.mxu0 %v6624_v61 }
 0x25e   : > { %2023 = vmatmul.bf16.vlgmr.msrb.gmra.mxu0 %v7381_v41 }
 0x25f   : > { %2346 = vmatpush.bf16.msra.mxu0 %v6663_v63 }
 0x263   : > { %2347 = vmatpush.bf16.msra.mxu0 %v6662_v2 }
 0x267   : > { %2348 = vmatpush.bf16.msra.mxu0 %v6661_v5  ;;  %v6679_v5 = vld [vmem:[#allocation6 + $0x6b8] sm:$0xff] }
 0x2b2   : > { %v1504_v18 = vpop.f32.mrf.mxu1 }
 0x2ba   : > { %v1490_v13 = vpop.f32.mrf.mxu0  ;;  %v1506_v31 = vpop.f32.mrf.mxu1 }
 0x2bb   : > { %v1491_v17 = vadd.f32 %v6971_v10, %v1490_v13  ;;  %v6659_v13 = vld [vmem:[#allocation6 + $0x618] sm:$0xff] }
 0x2bd   : > { %v1505_v19 = vadd.f32 %v1504_v18, %v1491_v17  ;;  %v6658_v17 = vld [vmem:[#allocation6 + $0x610] sm:$0xff]  ;;  %v6648_v18 = vld [vmem:[#allocation6 + $0x5c0] sm:$0xff] }
 0x2be   : > { %2339 = vmatpush.bf16.msrb.mxu3 %v6648_v18  ;;  %v6665_v18 = vld [vmem:[#allocation6 + $0x648] sm:$0xff] }
 0x2c1   : > { %v1518_v20 = vpop.f32.mrf.mxu2 }
 0x2c2   : > { %v1519_v24 = vadd.f32 %v1518_v20, %v1505_v19  ;;  %v1492_v25 = vpop.f32.mrf.mxu0  ;;  %v1603_v19 = vpop.f32.mrf.mxu3  ;;  %v6974_v20 = vld [vmem:[#allocation8 + $0x7] ss:$0 sm:$0xff] }
 0x2c3   : > { %v1493_v29 = vadd.f32 %v6971_v10, %v1492_v25  ;;  %v6660_v10 = vld [vmem:[#allocation6 + $0x620] sm:$0xff] }
 0x2c4   : > { %v1523_v28 = vmax.f32 %v1519_v24, 0.0  ;;  %2349 = vmatpush.bf16.msra.mxu0 %v6660_v10  ;;  %v6657_v24 = vld [vmem:[#allocation6 + $0x608] sm:$0xff]  ;;  %v6973_v25 = vld [vmem:[#allocation8 + $0x5] ss:$0 sm:$0xff] }
 0x2c5   : > { %v1507_v34 = vadd.f32 %v1506_v31, %v1493_v29  ;;  %v1602_v32 = vadd.f32 %v6973_v25, %v1601_v7  ;;  %v6678_v7 = vld [vmem:[#allocation6 + $0x6b0] sm:$0xff]  ;;  %v6668_v10 = vld [vmem:[#allocation6 + $0x660] sm:$0xff] }
 0x2c6   : > { %v7394_v30 = vadd.f32 %v1523_v28, %v1025_v27  ;;  %v6640_v27 = vld [vmem:[#allocation6 + $0x580] sm:$0xff] }
 0x2c7   : > { %v6656_v28 = vld [vmem:[#allocation6 + $0x600] sm:$0xff]  ;;  %2325 = vmatpush.bf16.msrb.mxu2 %v6640_v27  ;;  %v6703_v27 = vld [vmem:[#allocation6 + $0x778] sm:$0xff] }
 0x2c8   : > { %2350 = vmatpush.bf16.msra.mxu0 %v6659_v13  ;;  %v6675_v13 = vld [vmem:[#allocation6 + $0x698] sm:$0xff] }
 0x2c9   : > { %v1520_v36 = vpop.f32.mrf.mxu2 }
 0x2ca   : > { %v1521_v37 = vadd.f32 %v1520_v36, %v1507_v34  ;;  %v1683_v38 = vpop.f32.mrf.mxu0 }
 0x2cb   : > { %v1684_v22 = vadd.f32 %v6972_v35, %v1683_v38 }
 0x2cc   : > { %v1524_v42 = vmax.f32 %v1521_v37, 0.0  ;;  %2351 = vmatpush.bf16.msra.mxu0 %v6658_v17 }
 0x2cd   : > { %v1688_v23 = vmax.f32 %v1684_v22, 0.0 }
 0x2ce   : > { %v7397_v8 = vadd.f32 %v1524_v42, %v1026_v40  ;;  %v1604_v42 = vadd.f32 %v6973_v25, %v1603_v19  ;;  %v6673_v19 = vld [vmem:[#allocation6 + $0x688] sm:$0xff]  ;;  %v6687_v25 = vld [vmem:[#allocation6 + $0x6f8] sm:$0xff] }
 0x2cf   : > { %1690 = vst [vmem:[#allocation2 + $0x8] sm:$0xff] %v1688_v23 }
 0x2d0   : > { %2352 = vmatpush.bf16.msra.mxu0 %v6657_v24 }
 0x2d2   : > { %v1685_v44 = vpop.f32.mrf.mxu0 }
 0x2d3   : > { %v1686_v45 = vadd.f32 %v6972_v35, %v1685_v44  ;;  %v1606_v35 = vmax.f32 %v1602_v32, 0.0 }
 0x2d4   : > { %2353 = vmatpush.bf16.msra.mxu0 %v6656_v28  ;;  %v6686_v28 = vld [vmem:[#allocation6 + $0x6f0] sm:$0xff] }
 0x2d5   : > { %v1689_v46 = vmax.f32 %v1686_v45, 0.0 }
 0x2d6   : > { %v1692_v49 = vld [vmem:[#allocation2 + $0x7] sm:$0xff] }
 0x2d7   : > { %1691 = vst [vmem:[#allocation2 + $0x10] sm:$0xff] %v1689_v46  ;;  %v1699_v47 = vpack.c.bf16 %v1689_v46, %v1688_v23  ;;  %v6976_v23 = vld [vmem:[#allocation9 + $0x3] ss:$0 sm:$0xff] }
 0x2d9   : > { %1917 = vmatmul.bf16.vlgmr.msra.gmra.mxu2 %v1699_v47  ;;  %v1607_v47 = vmax.f32 %v1604_v42, 0.0 }
 0x2da   : > { %2521 = vmatpush.bf16.msra.mxu2 %v6679_v5  ;;  %v6700_v5 = vld [vmem:[#allocation6 + $0x760] sm:$0xff] }
 0x2db   : > { %v2024_v17 = vpop.f32.mrf.mxu0 }
 0x2de   : > { %v1693_v50 = vld [vmem:[#allocation2 + $0xf] sm:$0xff]  ;;  %2522 = vmatpush.bf16.msra.mxu2 %v6678_v7  ;;  %v6680_v7 = vld [vmem:[#allocation6 + $0x6c0] sm:$0xff] }
 0x2df   : > { %v1696_v51 = vld [vmem:[#allocation2 + $0x9] sm:$0xff]  ;;  %v1697_v52 = vld [vmem:[#allocation2 + $0x11] sm:$0xff]  ;;  %v1698_v53 = vpack.c.bf16 %v1693_v50, %v1692_v49 }
 0x2e0   : > { %v1700_v54 = vpack.c.bf16 %v1697_v52, %v1696_v51 }
 0x2e1   : > { %1903 = vmatmul.bf16.vlgmr.msra.gmra.mxu1 %v1698_v53 }
 0x2e2   : > { %1931 = vmatmul.bf16.vlgmr.msra.gmra.mxu3 %v1700_v54  ;;  %2439 = vmatpush.bf16.msra.mxu1 %v6671_v4  ;;  %v6681_v4 = vld [vmem:[#allocation6 + $0x6c8] sm:$0xff] }
 0x2e3   : > { %2523 = vmatpush.bf16.msra.mxu2 %v6677_v9  ;;  %v2026_v24 = vpop.f32.mrf.mxu0  ;;  %2742 = vmatpush.bf16.msra.mxu3 %v6687_v25  ;;  %v6719_v9 = vld [vmem:[#allocation6 + $0x7f8] sm:$0xff] }
 0x2e6   : > { %2440 = vmatpush.bf16.msra.mxu1 %v6670_v6  ;;  %v6690_v6 = vld [vmem:[#allocation6 + $0x710] sm:$0xff] }
 0x2e7   : > { %2524 = vmatpush.bf16.msra.mxu2 %v6676_v11  ;;  %2743 = vmatpush.bf16.msra.mxu3 %v6686_v28  ;;  %v6698_v11 = vld [vmem:[#allocation6 + $0x750] sm:$0xff] }
 0x2eb   : > { %2525 = vmatpush.bf16.msra.mxu2 %v6675_v13  ;;  %v6688_v13 = vld [vmem:[#allocation6 + $0x700] sm:$0xff] }
 0x2ef   : > { %2526 = vmatpush.bf16.msra.mxu2 %v6674_v15  ;;  %v6717_v15 = vld [vmem:[#allocation6 + $0x7e8] sm:$0xff] }
 0x2f1   : > { %2105 = vmatmul.bf16.vlgmr.msrb.gmra.mxu1 %v7381_v41 }
 0x2f3   : > { %2527 = vmatpush.bf16.msra.mxu2 %v6673_v19  ;;  %v6715_v19 = vld [vmem:[#allocation6 + $0x7d8] sm:$0xff] }
 0x2f7   : > { %2528 = vmatpush.bf16.msra.mxu2 %v6672_v21  ;;  %v6713_v21 = vld [vmem:[#allocation6 + $0x7c8] sm:$0xff] }
 0x35c   : > { %v1918_v31 = vpop.f32.mrf.mxu2 }
 0x35e   : > { %v1904_v26 = vpop.f32.mrf.mxu1 }
 0x35f   : > { %v1905_v29 = vadd.f32 %v6974_v20, %v1904_v26  ;;  %v6695_v26 = vld [vmem:[#allocation6 + $0x738] sm:$0xff] }
 0x360   : > { %2756 = vmatpush.bf16.msrb.mxu0 %v6695_v26  ;;  %v6712_v26 = vld [vmem:[#allocation6 + $0x7c0] sm:$0xff] }
 0x361   : > { %v1919_v33 = vadd.f32 %v1918_v31, %v1905_v29  ;;  %v6979_v29 = vld [vmem:[#allocation8 + $0xa] ss:$0 sm:$0xff] }
 0x362   : > { %v6685_v31 = vld [vmem:[#allocation6 + $0x6e8] sm:$0xff] }
 0x363   : > { %2744 = vmatpush.bf16.msra.mxu3 %v6685_v31 }
 0x364   : > { %v1920_v43 = vpop.f32.mrf.mxu2 }
 0x365   : > { %v1932_v34 = vpop.f32.mrf.mxu3 }
 0x366   : > { %v1933_v36 = vadd.f32 %v1932_v34, %v1919_v33  ;;  %v1906_v37 = vpop.f32.mrf.mxu1 }
 0x367   : > { %v1907_v40 = vadd.f32 %v6974_v20, %v1906_v37  ;;  %v6664_v20 = vld [vmem:[#allocation6 + $0x640] sm:$0xff] }
 0x368   : > { %v1937_v38 = vmax.f32 %v1933_v36, 0.0  ;;  %v6978_v36 = vld [vmem:[#allocation8 + $0x8] ss:$0 sm:$0xff] }
 0x369   : > { %v1921_v45 = vadd.f32 %v1920_v43, %v1907_v40  ;;  %v2025_v40 = vadd.f32 %v6978_v36, %v2024_v17  ;;  %v6696_v17 = vld [vmem:[#allocation6 + $0x740] sm:$0xff] }
 0x36a   : > { %v1939_v22 = vadd.f32 %v1937_v38, %v1606_v35  ;;  %v6684_v38 = vld [vmem:[#allocation6 + $0x6e0] sm:$0xff] }
 0x36b   : > { %2745 = vmatpush.bf16.msra.mxu3 %v6684_v38 }
 0x36c   : > { %v1943_v44 = vmul.f32 %v6975_v39, %v1939_v22 }
 0x36d   : > { %v1934_v46 = vpop.f32.mrf.mxu3 }
 0x36e   : > { %v1947_v48 = vadd.f32 %v6976_v23, %v1943_v44  ;;  %v1935_v49 = vadd.f32 %v1934_v46, %v1921_v45  ;;  %v2106_v50 = vpop.f32.mrf.mxu1  ;;  %v2029_v44 = vmax.f32 %v2025_v40, 0.0  ;;  %v2027_v45 = vadd.f32 %v6978_v36, %v2026_v24  ;;  %v6983_v24 = vld [vmem:[#allocation8 + $0xc] ss:$0 sm:$0xff] }
 0x36f   : > { %v2107_v52 = vadd.f32 %v6977_v16, %v2106_v50  ;;  %v6709_v36 = vld [vmem:[#allocation6 + $0x7a8] sm:$0xff] }
 0x370   : > { %v1938_v51 = vmax.f32 %v1935_v49, 0.0  ;;  %v7402_v53 = vadd.f32 %v7394_v30, %v1947_v48  ;;  %v6980_v48 = vld [vmem:[#allocation9 + $0x4] ss:$0 sm:$0xff]  ;;  %v2030_v50 = vmax.f32 %v2027_v45, 0.0  ;;  %v6735_v45 = vld [vmem:[#allocation6 + $0x878] sm:$0xff] }
 0x371   : > { %v2111_v55 = vmax.f32 %v2107_v52, 0.0 }
 0x372   : > { %v1940_v54 = vadd.f32 %v1938_v51, %v1607_v47 }
 0x373   : > { %2113 = vst [vmem:[#allocation2 + $0x8] sm:$0xff] %v2111_v55 }
 0x374   : > { %v1944_v56 = vmul.f32 %v6975_v39, %v1940_v54  ;;  %v6981_v54 = vld [vmem:[#allocation9 + $0x5] ss:$0 sm:$0xff] }
 0x376   : > { %v1948_v57 = vadd.f32 %v6976_v23, %v1944_v56  ;;  %v2108_v58 = vpop.f32.mrf.mxu1 }
 0x377   : > { %v2109_v59 = vadd.f32 %v6977_v16, %v2108_v58 }
 0x378   : > { %v7405_v60 = vadd.f32 %v7397_v8, %v1948_v57  ;;  %v6669_v8 = vld [vmem:[#allocation6 + $0x668] sm:$0xff] }
 0x379   : > { %v2112_v61 = vmax.f32 %v2109_v59, 0.0  ;;  %2441 = vmatpush.bf16.msra.mxu1 %v6669_v8  ;;  %v6699_v8 = vld [vmem:[#allocation6 + $0x758] sm:$0xff] }
 0x37a   : > { %v2115_v63 = vld [vmem:[#allocation2 + $0x7] sm:$0xff] }
 0x37b   : > { %2114 = vst [vmem:[#allocation2 + $0x10] sm:$0xff] %v2112_v61  ;;  %v2122_v62 = vpack.c.bf16 %v2112_v61, %v2111_v55  ;;  %v6694_v61 = vld [vmem:[#allocation6 + $0x730] sm:$0xff] }
 0x37c   : > { %2757 = vmatpush.bf16.msrb.mxu0 %v6694_v61  ;;  %v6740_v61 = vld [vmem:[#allocation6 + $0x8a0] sm:$0xff] }
 0x37d   : > { %2340 = vmatmul.bf16.vlgmr.msrb.gmra.mxu3 %v2122_v62  ;;  %2442 = vmatpush.bf16.msra.mxu1 %v6668_v10  ;;  %v6693_v62 = vld [vmem:[#allocation6 + $0x728] sm:$0xff] }
 0x37e   : > { %v6689_v10 = vld [vmem:[#allocation6 + $0x708] sm:$0xff] }
 0x380   : > { %2758 = vmatpush.bf16.msrb.mxu0 %v6693_v62  ;;  %v6730_v62 = vld [vmem:[#allocation6 + $0x850] sm:$0xff] }
 0x381   : > { %2443 = vmatpush.bf16.msra.mxu1 %v6667_v12  ;;  %v6718_v12 = vld [vmem:[#allocation6 + $0x7f0] sm:$0xff] }
 0x382   : > { %v2116_v0 = vld [vmem:[#allocation2 + $0xf] sm:$0xff] }
 0x383   : > { %v2119_v1 = vld [vmem:[#allocation2 + $0x9] sm:$0xff]  ;;  %v2120_v2 = vld [vmem:[#allocation2 + $0x11] sm:$0xff]  ;;  %v2121_v30 = vpack.c.bf16 %v2116_v0, %v2115_v63 }
 0x384   : > { %v2123_v3 = vpack.c.bf16 %v2120_v2, %v2119_v1  ;;  %v6683_v63 = vld [vmem:[#allocation6 + $0x6d8] sm:$0xff]  ;;  %v6702_v0 = vld [vmem:[#allocation6 + $0x770] sm:$0xff]  ;;  %v6692_v1 = vld [vmem:[#allocation6 + $0x720] sm:$0xff] }
 0x385   : > { %2326 = vmatmul.bf16.vlgmr.msrb.gmra.mxu2 %v2121_v30  ;;  %2444 = vmatpush.bf16.msra.mxu1 %v6666_v14  ;;  %v6682_v2 = vld [vmem:[#allocation6 + $0x6d0] sm:$0xff]  ;;  %v6701_v30 = vld [vmem:[#allocation6 + $0x768] sm:$0xff] }
 0x386   : > { %2354 = vmatmul.bf16.vlgmr.msra.gmra.mxu0 %v2123_v3  ;;  %2746 = vmatpush.bf16.msra.mxu3 %v6683_v63  ;;  %v6691_v3 = vld [vmem:[#allocation6 + $0x718] sm:$0xff]  ;;  %v6697_v14 = vld [vmem:[#allocation6 + $0x748] sm:$0xff] }
 0x387   : > { %2759 = vmatpush.bf16.msrb.mxu0 %v6692_v1  ;;  %v6723_v63 = vld [vmem:[#allocation6 + $0x818] sm:$0xff]  ;;  %v6729_v1 = vld [vmem:[#allocation6 + $0x848] sm:$0xff] }
 0x389   : > { %2445 = vmatpush.bf16.msra.mxu1 %v6665_v18  ;;  %v6716_v18 = vld [vmem:[#allocation6 + $0x7e0] sm:$0xff] }
 0x38a   : > { %2747 = vmatpush.bf16.msra.mxu3 %v6682_v2 }
 0x38b   : > { %2760 = vmatpush.bf16.msrb.mxu0 %v6691_v3  ;;  %v6738_v3 = vld [vmem:[#allocation6 + $0x890] sm:$0xff] }
 0x38d   : > { %2446 = vmatpush.bf16.msra.mxu1 %v6664_v20  ;;  %v6714_v20 = vld [vmem:[#allocation6 + $0x7d0] sm:$0xff] }
 0x38e   : > { %2748 = vmatpush.bf16.msra.mxu3 %v6681_v4  ;;  %v6728_v4 = vld [vmem:[#allocation6 + $0x840] sm:$0xff] }
 0x38f   : > { %2761 = vmatpush.bf16.msrb.mxu0 %v6690_v6  ;;  %v6721_v6 = vld [vmem:[#allocation6 + $0x808] sm:$0xff] }
 0x391   : > { %2770 = vmatpush.bf16.msrb.mxu1 %v6703_v27 }
 0x392   : > { %2749 = vmatpush.bf16.msra.mxu3 %v6680_v7  ;;  %v6737_v7 = vld [vmem:[#allocation6 + $0x888] sm:$0xff] }
 0x393   : > { %2762 = vmatpush.bf16.msrb.mxu0 %v6689_v10 }
 0x395   : > { %2771 = vmatpush.bf16.msrb.mxu1 %v6702_v0  ;;  %v6739_v0 = vld [vmem:[#allocation6 + $0x898] sm:$0xff] }
 0x396   : > { %2944 = vmatpush.bf16.msrb.mxu3 %v6719_v9 }
 0x397   : > { %2763 = vmatpush.bf16.msrb.mxu0 %v6688_v13 }
 0x399   : > { %2772 = vmatpush.bf16.msrb.mxu1 %v6701_v30  ;;  %v6722_v30 = vld [vmem:[#allocation6 + $0x810] sm:$0xff] }
 0x39a   : > { %2945 = vmatpush.bf16.msrb.mxu3 %v6718_v12  ;;  %v6736_v12 = vld [vmem:[#allocation6 + $0x880] sm:$0xff] }
 0x39d   : > { %2773 = vmatpush.bf16.msrb.mxu1 %v6700_v5  ;;  %v6984_v5 = vld [vmem:[#allocation8 + $0xd] ss:$0 sm:$0xff] }
 0x39e   : > { %2946 = vmatpush.bf16.msrb.mxu3 %v6717_v15 }
 0x3a1   : > { %2774 = vmatpush.bf16.msrb.mxu1 %v6699_v8  ;;  %v6982_v8 = vld [vmem:[#allocation8 + $0xb] ss:$0 sm:$0xff] }
 0x3a2   : > { %2947 = vmatpush.bf16.msrb.mxu3 %v6716_v18 }
 0x3a5   : > { %2775 = vmatpush.bf16.msrb.mxu1 %v6698_v11  ;;  %v6720_v11 = vld [vmem:[#allocation6 + $0x800] sm:$0xff] }
 0x3a6   : > { %2948 = vmatpush.bf16.msrb.mxu3 %v6715_v19 }
 0x3a9   : > { %2776 = vmatpush.bf16.msrb.mxu1 %v6697_v14 }
 0x3aa   : > { %2949 = vmatpush.bf16.msrb.mxu3 %v6714_v20 }
 0x3ad   : > { %2777 = vmatpush.bf16.msrb.mxu1 %v6696_v17 }
 0x3ae   : > { %2950 = vmatpush.bf16.msrb.mxu3 %v6713_v21  ;;  %v6985_v21 = vld [vmem:[#allocation9 + $0x6] ss:$0 sm:$0xff] }
 0x3b2   : > { %2951 = vmatpush.bf16.msrb.mxu3 %v6712_v26 }
 0x400   : > { %v2341_v33 = vpop.f32.mrf.mxu3 }
 0x403   : > { %v2355_v35 = vpop.f32.mrf.mxu0 }
 0x408   : > { %v2327_v32 = vpop.f32.mrf.mxu2  ;;  %v2343_v43 = vpop.f32.mrf.mxu3 }
 0x409   : > { %v2328_v34 = vadd.f32 %v6979_v29, %v2327_v32 }
 0x40b   : > { %v2342_v37 = vadd.f32 %v2341_v33, %v2328_v34  ;;  %v2357_v46 = vpop.f32.mrf.mxu0  ;;  %v6710_v33 = vld [vmem:[#allocation6 + $0x7b0] sm:$0xff] }
 0x40d   : > { %v2356_v39 = vadd.f32 %v2355_v35, %v2342_v37  ;;  %v6708_v37 = vld [vmem:[#allocation6 + $0x7a0] sm:$0xff] }
 0x40f   : > { %v2360_v22 = vmax.f32 %v2356_v39, 0.0 }
 0x410   : > { %v2329_v42 = vpop.f32.mrf.mxu2 }
 0x411   : > { %v2330_v23 = vadd.f32 %v6979_v29, %v2329_v42  ;;  %v2362_v47 = vadd.f32 %v2360_v22, %v2029_v44  ;;  %v6711_v29 = vld [vmem:[#allocation6 + $0x7b8] sm:$0xff]  ;;  %v6706_v44 = vld [vmem:[#allocation6 + $0x790] sm:$0xff] }
 0x412   : > { %2862 = vmatpush.bf16.msrb.mxu2 %v6711_v29 }
 0x413   : > { %v2344_v16 = vadd.f32 %v2343_v43, %v2330_v23  ;;  %v2366_v52 = vmul.f32 %v6980_v48, %v2362_v47  ;;  %v6707_v43 = vld [vmem:[#allocation6 + $0x798] sm:$0xff]  ;;  %v6704_v47 = vld [vmem:[#allocation6 + $0x780] sm:$0xff] }
 0x415   : > { %v2358_v49 = vadd.f32 %v2357_v46, %v2344_v16  ;;  %v2370_v57 = vadd.f32 %v6981_v54, %v2366_v52  ;;  %v6705_v16 = vld [vmem:[#allocation6 + $0x788] sm:$0xff]  ;;  %v6734_v46 = vld [vmem:[#allocation6 + $0x870] sm:$0xff] }
 0x416   : > { %2863 = vmatpush.bf16.msrb.mxu2 %v6710_v33  ;;  %v6742_v52 = vld [vmem:[#allocation6 + $0x8b0] sm:$0xff] }
 0x417   : > { %v2361_v51 = vmax.f32 %v2358_v49, 0.0  ;;  %v6743_v49 = vld [vmem:[#allocation6 + $0x8b8] sm:$0xff] }
 0x419   : > { %v2363_v55 = vadd.f32 %v2361_v51, %v2030_v50  ;;  %v6733_v50 = vld [vmem:[#allocation6 + $0x868] sm:$0xff]  ;;  %v6726_v51 = vld [vmem:[#allocation6 + $0x830] sm:$0xff] }
 0x41a   : > { %2864 = vmatpush.bf16.msrb.mxu2 %v6709_v36 }
 0x41b   : > { %v2367_v56 = vmul.f32 %v6980_v48, %v2363_v55  ;;  %v6727_v48 = vld [vmem:[#allocation6 + $0x838] sm:$0xff]  ;;  %v6725_v55 = vld [vmem:[#allocation6 + $0x828] sm:$0xff] }
 0x41c   : > { %3165 = vmatpush.bf16.msra.mxu0 %v6727_v48 }
 0x41d   : > { %v2371_v58 = vadd.f32 %v6981_v54, %v2367_v56  ;;  %v6732_v54 = vld [vmem:[#allocation6 + $0x860] sm:$0xff]  ;;  %v6741_v56 = vld [vmem:[#allocation6 + $0x8a8] sm:$0xff] }
 0x41e   : > { %2865 = vmatpush.bf16.msrb.mxu2 %v6708_v37 }
 0x41f   : > { %v2372_v59 = vpack.c.bf16 %v2371_v58, %v2370_v57  ;;  %v6731_v57 = vld [vmem:[#allocation6 + $0x858] sm:$0xff] }
 0x420   : > { %3166 = vmatpush.bf16.msra.mxu0 %v6726_v51 }
 0x421   : > { %2447 = vmatmul.bf16.vlgmr.msra.gmra.mxu1 %v2372_v59  ;;  %2529 = vmatmul.bf16.vlgmr.msra.gmra.mxu2 %v2372_v59  ;;  %v6724_v59 = vld [vmem:[#allocation6 + $0x820] sm:$0xff] }
 0x422   : > { %2866 = vmatpush.bf16.msrb.mxu2 %v6707_v43  ;;  %3179 = vmatpush.bf16.msra.mxu1 %v6735_v45 }
 0x424   : > { %3167 = vmatpush.bf16.msra.mxu0 %v6725_v55  ;;  %v6751_v55 = vld [vmem:[#allocation6 + $0x8f8] sm:$0xff] }
 0x426   : > { %2867 = vmatpush.bf16.msrb.mxu2 %v6706_v44  ;;  %3180 = vmatpush.bf16.msra.mxu1 %v6734_v46 }
 0x428   : > { %3168 = vmatpush.bf16.msra.mxu0 %v6724_v59  ;;  %v6757_v59 = vld [vmem:[#allocation6 + $0x928] sm:$0xff] }
 0x42a   : > { %2868 = vmatpush.bf16.msrb.mxu2 %v6705_v16  ;;  %3181 = vmatpush.bf16.msra.mxu1 %v6733_v50 }
 0x42c   : > { %3169 = vmatpush.bf16.msra.mxu0 %v6723_v63  ;;  %v6747_v63 = vld [vmem:[#allocation6 + $0x8d8] sm:$0xff] }
 0x42e   : > { %2869 = vmatpush.bf16.msrb.mxu2 %v6704_v47  ;;  %3182 = vmatpush.bf16.msra.mxu1 %v6732_v54 }
 0x430   : > { %3170 = vmatpush.bf16.msra.mxu0 %v6722_v30  ;;  %v6745_v30 = vld [vmem:[#allocation6 + $0x8c8] sm:$0xff] }
 0x431   : > { %2870 = vmatmul.bf16.vlgmr.msrb.gmra.mxu2 %v7381_v41 }
 0x432   : > { %3193 = vmatpush.bf16.msra.mxu2 %v6743_v49  ;;  %3183 = vmatpush.bf16.msra.mxu1 %v6731_v57  ;;  %v6758_v57 = vld [vmem:[#allocation6 + $0x930] sm:$0xff] }
 0x434   : > { %3171 = vmatpush.bf16.msra.mxu0 %v6721_v6  ;;  %v6752_v6 = vld [vmem:[#allocation6 + $0x900] sm:$0xff] }
 0x436   : > { %3194 = vmatpush.bf16.msra.mxu2 %v6742_v52  ;;  %3184 = vmatpush.bf16.msra.mxu1 %v6730_v62  ;;  %v6756_v62 = vld [vmem:[#allocation6 + $0x920] sm:$0xff] }
 0x438   : > { %3172 = vmatpush.bf16.msra.mxu0 %v6720_v11  ;;  %v6766_v11 = vld [vmem:[#allocation6 + $0x970] sm:$0xff] }
 0x43a   : > { %3195 = vmatpush.bf16.msra.mxu2 %v6741_v56  ;;  %3185 = vmatpush.bf16.msra.mxu1 %v6729_v1  ;;  %v6759_v56 = vld [vmem:[#allocation6 + $0x938] sm:$0xff]  ;;  %v6746_v1 = vld [vmem:[#allocation6 + $0x8d0] sm:$0xff] }
 0x43e   : > { %3196 = vmatpush.bf16.msra.mxu2 %v6740_v61  ;;  %3186 = vmatpush.bf16.msra.mxu1 %v6728_v4  ;;  %v6748_v61 = vld [vmem:[#allocation6 + $0x8e0] sm:$0xff] }
 0x442   : > { %3197 = vmatpush.bf16.msra.mxu2 %v6739_v0  ;;  %v6755_v0 = vld [vmem:[#allocation6 + $0x918] sm:$0xff] }
 0x446   : > { %3198 = vmatpush.bf16.msra.mxu2 %v6738_v3  ;;  %v6753_v3 = vld [vmem:[#allocation6 + $0x908] sm:$0xff] }
 0x44a   : > { %3199 = vmatpush.bf16.msra.mxu2 %v6737_v7  ;;  %v6767_v7 = vld [vmem:[#allocation6 + $0x978] sm:$0xff] }
 0x44e   : > { %3200 = vmatpush.bf16.msra.mxu2 %v6736_v12  ;;  %v6774_v12 = vld [vmem:[#allocation6 + $0x9b0] sm:$0xff] }
 0x49e   : > { %v2448_v58 = vpop.f32.mrf.mxu1 }
 0x49f   : > { %v2449_v15 = vadd.f32 %v6982_v8, %v2448_v58  ;;  %v6749_v58 = vld [vmem:[#allocation6 + $0x8e8] sm:$0xff] }
 0x4a1   : > { %v2453_v19 = vmax.f32 %v2449_v15, 0.0 }
 0x4a4   : > { %v2530_v25 = vpop.f32.mrf.mxu2 }
 0x4a5   : > { %v2531_v27 = vadd.f32 %v6983_v24, %v2530_v25 }
 0x4a6   : > { %v2450_v2 = vpop.f32.mrf.mxu1 }
 0x4a7   : > { %v2535_v28 = vmax.f32 %v2531_v27, 0.0  ;;  %v7002_v27 = vld [vmem:[#allocation9 + $0x7] ss:$0 sm:$0xff]  ;;  %v2451_v29 = vadd.f32 %v6982_v8, %v2450_v2  ;;  %v6754_v2 = vld [vmem:[#allocation6 + $0x910] sm:$0xff]  ;;  %v6775_v8 = vld [vmem:[#allocation6 + $0x9b8] sm:$0xff] }
 0x4a8   : > { %3603 = vmatpush.bf16.msrb.mxu2 %v6775_v8 }
 0x4a9   : > { %2537 = vst [vmem:[#allocation2 + $0x8] sm:$0xff] %v2535_v28  ;;  %v2454_v37 = vmax.f32 %v2451_v29, 0.0 }
 0x4ac   : > { %v2532_v31 = vpop.f32.mrf.mxu2  ;;  %3604 = vmatpush.bf16.msrb.mxu2 %v6774_v12 }
 0x4ad   : > { %v2533_v32 = vadd.f32 %v6983_v24, %v2532_v31 }
 0x4af   : > { %v2536_v34 = vmax.f32 %v2533_v32, 0.0 }
 0x4b0   : > { %v2539_v38 = vld [vmem:[#allocation2 + $0x7] sm:$0xff] }
 0x4b1   : > { %2538 = vst [vmem:[#allocation2 + $0x10] sm:$0xff] %v2536_v34  ;;  %v2546_v35 = vpack.c.bf16 %v2536_v34, %v2535_v28 }
 0x4b3   : > { %2764 = vmatmul.bf16.vlgmr.msrb.gmra.mxu0 %v2546_v35  ;;  %v6986_v35 = vld [vmem:[#allocation8 + $0xf] ss:$0 sm:$0xff] }
 0x4b4   : > { %3368 = vmatpush.bf16.msrb.mxu0 %v6759_v56  ;;  %v2871_v4 = vpop.f32.mrf.mxu2  ;;  %v6779_v56 = vld [vmem:[#allocation6 + $0x9d8] sm:$0xff] }
 0x4b8   : > { %v2540_v39 = vld [vmem:[#allocation2 + $0xf] sm:$0xff]  ;;  %3369 = vmatpush.bf16.msrb.mxu0 %v6758_v57 }
 0x4b9   : > { %v2543_v40 = vld [vmem:[#allocation2 + $0x9] sm:$0xff]  ;;  %v2544_v42 = vld [vmem:[#allocation2 + $0x11] sm:$0xff]  ;;  %v2545_v22 = vpack.c.bf16 %v2540_v39, %v2539_v38 }
 0x4ba   : > { %v2547_v23 = vpack.c.bf16 %v2544_v42, %v2543_v40  ;;  %v6762_v57 = vld [vmem:[#allocation6 + $0x950] sm:$0xff] }
 0x4bb   : > { %2750 = vmatmul.bf16.vlgmr.msra.gmra.mxu3 %v2545_v22 }
 0x4bc   : > { %2778 = vmatmul.bf16.vlgmr.msrb.gmra.mxu1 %v2547_v23  ;;  %3286 = vmatpush.bf16.msra.mxu3 %v6751_v55  ;;  %v6763_v55 = vld [vmem:[#allocation6 + $0x958] sm:$0xff] }
 0x4bd   : > { %3370 = vmatpush.bf16.msrb.mxu0 %v6757_v59  ;;  %3589 = vmatpush.bf16.msrb.mxu1 %v6767_v7  ;;  %v6768_v59 = vld [vmem:[#allocation6 + $0x980] sm:$0xff] }
 0x4be   : > { %v6796_v7 = vld [vmem:[#allocation6 + $0xa60] sm:$0xff] }
 0x4c1   : > { %3371 = vmatpush.bf16.msrb.mxu0 %v6756_v62  ;;  %3590 = vmatpush.bf16.msrb.mxu1 %v6766_v11  ;;  %v6777_v62 = vld [vmem:[#allocation6 + $0x9c8] sm:$0xff] }
 0x4c5   : > { %3372 = vmatpush.bf16.msrb.mxu0 %v6755_v0  ;;  %v6776_v0 = vld [vmem:[#allocation6 + $0x9c0] sm:$0xff] }
 0x4c9   : > { %3373 = vmatpush.bf16.msrb.mxu0 %v6754_v2  ;;  %v6791_v2 = vld [vmem:[#allocation6 + $0xa38] sm:$0xff] }
 0x4cb   : > { %2952 = vmatmul.bf16.vlgmr.msrb.gmra.mxu3 %v7381_v41 }
 0x4cd   : > { %3374 = vmatpush.bf16.msrb.mxu0 %v6753_v3  ;;  %v6991_v3 = vld [vmem:[#allocation8 + $0x12] ss:$0 sm:$0xff] }
 0x4d1   : > { %3375 = vmatpush.bf16.msrb.mxu0 %v6752_v6 }
 0x530   : > { %v2765_v9 = vpop.f32.mrf.mxu0 }
 0x538   : > { %v2767_v28 = vpop.f32.mrf.mxu0 }
 0x539   : > { %v2779_v14 = vpop.f32.mrf.mxu1 }
 0x53e   : > { %v2751_v10 = vpop.f32.mrf.mxu3 }
 0x53f   : > { %v2752_v13 = vadd.f32 %v6984_v5, %v2751_v10  ;;  %v6988_v10 = vld [vmem:[#allocation8 + $0x10] ss:$0 sm:$0xff] }
 0x541   : > { %v2766_v17 = vadd.f32 %v2765_v9, %v2752_v13  ;;  %v2781_v33 = vpop.f32.mrf.mxu1  ;;  %v6783_v9 = vld [vmem:[#allocation6 + $0x9f8] sm:$0xff]  ;;  %v2873_v13 = vpop.f32.mrf.mxu2 }
 0x543   : > { %v2780_v18 = vadd.f32 %v2779_v14, %v2766_v17  ;;  %v6782_v14 = vld [vmem:[#allocation6 + $0x9f0] sm:$0xff] }
 0x545   : > { %v2784_v20 = vmax.f32 %v2780_v18, 0.0 }
 0x546   : > { %v2753_v24 = vpop.f32.mrf.mxu3 }
 0x547   : > { %v2786_v25 = vadd.f32 %v2784_v20, %v2453_v19  ;;  %v2754_v26 = vadd.f32 %v6984_v5, %v2753_v24  ;;  %v6744_v5 = vld [vmem:[#allocation6 + $0x8c0] sm:$0xff]  ;;  %v6987_v19 = vld [vmem:[#allocation8 + $0xe] ss:$0 sm:$0xff] }
 0x549   : > { %v2790_v31 = vmul.f32 %v6985_v21, %v2786_v25  ;;  %v2768_v32 = vadd.f32 %v2767_v28, %v2754_v26  ;;  %v2872_v26 = vadd.f32 %v6987_v19, %v2871_v4  ;;  %v6797_v4 = vld [vmem:[#allocation6 + $0xa68] sm:$0xff] }
 0x54b   : > { %v2782_v34 = vadd.f32 %v2781_v33, %v2768_v32  ;;  %v2794_v36 = vadd.f32 %v7002_v27, %v2790_v31  ;;  %v2876_v31 = vmax.f32 %v2872_v26, 0.0  ;;  %v2874_v32 = vadd.f32 %v6987_v19, %v2873_v13  ;;  %v6793_v26 = vld [vmem:[#allocation6 + $0xa48] sm:$0xff] }
 0x54d   : > { %v2785_v38 = vmax.f32 %v2782_v34, 0.0  ;;  %v7410_v39 = vadd.f32 %v7402_v53, %v2794_v36  ;;  %v6989_v36 = vld [vmem:[#allocation9 + $0x8] ss:$0 sm:$0xff] }
 0x54e   : > { %v2953_v40 = vpop.f32.mrf.mxu3 }
 0x54f   : > { %v2787_v42 = vadd.f32 %v2785_v38, %v2454_v37  ;;  %v2954_v22 = vadd.f32 %v6986_v35, %v2953_v40  ;;  %v2877_v38 = vmax.f32 %v2874_v32, 0.0  ;;  %v6786_v32 = vld [vmem:[#allocation6 + $0xa10] sm:$0xff] }
 0x551   : > { %v2791_v23 = vmul.f32 %v6985_v21, %v2787_v42  ;;  %v2958_v43 = vmax.f32 %v2954_v22, 0.0  ;;  %v6990_v22 = vld [vmem:[#allocation9 + $0x9] ss:$0 sm:$0xff] }
 0x553   : > { %2960 = vst [vmem:[#allocation2 + $0x8] sm:$0xff] %v2958_v43  ;;  %v2795_v44 = vadd.f32 %v7002_v27, %v2791_v23 }
 0x555   : > { %v7413_v45 = vadd.f32 %v7405_v60, %v2795_v44  ;;  %v6750_v60 = vld [vmem:[#allocation6 + $0x8f0] sm:$0xff] }
 0x556   : > { %v2955_v16 = vpop.f32.mrf.mxu3  ;;  %3287 = vmatpush.bf16.msra.mxu3 %v6750_v60  ;;  %v6769_v60 = vld [vmem:[#allocation6 + $0x988] sm:$0xff] }
 0x557   : > { %v2956_v46 = vadd.f32 %v6986_v35, %v2955_v16 }
 0x559   : > { %v2959_v47 = vmax.f32 %v2956_v46, 0.0 }
 0x55a   : > { %v2962_v49 = vld [vmem:[#allocation2 + $0x7] sm:$0xff]  ;;  %3288 = vmatpush.bf16.msra.mxu3 %v6749_v58  ;;  %v6778_v58 = vld [vmem:[#allocation6 + $0x9d0] sm:$0xff] }
 0x55b   : > { %2961 = vst [vmem:[#allocation2 + $0x10] sm:$0xff] %v2959_v47  ;;  %v2969_v48 = vpack.c.bf16 %v2959_v47, %v2958_v43  ;;  %v6773_v47 = vld [vmem:[#allocation6 + $0x9a8] sm:$0xff] }
 0x55c   : > { %3605 = vmatpush.bf16.msrb.mxu2 %v6773_v47  ;;  %v6824_v47 = vld [vmem:[#allocation6 + $0xb40] sm:$0xff] }
 0x55d   : > { %3187 = vmatmul.bf16.vlgmr.msra.gmra.mxu1 %v2969_v48  ;;  %v6772_v48 = vld [vmem:[#allocation6 + $0x9a0] sm:$0xff] }
 0x55e   : > { %3289 = vmatpush.bf16.msra.mxu3 %v6748_v61  ;;  %v6761_v61 = vld [vmem:[#allocation6 + $0x948] sm:$0xff] }
 0x560   : > { %3606 = vmatpush.bf16.msrb.mxu2 %v6772_v48  ;;  %v6992_v48 = vld [vmem:[#allocation8 + $0x11] ss:$0 sm:$0xff] }
 0x562   : > { %v2963_v50 = vld [vmem:[#allocation2 + $0xf] sm:$0xff]  ;;  %3290 = vmatpush.bf16.msra.mxu3 %v6747_v63  ;;  %v6760_v63 = vld [vmem:[#allocation6 + $0x940] sm:$0xff] }
 0x563   : > { %v2966_v53 = vld [vmem:[#allocation2 + $0x9] sm:$0xff]  ;;  %v2967_v51 = vld [vmem:[#allocation2 + $0x11] sm:$0xff]  ;;  %v2968_v52 = vpack.c.bf16 %v2963_v50, %v2962_v49 }
 0x564   : > { %v2970_v54 = vpack.c.bf16 %v2967_v51, %v2966_v53  ;;  %v6765_v49 = vld [vmem:[#allocation6 + $0x968] sm:$0xff]  ;;  %v6771_v53 = vld [vmem:[#allocation6 + $0x998] sm:$0xff]  ;;  %v6764_v51 = vld [vmem:[#allocation6 + $0x960] sm:$0xff] }
 0x565   : > { %3173 = vmatmul.bf16.vlgmr.msra.gmra.mxu0 %v2968_v52  ;;  %v6781_v50 = vld [vmem:[#allocation6 + $0x9e8] sm:$0xff]  ;;  %3591 = vmatpush.bf16.msrb.mxu1 %v6765_v49  ;;  %v6780_v52 = vld [vmem:[#allocation6 + $0x9e0] sm:$0xff] }
 0x566   : > { %3201 = vmatmul.bf16.vlgmr.msra.gmra.mxu2 %v2970_v54  ;;  %3291 = vmatpush.bf16.msra.mxu3 %v6746_v1  ;;  %v6770_v54 = vld [vmem:[#allocation6 + $0x990] sm:$0xff]  ;;  %v6799_v1 = vld [vmem:[#allocation6 + $0xa78] sm:$0xff] }
 0x567   : > { %3607 = vmatpush.bf16.msrb.mxu2 %v6771_v53  ;;  %3710 = vmatpush.bf16.msra.mxu0 %v6791_v2 }
 0x569   : > { %3592 = vmatpush.bf16.msrb.mxu1 %v6764_v51 }
 0x56a   : > { %3292 = vmatpush.bf16.msra.mxu3 %v6745_v30  ;;  %v6798_v30 = vld [vmem:[#allocation6 + $0xa70] sm:$0xff] }
 0x56b   : > { %3608 = vmatpush.bf16.msrb.mxu2 %v6770_v54 }
 0x56d   : > { %3593 = vmatpush.bf16.msrb.mxu1 %v6763_v55 }
 0x56e   : > { %3293 = vmatpush.bf16.msra.mxu3 %v6744_v5 }
 0x56f   : > { %3609 = vmatpush.bf16.msrb.mxu2 %v6769_v60  ;;  %v6815_v60 = vld [vmem:[#allocation6 + $0xaf8] sm:$0xff] }
 0x571   : > { %3594 = vmatpush.bf16.msrb.mxu1 %v6762_v57 }
 0x572   : > { %3617 = vmatpush.bf16.msrb.mxu3 %v6783_v9 }
 0x573   : > { %3610 = vmatpush.bf16.msrb.mxu2 %v6768_v59 }
 0x575   : > { %3595 = vmatpush.bf16.msrb.mxu1 %v6761_v61 }
 0x576   : > { %3618 = vmatpush.bf16.msrb.mxu3 %v6782_v14 }
 0x579   : > { %3596 = vmatpush.bf16.msrb.mxu1 %v6760_v63  ;;  %v6814_v63 = vld [vmem:[#allocation6 + $0xaf0] sm:$0xff] }
 0x57a   : > { %3619 = vmatpush.bf16.msrb.mxu3 %v6781_v50 }
 0x57d   : > { %3792 = vmatpush.bf16.msra.mxu1 %v6799_v1 }
 0x57e   : > { %3620 = vmatpush.bf16.msrb.mxu3 %v6780_v52 }
 0x581   : > { %3793 = vmatpush.bf16.msra.mxu1 %v6798_v30  ;;  %v6994_v30 = vld [vmem:[#allocation9 + $0xa] ss:$0 sm:$0xff] }
 0x582   : > { %3621 = vmatpush.bf16.msrb.mxu3 %v6779_v56  ;;  %v6807_v56 = vld [vmem:[#allocation6 + $0xab8] sm:$0xff] }
 0x583   : > { %4013 = vmatpush.bf16.msra.mxu2 %v6807_v56  ;;  %v6860_v56 = vld [vmem:[#allocation6 + $0xc60] sm:$0xff] }
 0x585   : > { %3794 = vmatpush.bf16.msra.mxu1 %v6797_v4  ;;  %v6822_v4 = vld [vmem:[#allocation6 + $0xb30] sm:$0xff] }
 0x586   : > { %3622 = vmatpush.bf16.msrb.mxu3 %v6778_v58 }
 0x589   : > { %3795 = vmatpush.bf16.msra.mxu1 %v6796_v7  ;;  %v6805_v7 = vld [vmem:[#allocation6 + $0xaa8] sm:$0xff] }
 0x58a   : > { %3623 = vmatpush.bf16.msrb.mxu3 %v6777_v62  ;;  %v6806_v62 = vld [vmem:[#allocation6 + $0xab0] sm:$0xff] }
 0x58b   : > { %4014 = vmatpush.bf16.msra.mxu2 %v6806_v62  ;;  %v6858_v62 = vld [vmem:[#allocation6 + $0xc50] sm:$0xff] }
 0x58e   : > { %3624 = vmatpush.bf16.msrb.mxu3 %v6776_v0  ;;  %v6823_v0 = vld [vmem:[#allocation6 + $0xb38] sm:$0xff] }
 0x58f   : > { %4015 = vmatpush.bf16.msra.mxu2 %v6805_v7 }
 0x5da   : > { %v3188_v18 = vpop.f32.mrf.mxu1 }
 0x5e2   : > { %v3174_v15 = vpop.f32.mrf.mxu0  ;;  %v3190_v29 = vpop.f32.mrf.mxu1 }
 0x5e3   : > { %v3175_v17 = vadd.f32 %v6988_v10, %v3174_v15 }
 0x5e5   : > { %v3189_v20 = vadd.f32 %v3188_v18, %v3175_v17 }
 0x5e9   : > { %v3202_v21 = vpop.f32.mrf.mxu2 }
 0x5ea   : > { %v3203_v24 = vadd.f32 %v3202_v21, %v3189_v20  ;;  %v3176_v25 = vpop.f32.mrf.mxu0  ;;  %v6795_v20 = vld [vmem:[#allocation6 + $0xa58] sm:$0xff]  ;;  %v6790_v21 = vld [vmem:[#allocation6 + $0xa30] sm:$0xff] }
 0x5eb   : > { %v3177_v27 = vadd.f32 %v6988_v10, %v3176_v25  ;;  %3796 = vmatpush.bf16.msra.mxu1 %v6795_v20  ;;  %3711 = vmatpush.bf16.msra.mxu0 %v6790_v21  ;;  %v6789_v25 = vld [vmem:[#allocation6 + $0xa28] sm:$0xff]  ;;  %v6803_v21 = vld [vmem:[#allocation6 + $0xa98] sm:$0xff] }
 0x5ec   : > { %v3207_v28 = vmax.f32 %v3203_v24, 0.0  ;;  %v6794_v24 = vld [vmem:[#allocation6 + $0xa50] sm:$0xff] }
 0x5ed   : > { %v3191_v33 = vadd.f32 %v3190_v29, %v3177_v27  ;;  %v6788_v27 = vld [vmem:[#allocation6 + $0xa20] sm:$0xff]  ;;  %v6787_v29 = vld [vmem:[#allocation6 + $0xa18] sm:$0xff] }
 0x5ee   : > { %v3209_v35 = vadd.f32 %v3207_v28, %v2876_v31  ;;  %v6792_v28 = vld [vmem:[#allocation6 + $0xa40] sm:$0xff]  ;;  %v6831_v31 = vld [vmem:[#allocation6 + $0xb78] sm:$0xff] }
 0x5ef   : > { %3797 = vmatpush.bf16.msra.mxu1 %v6794_v24  ;;  %3712 = vmatpush.bf16.msra.mxu0 %v6789_v25  ;;  %v6811_v24 = vld [vmem:[#allocation6 + $0xad8] sm:$0xff] }
 0x5f0   : > { %v3213_v42 = vmul.f32 %v6989_v36, %v3209_v35  ;;  %v6829_v35 = vld [vmem:[#allocation6 + $0xb68] sm:$0xff]  ;;  %v6819_v25 = vld [vmem:[#allocation6 + $0xb18] sm:$0xff] }
 0x5f1   : > { %v3204_v34 = vpop.f32.mrf.mxu2 }
 0x5f2   : > { %v3205_v37 = vadd.f32 %v3204_v34, %v3191_v33  ;;  %v3217_v44 = vadd.f32 %v6990_v22, %v3213_v42  ;;  %v6830_v33 = vld [vmem:[#allocation6 + $0xb70] sm:$0xff]  ;;  %v6785_v34 = vld [vmem:[#allocation6 + $0xa08] sm:$0xff] }
 0x5f3   : > { %3798 = vmatpush.bf16.msra.mxu1 %v6793_v26  ;;  %3713 = vmatpush.bf16.msra.mxu0 %v6788_v27  ;;  %v6826_v42 = vld [vmem:[#allocation6 + $0xb50] sm:$0xff] }
 0x5f4   : > { %v3208_v40 = vmax.f32 %v3205_v37, 0.0  ;;  %v6784_v37 = vld [vmem:[#allocation6 + $0xa00] sm:$0xff]  ;;  %v6802_v26 = vld [vmem:[#allocation6 + $0xa90] sm:$0xff] }
 0x5f5   : > { %v6810_v27 = vld [vmem:[#allocation6 + $0xad0] sm:$0xff] }
 0x5f6   : > { %v3210_v23 = vadd.f32 %v3208_v40, %v2877_v38  ;;  %v6828_v38 = vld [vmem:[#allocation6 + $0xb60] sm:$0xff]  ;;  %v6827_v40 = vld [vmem:[#allocation6 + $0xb58] sm:$0xff] }
 0x5f7   : > { %3799 = vmatpush.bf16.msra.mxu1 %v6792_v28  ;;  %3714 = vmatpush.bf16.msra.mxu0 %v6787_v29  ;;  %v6818_v28 = vld [vmem:[#allocation6 + $0xb10] sm:$0xff]  ;;  %v6801_v29 = vld [vmem:[#allocation6 + $0xa88] sm:$0xff] }
 0x5f8   : > { %v3214_v43 = vmul.f32 %v6989_v36, %v3210_v23 }
 0x5fa   : > { %v3218_v16 = vadd.f32 %v6990_v22, %v3214_v43  ;;  %v6993_v22 = vld [vmem:[#allocation8 + $0x13] ss:$0 sm:$0xff] }
 0x5fb   : > { %3715 = vmatpush.bf16.msra.mxu0 %v6786_v32  ;;  %v6800_v32 = vld [vmem:[#allocation6 + $0xa80] sm:$0xff] }
 0x5fc   : > { %v3219_v46 = vpack.c.bf16 %v3218_v16, %v3217_v44  ;;  %v6825_v44 = vld [vmem:[#allocation6 + $0xb48] sm:$0xff] }
 0x5fe   : > { %3294 = vmatmul.bf16.vlgmr.msra.gmra.mxu3 %v3219_v46  ;;  %3376 = vmatmul.bf16.vlgmr.msrb.gmra.mxu0 %v3219_v46 }
 0x5ff   : > { %3716 = vmatpush.bf16.msra.mxu0 %v6785_v34  ;;  %4027 = vmatpush.bf16.msra.mxu3 %v6815_v60  ;;  %v6839_v34 = vld [vmem:[#allocation6 + $0xbb8] sm:$0xff]  ;;  %v6832_v60 = vld [vmem:[#allocation6 + $0xb80] sm:$0xff] }
 0x603   : > { %3717 = vmatpush.bf16.msra.mxu0 %v6784_v37  ;;  %4028 = vmatpush.bf16.msra.mxu3 %v6814_v63  ;;  %v6846_v37 = vld [vmem:[#allocation6 + $0xbf0] sm:$0xff] }
 0x604   : > { %v6997_v63 = vld [vmem:[#allocation8 + $0x15] ss:$0 sm:$0xff] }
 0x607   : > { %4041 = vmatpush.bf16.msrb.mxu0 %v6823_v0  ;;  %v6849_v0 = vld [vmem:[#allocation6 + $0xc08] sm:$0xff] }
 0x60b   : > { %4042 = vmatpush.bf16.msrb.mxu0 %v6822_v4  ;;  %v6856_v4 = vld [vmem:[#allocation6 + $0xc40] sm:$0xff] }
 0x67b   : > { %v3377_v5 = vpop.f32.mrf.mxu0 }
 0x67c   : > { %v3378_v6 = vadd.f32 %v6991_v3, %v3377_v5 }
 0x67e   : > { %v3382_v8 = vmax.f32 %v3378_v6, 0.0 }
 0x680   : > { %3384 = vst [vmem:[#allocation2 + $0x8] sm:$0xff] %v3382_v8 }
 0x681   : > { %v3295_v36 = vpop.f32.mrf.mxu3 }
 0x682   : > { %v3296_v52 = vadd.f32 %v6992_v48, %v3295_v36  ;;  %v6838_v36 = vld [vmem:[#allocation6 + $0xbb0] sm:$0xff] }
 0x683   : > { %v3379_v9 = vpop.f32.mrf.mxu0 }
 0x684   : > { %v3380_v10 = vadd.f32 %v6991_v3, %v3379_v9  ;;  %v3300_v58 = vmax.f32 %v3296_v52, 0.0  ;;  %v6833_v52 = vld [vmem:[#allocation6 + $0xb88] sm:$0xff] }
 0x686   : > { %v3383_v11 = vmax.f32 %v3380_v10, 0.0  ;;  %v6995_v10 = vld [vmem:[#allocation9 + $0xb] ss:$0 sm:$0xff] }
 0x687   : > { %v3386_v13 = vld [vmem:[#allocation2 + $0x7] sm:$0xff] }
 0x688   : > { %3385 = vst [vmem:[#allocation2 + $0x10] sm:$0xff] %v3383_v11  ;;  %v3393_v12 = vpack.c.bf16 %v3383_v11, %v3382_v8  ;;  %v6813_v8 = vld [vmem:[#allocation6 + $0xae8] sm:$0xff] }
 0x689   : > { %v3297_v23 = vpop.f32.mrf.mxu3  ;;  %4029 = vmatpush.bf16.msra.mxu3 %v6813_v8 }
 0x68a   : > { %3611 = vmatmul.bf16.vlgmr.msrb.gmra.mxu2 %v3393_v12  ;;  %v3298_v59 = vadd.f32 %v6992_v48, %v3297_v23  ;;  %v6821_v12 = vld [vmem:[#allocation6 + $0xb28] sm:$0xff]  ;;  %v6836_v23 = vld [vmem:[#allocation6 + $0xba0] sm:$0xff]  ;;  %v6862_v48 = vld [vmem:[#allocation6 + $0xc70] sm:$0xff] }
 0x68b   : > { %4043 = vmatpush.bf16.msrb.mxu0 %v6821_v12 }
 0x68c   : > { %v3301_v5 = vmax.f32 %v3298_v59, 0.0  ;;  %v6859_v59 = vld [vmem:[#allocation6 + $0xc58] sm:$0xff] }
 0x68f   : > { %v3387_v14 = vld [vmem:[#allocation2 + $0xf] sm:$0xff] }
 0x690   : > { %v3390_v15 = vld [vmem:[#allocation2 + $0x9] sm:$0xff]  ;;  %v3391_v17 = vld [vmem:[#allocation2 + $0x11] sm:$0xff]  ;;  %v3392_v18 = vpack.c.bf16 %v3387_v14, %v3386_v13  ;;  %v6804_v14 = vld [vmem:[#allocation6 + $0xaa0] sm:$0xff] }
 0x691   : > { %v3394_v19 = vpack.c.bf16 %v3391_v17, %v3390_v15  ;;  %v6812_v15 = vld [vmem:[#allocation6 + $0xae0] sm:$0xff]  ;;  %4016 = vmatpush.bf16.msra.mxu2 %v6804_v14 }
 0x692   : > { %3597 = vmatmul.bf16.vlgmr.msrb.gmra.mxu1 %v3392_v18  ;;  %4030 = vmatpush.bf16.msra.mxu3 %v6812_v15 }
 0x693   : > { %3625 = vmatmul.bf16.vlgmr.msrb.gmra.mxu3 %v3394_v19  ;;  %4133 = vmatpush.bf16.msrb.mxu1 %v6831_v31  ;;  %v6820_v19 = vld [vmem:[#allocation6 + $0xb20] sm:$0xff]  ;;  %v6809_v31 = vld [vmem:[#allocation6 + $0xac8] sm:$0xff] }
 0x694   : > { %4044 = vmatpush.bf16.msrb.mxu0 %v6820_v19  ;;  %v6877_v19 = vld [vmem:[#allocation6 + $0xce8] sm:$0xff] }
 0x695   : > { %4017 = vmatpush.bf16.msra.mxu2 %v6803_v21 }
 0x696   : > { %4031 = vmatpush.bf16.msra.mxu3 %v6811_v24 }
 0x697   : > { %4134 = vmatpush.bf16.msrb.mxu1 %v6830_v33  ;;  %v6808_v33 = vld [vmem:[#allocation6 + $0xac0] sm:$0xff] }
 0x698   : > { %4045 = vmatpush.bf16.msrb.mxu0 %v6819_v25 }
 0x699   : > { %4018 = vmatpush.bf16.msra.mxu2 %v6802_v26 }
 0x69a   : > { %4032 = vmatpush.bf16.msra.mxu3 %v6810_v27 }
 0x69b   : > { %4135 = vmatpush.bf16.msrb.mxu1 %v6829_v35  ;;  %v6847_v35 = vld [vmem:[#allocation6 + $0xbf8] sm:$0xff] }
 0x69c   : > { %4046 = vmatpush.bf16.msrb.mxu0 %v6818_v28  ;;  %v6870_v28 = vld [vmem:[#allocation6 + $0xcb0] sm:$0xff] }
 0x69d   : > { %4019 = vmatpush.bf16.msra.mxu2 %v6801_v29  ;;  %v6876_v29 = vld [vmem:[#allocation6 + $0xce0] sm:$0xff] }
 0x69e   : > { %4033 = vmatpush.bf16.msra.mxu3 %v6809_v31 }
 0x69f   : > { %4136 = vmatpush.bf16.msrb.mxu1 %v6828_v38  ;;  %v6817_v38 = vld [vmem:[#allocation6 + $0xb08] sm:$0xff] }
 0x6a0   : > { %4047 = vmatpush.bf16.msrb.mxu0 %v6817_v38 }
 0x6a1   : > { %4020 = vmatpush.bf16.msra.mxu2 %v6800_v32 }
 0x6a2   : > { %4034 = vmatpush.bf16.msra.mxu3 %v6808_v33  ;;  %v6869_v33 = vld [vmem:[#allocation6 + $0xca8] sm:$0xff] }
 0x6a3   : > { %4137 = vmatpush.bf16.msrb.mxu1 %v6827_v40  ;;  %v6837_v40 = vld [vmem:[#allocation6 + $0xba8] sm:$0xff] }
 0x6a5   : > { %4555 = vmatpush.bf16.msrb.mxu2 %v6839_v34  ;;  %v6875_v34 = vld [vmem:[#allocation6 + $0xcd8] sm:$0xff] }
 0x6a6   : > { %4569 = vmatpush.bf16.msrb.mxu3 %v6847_v35  ;;  %v6868_v35 = vld [vmem:[#allocation6 + $0xca0] sm:$0xff] }
 0x6a7   : > { %4138 = vmatpush.bf16.msrb.mxu1 %v6826_v42  ;;  %v6845_v42 = vld [vmem:[#allocation6 + $0xbe8] sm:$0xff] }
 0x6a9   : > { %4556 = vmatpush.bf16.msrb.mxu2 %v6838_v36  ;;  %v6874_v36 = vld [vmem:[#allocation6 + $0xcd0] sm:$0xff] }
 0x6aa   : > { %4570 = vmatpush.bf16.msrb.mxu3 %v6846_v37 }
 0x6ab   : > { %4139 = vmatpush.bf16.msrb.mxu1 %v6825_v44  ;;  %v6855_v44 = vld [vmem:[#allocation6 + $0xc38] sm:$0xff] }
 0x6ad   : > { %4557 = vmatpush.bf16.msrb.mxu2 %v6837_v40 }
 0x6ae   : > { %4571 = vmatpush.bf16.msrb.mxu3 %v6845_v42 }
 0x6af   : > { %4140 = vmatpush.bf16.msrb.mxu1 %v6824_v47  ;;  %v6854_v47 = vld [vmem:[#allocation6 + $0xc30] sm:$0xff] }
 0x6b1   : > { %4558 = vmatpush.bf16.msrb.mxu2 %v6836_v23 }
 0x70d   : > { %v3612_v46 = vpop.f32.mrf.mxu2 }
 0x70f   : > { %v3598_v43 = vpop.f32.mrf.mxu1 }
 0x710   : > { %v3599_v16 = vadd.f32 %v6993_v22, %v3598_v43  ;;  %v6844_v43 = vld [vmem:[#allocation6 + $0xbe0] sm:$0xff] }
 0x711   : > { %4572 = vmatpush.bf16.msrb.mxu3 %v6844_v43 }
 0x712   : > { %v3613_v49 = vadd.f32 %v3612_v46, %v3599_v16  ;;  %v6863_v16 = vld [vmem:[#allocation6 + $0xc78] sm:$0xff] }
 0x713   : > { %v6835_v46 = vld [vmem:[#allocation6 + $0xb98] sm:$0xff] }
 0x714   : > { %4559 = vmatpush.bf16.msrb.mxu2 %v6835_v46  ;;  %v6873_v46 = vld [vmem:[#allocation6 + $0xcc8] sm:$0xff] }
 0x715   : > { %v3614_v57 = vpop.f32.mrf.mxu2 }
 0x716   : > { %v3626_v50 = vpop.f32.mrf.mxu3 }
 0x717   : > { %v3627_v53 = vadd.f32 %v3626_v50, %v3613_v49  ;;  %v3600_v51 = vpop.f32.mrf.mxu1  ;;  %v6834_v49 = vld [vmem:[#allocation6 + $0xb90] sm:$0xff] }
 0x718   : > { %v3601_v54 = vadd.f32 %v6993_v22, %v3600_v51  ;;  %v6816_v22 = vld [vmem:[#allocation6 + $0xb00] sm:$0xff]  ;;  %v6842_v50 = vld [vmem:[#allocation6 + $0xbd0] sm:$0xff]  ;;  %v6861_v51 = vld [vmem:[#allocation6 + $0xc68] sm:$0xff]  ;;  %4560 = vmatpush.bf16.msrb.mxu2 %v6834_v49 }
 0x719   : > { %v3631_v55 = vmax.f32 %v3627_v53, 0.0  ;;  %4048 = vmatpush.bf16.msrb.mxu0 %v6816_v22  ;;  %v6853_v53 = vld [vmem:[#allocation6 + $0xc28] sm:$0xff]  ;;  %v6872_v49 = vld [vmem:[#allocation6 + $0xcc0] sm:$0xff] }
 0x71a   : > { %v3615_v61 = vadd.f32 %v3614_v57, %v3601_v54  ;;  %v6841_v54 = vld [vmem:[#allocation6 + $0xbc8] sm:$0xff]  ;;  %v6840_v57 = vld [vmem:[#allocation6 + $0xbc0] sm:$0xff] }
 0x71b   : > { %v3633_v2 = vadd.f32 %v3631_v55, %v3300_v58  ;;  %v6852_v55 = vld [vmem:[#allocation6 + $0xc20] sm:$0xff]  ;;  %v6851_v58 = vld [vmem:[#allocation6 + $0xc18] sm:$0xff] }
 0x71c   : > { %4561 = vmatpush.bf16.msrb.mxu2 %v6833_v52 }
 0x71d   : > { %v3637_v9 = vmul.f32 %v6994_v30, %v3633_v2 }
 0x71e   : > { %v3628_v1 = vpop.f32.mrf.mxu3 }
 0x71f   : > { %v3629_v3 = vadd.f32 %v3628_v1, %v3615_v61  ;;  %v3641_v17 = vadd.f32 %v6995_v10, %v3637_v9  ;;  %v6850_v61 = vld [vmem:[#allocation6 + $0xc10] sm:$0xff]  ;;  %v6857_v1 = vld [vmem:[#allocation6 + $0xc48] sm:$0xff]  ;;  %v6879_v9 = vld [vmem:[#allocation6 + $0xcf8] sm:$0xff] }
 0x720   : > { %4562 = vmatpush.bf16.msrb.mxu2 %v6832_v60 }
 0x721   : > { %v3632_v6 = vmax.f32 %v3629_v3, 0.0 }
 0x723   : > { %v3634_v11 = vadd.f32 %v3632_v6, %v3301_v5 }
 0x725   : > { %v3638_v13 = vmul.f32 %v6994_v30, %v3634_v11  ;;  %v6848_v30 = vld [vmem:[#allocation6 + $0xc00] sm:$0xff] }
 0x727   : > { %v3642_v18 = vadd.f32 %v6995_v10, %v3638_v13  ;;  %v6998_v10 = vld [vmem:[#allocation8 + $0x17] ss:$0 sm:$0xff] }
 0x728   : > { %v6878_v13 = vld [vmem:[#allocation6 + $0xcf0] sm:$0xff] }
 0x729   : > { %v3643_v20 = vpack.c.bf16 %v3642_v18, %v3641_v17  ;;  %v6871_v18 = vld [vmem:[#allocation6 + $0xcb8] sm:$0xff] }
 0x72b   : > { %3718 = vmatmul.bf16.vlgmr.msra.gmra.mxu0 %v3643_v20  ;;  %3800 = vmatmul.bf16.vlgmr.msra.gmra.mxu1 %v3643_v20 }
 0x72c   : > { %4583 = vmatpush.bf16.msra.mxu0 %v6855_v44  ;;  %4597 = vmatpush.bf16.msra.mxu1 %v6863_v16  ;;  %v6867_v16 = vld [vmem:[#allocation6 + $0xc98] sm:$0xff] }
 0x730   : > { %4584 = vmatpush.bf16.msra.mxu0 %v6854_v47  ;;  %4598 = vmatpush.bf16.msra.mxu1 %v6862_v48  ;;  %v6866_v48 = vld [vmem:[#allocation6 + $0xc90] sm:$0xff] }
 0x734   : > { %4585 = vmatpush.bf16.msra.mxu0 %v6853_v53  ;;  %4599 = vmatpush.bf16.msra.mxu1 %v6861_v51  ;;  %v6864_v53 = vld [vmem:[#allocation6 + $0xc80] sm:$0xff] }
 0x738   : > { %4586 = vmatpush.bf16.msra.mxu0 %v6852_v55  ;;  %4600 = vmatpush.bf16.msra.mxu1 %v6860_v56 }
 0x73b   : > { %4141 = vmatmul.bf16.vlgmr.msrb.gmra.mxu1 %v7381_v41  ;;  %v6843_v41 = vld [vmem:[#allocation6 + $0xbd8] sm:$0xff] }
 0x73c   : > { %4573 = vmatpush.bf16.msrb.mxu3 %v6843_v41  ;;  %4587 = vmatpush.bf16.msra.mxu0 %v6851_v58 }
 0x73d   : > { %4601 = vmatpush.bf16.msra.mxu1 %v6859_v59 }
 0x740   : > { %4574 = vmatpush.bf16.msrb.mxu3 %v6842_v50  ;;  %4588 = vmatpush.bf16.msra.mxu0 %v6850_v61  ;;  %v6865_v50 = vld [vmem:[#allocation6 + $0xc88] sm:$0xff] }
 0x741   : > { %4602 = vmatpush.bf16.msra.mxu1 %v6858_v62 }
 0x744   : > { %4575 = vmatpush.bf16.msrb.mxu3 %v6841_v54  ;;  %4589 = vmatpush.bf16.msra.mxu0 %v6849_v0 }
 0x745   : > { %4603 = vmatpush.bf16.msra.mxu1 %v6857_v1 }
 0x748   : > { %4576 = vmatpush.bf16.msrb.mxu3 %v6840_v57  ;;  %4590 = vmatpush.bf16.msra.mxu0 %v6848_v30 }
 0x749   : > { %4604 = vmatpush.bf16.msra.mxu1 %v6856_v4  ;;  %v6996_v4 = vld [vmem:[#allocation8 + $0x14] ss:$0 sm:$0xff] }
 0x7a8   : > { %v3801_v2 = vpop.f32.mrf.mxu1  ;;  %v3719_v57 = vpop.f32.mrf.mxu0 }
 0x7a9   : > { %v3802_v3 = vadd.f32 %v6997_v63, %v3801_v2 }
 0x7ab   : > { %v3806_v5 = vmax.f32 %v3802_v3, 0.0 }
 0x7ad   : > { %3808 = vst [vmem:[#allocation2 + $0x8] sm:$0xff] %v3806_v5 }
 0x7b0   : > { %v3803_v6 = vpop.f32.mrf.mxu1  ;;  %v3721_v58 = vpop.f32.mrf.mxu0 }
 0x7b1   : > { %v3804_v7 = vadd.f32 %v6997_v63, %v3803_v6  ;;  %v6999_v63 = vld [vmem:[#allocation8 + $0x16] ss:$0 sm:$0xff] }
 0x7b3   : > { %v3807_v8 = vmax.f32 %v3804_v7, 0.0 }
 0x7b4   : > { %v3810_v17 = vld [vmem:[#allocation2 + $0x7] sm:$0xff] }
 0x7b5   : > { %3809 = vst [vmem:[#allocation2 + $0x10] sm:$0xff] %v3807_v8  ;;  %v3817_v11 = vpack.c.bf16 %v3807_v8, %v3806_v5  ;;  %v7001_v5 = vld [vmem:[#allocation8 + $0x18] ss:$0 sm:$0xff] }
 0x7b7   : > { %4035 = vmatmul.bf16.vlgmr.msra.gmra.mxu3 %v3817_v11 }
 0x7b8   : > { %v4142_v12 = vpop.f32.mrf.mxu1  ;;  %4625 = vmatpush.bf16.msra.mxu3 %v6879_v9 }
 0x7b9   : > { %v4143_v14 = vadd.f32 %v6998_v10, %v4142_v12 }
 0x7bb   : > { %v4147_v15 = vmax.f32 %v4143_v14, 0.0 }
 0x7bc   : > { %v3811_v20 = vld [vmem:[#allocation2 + $0xf] sm:$0xff]  ;;  %4626 = vmatpush.bf16.msra.mxu3 %v6878_v13 }
 0x7bd   : > { %v3814_v21 = vld [vmem:[#allocation2 + $0x9] sm:$0xff]  ;;  %v3815_v24 = vld [vmem:[#allocation2 + $0x11] sm:$0xff]  ;;  %v3816_v25 = vpack.c.bf16 %v3811_v20, %v3810_v17 }
 0x7be   : > { %v3818_v26 = vpack.c.bf16 %v3815_v24, %v3814_v21  ;;  %4149 = vst [vmem:[#allocation2 + $0x8] sm:$0xff] %v4147_v15  ;;  %v7000_v21 = vld [vmem:[#allocation9 + $0xc] ss:$0 sm:$0xff] }
 0x7bf   : > { %4021 = vmatmul.bf16.vlgmr.msra.gmra.mxu2 %v3816_v25  ;;  %v3722_v25 = vadd.f32 %v6996_v4, %v3721_v58 }
 0x7c0   : > { %4049 = vmatmul.bf16.vlgmr.msrb.gmra.mxu0 %v3818_v26  ;;  %v4144_v27 = vpop.f32.mrf.mxu1  ;;  %4611 = vmatpush.bf16.msra.mxu2 %v6871_v18 }
 0x7c1   : > { %4627 = vmatpush.bf16.msra.mxu3 %v6877_v19  ;;  %v4145_v31 = vadd.f32 %v6998_v10, %v4144_v27  ;;  %v3720_v10 = vadd.f32 %v6996_v4, %v3719_v57 }
 0x7c3   : > { %v4148_v32 = vmax.f32 %v4145_v31, 0.0  ;;  %v3724_v14 = vmax.f32 %v3720_v10, 0.0 }
 0x7c4   : > { %4612 = vmatpush.bf16.msra.mxu2 %v6870_v28 }
 0x7c5   : > { %4628 = vmatpush.bf16.msra.mxu3 %v6876_v29  ;;  %4150 = vst [vmem:[#allocation2 + $0x10] sm:$0xff] %v4148_v32  ;;  %v4151_v37 = vld [vmem:[#allocation2 + $0x6] sm:$0xff]  ;;  %v4165_v41 = vpack.c.bf16 %v4148_v32, %v4147_v15 }
 0x7c6   : > { %v4153_v38 = vld [vmem:[#allocation2 + $0x7] sm:$0xff] }
 0x7c7   : > { %v7003_v32 = vld [vmem:[#allocation9 + $0xd] ss:$0 sm:$0xff] }
 0x7c8   : > { %4613 = vmatpush.bf16.msra.mxu2 %v6869_v33  ;;  %v3725_v33 = vmax.f32 %v3722_v25, 0.0 }
 0x7c9   : > { %4629 = vmatpush.bf16.msra.mxu3 %v6875_v34 }
 0x7cc   : > { %4614 = vmatpush.bf16.msra.mxu2 %v6868_v35  ;;  %v4152_v40 = vld [vmem:[#allocation2 + $0xe] sm:$0xff] }
 0x7cd   : > { %v4154_v42 = vld [vmem:[#allocation2 + $0xf] sm:$0xff]  ;;  %4630 = vmatpush.bf16.msra.mxu3 %v6874_v36  ;;  %v4163_v23 = vpack.c.bf16 %v4152_v40, %v4151_v37 }
 0x7ce   : > { %v4157_v22 = vld [vmem:[#allocation2 + $0x9] sm:$0xff]  ;;  %v4164_v43 = vpack.c.bf16 %v4154_v42, %v4153_v38  ;;  %v4158_v44 = vld [vmem:[#allocation2 + $0x11] sm:$0xff] }
 0x7cf   : > { %v4166_v47 = vpack.c.bf16 %v4158_v44, %v4157_v22  ;;  %4563 = vmatmul.bf16.vlgmr.msrb.gmra.mxu2 %v4163_v23  ;;  %v4161_v51 = vld [vmem:[#allocation2 + $0xb] sm:$0xff]  ;;  %v4162_v52 = vld [vmem:[#allocation2 + $0x13] sm:$0xff] }
 0x7d0   : > { %4577 = vmatmul.bf16.vlgmr.msrb.gmra.mxu3 %v4164_v43  ;;  %4591 = vmatmul.bf16.vlgmr.msra.gmra.mxu0 %v4165_v41  ;;  %v4159_v54 = vld [vmem:[#allocation2 + $0xa] sm:$0xff]  ;;  %v4160_v55 = vld [vmem:[#allocation2 + $0x12] sm:$0xff]  ;;  %v4168_v56 = vpack.c.bf16 %v4162_v52, %v4161_v51 }
 0x7d1   : > { %4605 = vmatmul.bf16.vlgmr.msra.gmra.mxu1 %v4166_v47  ;;  %4615 = vmatpush.bf16.msra.mxu2 %v6867_v16  ;;  %v4167_v60 = vpack.c.bf16 %v4160_v55, %v4159_v54  ;;  %v7004_v41 = vld [vmem:[#allocation9 + $0xe] ss:$0 sm:$0xff] }
 0x7d2   : > { %4631 = vmatpush.bf16.msra.mxu3 %v6873_v46 }
 0x7d5   : > { %4616 = vmatpush.bf16.msra.mxu2 %v6866_v48 }
 0x7d6   : > { %4632 = vmatpush.bf16.msra.mxu3 %v6872_v49  ;;  %v7005_v49 = vld [vmem:[#allocation9 + $0xf] ss:$0 sm:$0xff] }
 0x7d9   : > { %4617 = vmatpush.bf16.msra.mxu2 %v6865_v50 }
 0x7dd   : > { %4618 = vmatpush.bf16.msra.mxu2 %v6864_v53 }
 0x7e0   : > { %4633 = vmatmul.bf16.vlgmr.msra.gmra.mxu3 %v4168_v56  ;;  %4619 = vmatmul.bf16.vlgmr.msra.gmra.mxu2 %v4167_v60 }
 0x83a   : > { %v4036_v59 = vpop.f32.mrf.mxu3 }
 0x83d   : > { %v4050_v62 = vpop.f32.mrf.mxu0 }
 0x842   : > { %v4022_v61 = vpop.f32.mrf.mxu2  ;;  %v4038_v1 = vpop.f32.mrf.mxu3 }
 0x843   : > { %v4023_v2 = vadd.f32 %v6999_v63, %v4022_v61 }
 0x845   : > { %v4037_v30 = vadd.f32 %v4036_v59, %v4023_v2  ;;  %v4052_v3 = vpop.f32.mrf.mxu0 }
 0x847   : > { %v4051_v8 = vadd.f32 %v4050_v62, %v4037_v30 }
 0x849   : > { %v4055_v12 = vmax.f32 %v4051_v8, 0.0 }
 0x84a   : > { %v4024_v0 = vpop.f32.mrf.mxu2 }
 0x84b   : > { %v4025_v9 = vadd.f32 %v6999_v63, %v4024_v0  ;;  %v4057_v20 = vadd.f32 %v4055_v12, %v3724_v14 }
 0x84d   : > { %v4039_v13 = vadd.f32 %v4038_v1, %v4025_v9  ;;  %v4592_v19 = vpop.f32.mrf.mxu0  ;;  %v4061_v29 = vmul.f32 %v7000_v21, %v4057_v20 }
 0x84e   : > { %v4606_v28 = vpop.f32.mrf.mxu1 }
 0x84f   : > { %v4053_v24 = vadd.f32 %v4052_v3, %v4039_v13  ;;  %v4065_v42 = vadd.f32 %v7003_v32, %v4061_v29 }
 0x851   : > { %v4056_v31 = vmax.f32 %v4053_v24, 0.0  ;;  %v4647_v46 = vadd.f32 %v7410_v39, %v4065_v42 }
 0x852   : > { %v4564_v6 = vpop.f32.mrf.mxu2 }
 0x853   : > { %v4578_v7 = vpop.f32.mrf.mxu3  ;;  %v4565_v11 = vadd.f32 %v7001_v5, %v4564_v6  ;;  %v4058_v38 = vadd.f32 %v4056_v31, %v3725_v33 }
 0x855   : > { %v4579_v15 = vadd.f32 %v4578_v7, %v4565_v11  ;;  %v4594_v22 = vpop.f32.mrf.mxu0  ;;  %v4062_v44 = vmul.f32 %v7000_v21, %v4058_v38 }
 0x856   : > { %v4608_v47 = vpop.f32.mrf.mxu1 }
 0x857   : > { %v4593_v26 = vadd.f32 %v4592_v19, %v4579_v15  ;;  %v4066_v54 = vadd.f32 %v7003_v32, %v4062_v44 }
 0x859   : > { %v4607_v35 = vadd.f32 %v4606_v28, %v4593_v26  ;;  %v4648_v57 = vadd.f32 %v7413_v45, %v4066_v54 }
 0x85a   : > { %v4566_v17 = vpop.f32.mrf.mxu2 }
 0x85b   : > { %v4580_v18 = vpop.f32.mrf.mxu3  ;;  %v4567_v27 = vadd.f32 %v7001_v5, %v4566_v17 }
 0x85d   : > { %v4581_v34 = vadd.f32 %v4580_v18, %v4567_v27 }
 0x85f   : > { %v4595_v23 = vadd.f32 %v4594_v22, %v4581_v34 }
 0x861   : > { %v4609_v50 = vadd.f32 %v4608_v47, %v4595_v23 }
 0x863   : > { %v4620_v36 = vpop.f32.mrf.mxu2  ;;  %v4634_v37 = vpop.f32.mrf.mxu3 }
 0x864   : > { %v4621_v40 = vadd.f32 %v4620_v36, %v4607_v35 }
 0x866   : > { %v4635_v43 = vadd.f32 %v4634_v37, %v4621_v40 }
 0x868   : > { %v4639_v16 = vmax.f32 %v4635_v43, 0.0 }
 0x86a   : > { %v4649_v48 = vadd.f32 %v4647_v46, %v4639_v16 }
 0x86b   : > { %v4622_v53 = vpop.f32.mrf.mxu2  ;;  %v4636_v55 = vpop.f32.mrf.mxu3 }
 0x86c   : > { %v4653_v51 = vmul.f32 %v7004_v41, %v4649_v48  ;;  %v4623_v52 = vadd.f32 %v4622_v53, %v4609_v50 }
 0x86e   : > { %v4657_v56 = vadd.f32 %v7005_v49, %v4653_v51  ;;  %v4637_v60 = vadd.f32 %v4636_v55, %v4623_v52 }
 0x870   : > { %4659 = vst [vmem:[%s267_s13] sm:$0xff] %v4657_v56  ;;  %v4640_v39 = vmax.f32 %v4637_v60, 0.0 }
 0x872   : > { %v4650_v58 = vadd.f32 %v4648_v57, %v4640_v39 }
 0x874   : > { %v4654_v59 = vmul.f32 %v7004_v41, %v4650_v58 }
 0x876   : > { %v4658_v61 = vadd.f32 %v7005_v49, %v4654_v59 }
 0x878   : > { %4660 = vst [vmem:[%s267_s13 + $0x8] sm:$0xff] %v4658_v61 }
 0x879   : > { %7153 = shalt.err (!%p7150_p10)
}
 0x87a   : > { %s7210_s29 = smov 128   ;;  %s7211_s27 = smov 8  }
 0x87b   : > { %6895 = dma.vmem_to_hbm [thread:$0]  (%p7325_p3), %s4675_s20, 256, %s4677_s23, %s4662_s19, %s7210_s29, %s7210_s29, %s7211_s27  }
 0x87c PF: > { %s4691_s28 = sand.u32 1, %s7188_s15   ;;  %p7464_p12 = scmp.ge.s32.totalorder %s7200_s18, 2 }
 0x87d   : > { %s4692_s21 = scalar_lea.sflag [#allocation5], %s4691_s28 }
 0x87e   : > { %p6912_p13 = pnand %p7464_p12, %p7272_p6 }
 0x880   : > { %p6913_p0 = pneg %p6912_p13 }
 0x882   : > { %7183 = dma.done.wait (%p6913_p0), %s4692_s21, 256  }
 0x883   : > { %7185 = vsyncadd (%p6913_p0), %s4692_s21, 4294967040  ;;  %p19_p5 = scmp.ge.s32.totalorder %s7312_s25, 4   ;;  %s7465_s15 = smov %s7192_s16 }
 0x884   : > { %s7466_s16 = smov %s7196_s17  ;;  %s7467_s17 = smov %s7321_s30 }
 0x885   : > { %s7468_s18 = smov %s7312_s25  ;;  %21 = sbr.rel (!%p19_p5) target bundleno = 7 (0x7), region = 93 }
 0x88a   :  { %4698 = vsyncpa [#allocation4], 1 }
 0x88b   :  { %4700 = vsyncpa [#allocation4 + $0x1], 1 }
 0x88c   :  { %4701 = vsyncpa [#allocation7], 1 }
 0x88d   :  { %4702 = vsyncpa [#allocation10], 1 }
 0x88e   :  { %4703 = vsyncpa [#allocation5], 1 }
 0x88f   :  { %4705 = vsyncpa [#allocation5 + $0x1], 1 }

</bundles_post_ra>
